<compile_context>
chip_gen: v7x
topology: tpu7x:2x2x1
jax: 0.10.0
libtpu: 0.0.40
codegen_flags: <defaults>
</compile_context>

<pallas_src>
import math

import jax
import jax.numpy as jnp
from jax.experimental import pallas as pl
from jax.experimental.pallas import tpu as pltpu


def without_keys(x, keys):
    return {key: x[key] for key in x if key not in keys}


# --------------------------- planning helpers ---------------------------

def _roundup(x, m):
    return ((x + m - 1) // m) * m


def _sublane_multiple(itemsize):
    # f32 -> 8 sublanes, bf16 -> 16, int8/fp8 -> 32 (packed sublanes).
    return max(8, 32 // max(int(itemsize), 1))


def _vmem_capacity_bytes():
    try:
        cap = int(getattr(pltpu.get_tpu_info(), "vmem_capacity_bytes", 0))
        if cap > 0:
            return cap
    except Exception:
        pass
    # Fallback keyed on device kind: only v7x has 64 MiB per TensorCore.
    try:
        kind = jax.devices()[0].device_kind.lower()
    except Exception:
        kind = ""
    return (64 << 20) if "v7" in kind else (128 << 20)


def _choose_fold(n_rows, out_dim, itemsize, max_fold=32):
    """Fold k rows into the lane axis so the output store becomes lane-dense."""
    if out_dim % 128 == 0 or n_rows <= 1:
        return 1
    ideal = 128 // math.gcd(out_dim, 128)  # smallest k with (k*out_dim) % 128 == 0
    if ideal <= max_fold and n_rows % ideal == 0:
        return ideal
    sub = _sublane_multiple(itemsize)      # partial densification fallback
    if sub <= max_fold and n_rows % sub == 0:
        return sub
    return 1


def _plan_row_tiling(n_rows, in_widths, out_width, itemsize,
                     target_step_bytes=4 << 20):
    """Pick rows-per-grid-step.  Returns (tile_rows, vmem_usage_bytes)."""
    sub = _sublane_multiple(itemsize)
    pad = lambda w: _roundup(w, 128)                       # 128-lane VMEM padding
    padded_row_vmem = (sum(pad(w) for w in in_widths) + pad(out_width)) * itemsize
    hbm_row_bytes = (sum(in_widths) + out_width) * itemsize
    total_hbm = n_rows * hbm_row_bytes

    # Double-buffered in/out blocks + one out-width temporary (concat result).
    per_row_cost = 2 * padded_row_vmem + pad(out_width) * itemsize
    vmem_budget = (_vmem_capacity_bytes() * 3) // 5        # ~60% of physical VMEM
    rows_cap = vmem_budget // max(per_row_cost, 1)

    # Small total work: one full-extent block (VMEM-checked, width-aware).
    if total_hbm <= target_step_bytes and n_rows <= rows_cap:
        return n_rows, n_rows * per_row_cost

    # Bytes-based step size: ~target_step_bytes of HBM traffic per grid step.
    rows_target = max(1, target_step_bytes // max(hbm_row_bytes, 1))
    rows_per_step = min(rows_target, max(rows_cap, 1))
    rows_per_step = max(sub, (rows_per_step // sub) * sub)

    # Balanced, even number of steps (>=2) so v7x's two TensorCores split it.
    num = max(2, pl.cdiv(n_rows, rows_per_step))
    if num % 2:
        num += 1
    tile_r = _roundup(pl.cdiv(n_rows, num), sub)
    tile_r = min(tile_r, max(sub, (rows_cap // sub) * sub))  # stay under VMEM
    tile_r = min(tile_r, n_rows)
    # TODO(synk): <8 rows with multi-MiB-wide rows would additionally need
    # feature-axis tiling; irrelevant for this module's state-vector inputs.
    return tile_r, tile_r * per_row_cost


# ------------------------------ kernels --------------------------------

def _make_copy_kernel(dims, fold, aligned):
    n_inputs = len(dims)

    if aligned:
        # Every width (and hence every output column offset) is a multiple of
        # 128: store each input straight into its output slice -- all stores
        # are unmasked lane-dense vst, no full-width concat temporary.
        def kernel(*refs):
            in_refs, out_ref = refs[:n_inputs], refs[n_inputs]
            off = 0
            for r, d in zip(in_refs, dims):
                out_ref[:, off:off + d] = r[...]
                off += d
        return kernel

    def kernel(*refs):
        in_refs, out_ref = refs[:n_inputs], refs[n_inputs]
        loaded = [r[...] for r in in_refs]
        if fold == 1:
            pieces = loaded
        else:
            # Row-fold interleave: piece (j, m) lands at column
            # j*out_dim + offset_m, matching cat(dim=-1) after the wrapper's
            # contiguous un-fold reshape.
            pieces = [v[:, j * d:(j + 1) * d]
                      for j in range(fold)
                      for v, d in zip(loaded, dims)]
        out_ref[...] = jnp.concatenate(pieces, axis=-1)  # single wide store
    return kernel


# ------------------------------ wrapper ---------------------------------

def cat_all_encoder(x: dict, excluded_keys=(), *, min_pallas_bytes=256 << 10):
    """Pallas implementation of CatAllEncoder.forward."""
    x = without_keys(x, excluded_keys)
    vals = list(x.values())
    assert len(vals) > 0, "CatAllEncoder needs at least one non-excluded input"

    lead_shape = vals[0].shape[:-1]
    for v in vals:
        assert v.shape[:-1] == lead_shape, "leading dims must match for cat(dim=-1)"

    # torch.cat-style dtype promotion (wrapper-side).
    dtype = jnp.result_type(*[v.dtype for v in vals])
    vals = [v.astype(dtype) for v in vals]
    dims = [int(v.shape[-1]) for v in vals]
    out_dim = sum(dims)
    n_rows = int(math.prod(lead_shape)) if lead_shape else 1
    itemsize = jnp.dtype(dtype).itemsize

    total_hbm_bytes = 2 * n_rows * out_dim * itemsize  # read all + write out

    # Tiny / single-input cats: XLA's fused concatenate beats a custom call.
    if len(vals) == 1:
        return vals[0]
    if n_rows == 0 or total_hbm_bytes < min_pallas_bytes:
        return jnp.concatenate(vals, axis=-1)

    # Lane-densify narrow feature dims by folding rows into the lane axis.
    fold = _choose_fold(n_rows, out_dim, itemsize)
    g_rows = n_rows // fold
    in_widths = [fold * d for d in dims]
    out_width = fold * out_dim
    flat = [v.reshape(g_rows, w) for v, w in zip(vals, in_widths)]  # free reshapes

    aligned = fold == 1 and all(d % 128 == 0 for d in dims)

    tile_r, usage = _plan_row_tiling(g_rows, in_widths, out_width, itemsize)
    grid = (pl.cdiv(g_rows, tile_r),)

    cap = _vmem_capacity_bytes()
    vmem_limit = int(min(cap * 9 // 10, max(32 << 20, usage * 5 // 4)))

    out_flat = pl.pallas_call(
        _make_copy_kernel(dims, fold, aligned),
        out_shape=jax.ShapeDtypeStruct((g_rows, out_width), dtype),
        grid=grid,
        in_specs=[pl.BlockSpec((tile_r, w), lambda i: (i, 0)) for w in in_widths],
        out_specs=pl.BlockSpec((tile_r, out_width), lambda i: (i, 0)),
        compiler_params=pltpu.CompilerParams(
            dimension_semantics=("parallel",),
            vmem_limit_bytes=vmem_limit,
        ),
    )(*flat)

    return out_flat.reshape(*lead_shape, out_dim)


# ------------------------------- demo -----------------------------------

if __name__ == "__main__":
    root = jax.random.PRNGKey(0)
    k1, k2, k3, k4, k5, k6, k7, k8, k9, k10 = jax.random.split(root, 10)

    # Case 1: small shapes matching the module's typical use; takes the XLA
    # fallback path (tiny total bytes) and checks key exclusion.
    B, T = 2, 8
    x1 = {
        "agent_pos":   jax.random.normal(k1, (B, T, 16), dtype=jnp.float32),
        "gripper":     jax.random.normal(k2, (B, T, 8),  dtype=jnp.float32),
        "obs_feature": jax.random.normal(k3, (B, T, 32), dtype=jnp.float32),
        "debug_extra": jax.random.normal(k4, (B, T, 4),  dtype=jnp.float32),
    }
    out1 = jax.block_until_ready(cat_all_encoder(x1, excluded_keys=("debug_extra",)))
    ref1 = jnp.concatenate([v for k, v in x1.items() if k != "debug_extra"], axis=-1)
    assert out1.shape == ref1.shape and jnp.allclose(out1, ref1)

    # Case 2: narrow feature dims, 1200 rows -> Pallas path with row folding
    # (out_dim=56, fold=16 -> lane-dense 896-wide stores), single block.
    B2, T2 = 3, 400
    x2 = {
        "a": jax.random.normal(k5, (B2, T2, 16), dtype=jnp.float32),
        "b": jax.random.normal(k6, (B2, T2, 8),  dtype=jnp.float32),
        "c": jax.random.normal(k7, (B2, T2, 32), dtype=jnp.float32),
    }
    out2 = jax.block_until_ready(cat_all_encoder(x2))
    ref2 = jnp.concatenate(list(x2.values()), axis=-1)
    assert out2.shape == ref2.shape and jnp.allclose(out2, ref2)

    # Case 3: 128-aligned feature dims, 2048 rows -> Pallas path with direct
    # per-slice lane-dense stores and a balanced 2-step "parallel" grid.
    B3, T3 = 2, 1024
    x3 = {
        "p": jax.random.normal(k8,  (B3, T3, 128), dtype=jnp.float32),
        "q": jax.random.normal(k9,  (B3, T3, 256), dtype=jnp.float32),
        "r": jax.random.normal(k10, (B3, T3, 128), dtype=jnp.float32),
    }
    out3 = jax.block_until_ready(cat_all_encoder(x3))
    ref3 = jnp.concatenate(list(x3.values()), axis=-1)
    assert out3.shape == ref3.shape and jnp.allclose(out3, ref3)

    print("KERNEL_OK")
</pallas_src>

<mosaic_0001>
module attributes {stable_mosaic.version = 11 : i64} {
  func.func @kernel(%arg0: i32, %arg1: memref<75x256xf32, #tpu.memory_space<vmem>>, %arg2: memref<75x128xf32, #tpu.memory_space<vmem>>, %arg3: memref<75x512xf32, #tpu.memory_space<vmem>>, %arg4: memref<75x896xf32, #tpu.memory_space<vmem>>) attributes {dimension_semantics = [#tpu.dimension_semantics<parallel>], iteration_bounds = array<i64: 1>, scalar_prefetch = 0 : i64, scratch_operands = 0 : i64, tpu.core_type = #tpu.core_type<tc>, window_params = [{transform_indices = @transform_0, window_bounds = array<i64: 75, 256>}, {transform_indices = @transform_1, window_bounds = array<i64: 75, 128>}, {transform_indices = @transform_2, window_bounds = array<i64: 75, 512>}, {transform_indices = @transform_3, window_bounds = array<i64: 75, 896>}]} {
    %c0 = arith.constant 0 : index
    %c0_0 = arith.constant 0 : index
    %0 = vector.load %arg1[%c0, %c0_0] : memref<75x256xf32, #tpu.memory_space<vmem>>, vector<75x256xf32>
    %c0_1 = arith.constant 0 : index
    %c0_2 = arith.constant 0 : index
    %1 = vector.load %arg2[%c0_1, %c0_2] : memref<75x128xf32, #tpu.memory_space<vmem>>, vector<75x128xf32>
    %c0_3 = arith.constant 0 : index
    %c0_4 = arith.constant 0 : index
    %2 = vector.load %arg3[%c0_3, %c0_4] : memref<75x512xf32, #tpu.memory_space<vmem>>, vector<75x512xf32>
    %3 = vector.extract_strided_slice %0 {offsets = [0, 0], sizes = [75, 16], strides = [1, 1]} : vector<75x256xf32> to vector<75x16xf32>
    %4 = vector.extract_strided_slice %1 {offsets = [0, 0], sizes = [75, 8], strides = [1, 1]} : vector<75x128xf32> to vector<75x8xf32>
    %5 = vector.extract_strided_slice %2 {offsets = [0, 0], sizes = [75, 32], strides = [1, 1]} : vector<75x512xf32> to vector<75x32xf32>
    %6 = vector.extract_strided_slice %0 {offsets = [0, 16], sizes = [75, 16], strides = [1, 1]} : vector<75x256xf32> to vector<75x16xf32>
    %7 = vector.extract_strided_slice %1 {offsets = [0, 8], sizes = [75, 8], strides = [1, 1]} : vector<75x128xf32> to vector<75x8xf32>
    %8 = vector.extract_strided_slice %2 {offsets = [0, 32], sizes = [75, 32], strides = [1, 1]} : vector<75x512xf32> to vector<75x32xf32>
    %9 = vector.extract_strided_slice %0 {offsets = [0, 32], sizes = [75, 16], strides = [1, 1]} : vector<75x256xf32> to vector<75x16xf32>
    %10 = vector.extract_strided_slice %1 {offsets = [0, 16], sizes = [75, 8], strides = [1, 1]} : vector<75x128xf32> to vector<75x8xf32>
    %11 = vector.extract_strided_slice %2 {offsets = [0, 64], sizes = [75, 32], strides = [1, 1]} : vector<75x512xf32> to vector<75x32xf32>
    %12 = vector.extract_strided_slice %0 {offsets = [0, 48], sizes = [75, 16], strides = [1, 1]} : vector<75x256xf32> to vector<75x16xf32>
    %13 = vector.extract_strided_slice %1 {offsets = [0, 24], sizes = [75, 8], strides = [1, 1]} : vector<75x128xf32> to vector<75x8xf32>
    %14 = vector.extract_strided_slice %2 {offsets = [0, 96], sizes = [75, 32], strides = [1, 1]} : vector<75x512xf32> to vector<75x32xf32>
    %15 = vector.extract_strided_slice %0 {offsets = [0, 64], sizes = [75, 16], strides = [1, 1]} : vector<75x256xf32> to vector<75x16xf32>
    %16 = vector.extract_strided_slice %1 {offsets = [0, 32], sizes = [75, 8], strides = [1, 1]} : vector<75x128xf32> to vector<75x8xf32>
    %17 = vector.extract_strided_slice %2 {offsets = [0, 128], sizes = [75, 32], strides = [1, 1]} : vector<75x512xf32> to vector<75x32xf32>
    %18 = vector.extract_strided_slice %0 {offsets = [0, 80], sizes = [75, 16], strides = [1, 1]} : vector<75x256xf32> to vector<75x16xf32>
    %19 = vector.extract_strided_slice %1 {offsets = [0, 40], sizes = [75, 8], strides = [1, 1]} : vector<75x128xf32> to vector<75x8xf32>
    %20 = vector.extract_strided_slice %2 {offsets = [0, 160], sizes = [75, 32], strides = [1, 1]} : vector<75x512xf32> to vector<75x32xf32>
    %21 = vector.extract_strided_slice %0 {offsets = [0, 96], sizes = [75, 16], strides = [1, 1]} : vector<75x256xf32> to vector<75x16xf32>
    %22 = vector.extract_strided_slice %1 {offsets = [0, 48], sizes = [75, 8], strides = [1, 1]} : vector<75x128xf32> to vector<75x8xf32>
    %23 = vector.extract_strided_slice %2 {offsets = [0, 192], sizes = [75, 32], strides = [1, 1]} : vector<75x512xf32> to vector<75x32xf32>
    %24 = vector.extract_strided_slice %0 {offsets = [0, 112], sizes = [75, 16], strides = [1, 1]} : vector<75x256xf32> to vector<75x16xf32>
    %25 = vector.extract_strided_slice %1 {offsets = [0, 56], sizes = [75, 8], strides = [1, 1]} : vector<75x128xf32> to vector<75x8xf32>
    %26 = vector.extract_strided_slice %2 {offsets = [0, 224], sizes = [75, 32], strides = [1, 1]} : vector<75x512xf32> to vector<75x32xf32>
    %27 = vector.extract_strided_slice %0 {offsets = [0, 128], sizes = [75, 16], strides = [1, 1]} : vector<75x256xf32> to vector<75x16xf32>
    %28 = vector.extract_strided_slice %1 {offsets = [0, 64], sizes = [75, 8], strides = [1, 1]} : vector<75x128xf32> to vector<75x8xf32>
    %29 = vector.extract_strided_slice %2 {offsets = [0, 256], sizes = [75, 32], strides = [1, 1]} : vector<75x512xf32> to vector<75x32xf32>
    %30 = vector.extract_strided_slice %0 {offsets = [0, 144], sizes = [75, 16], strides = [1, 1]} : vector<75x256xf32> to vector<75x16xf32>
    %31 = vector.extract_strided_slice %1 {offsets = [0, 72], sizes = [75, 8], strides = [1, 1]} : vector<75x128xf32> to vector<75x8xf32>
    %32 = vector.extract_strided_slice %2 {offsets = [0, 288], sizes = [75, 32], strides = [1, 1]} : vector<75x512xf32> to vector<75x32xf32>
    %33 = vector.extract_strided_slice %0 {offsets = [0, 160], sizes = [75, 16], strides = [1, 1]} : vector<75x256xf32> to vector<75x16xf32>
    %34 = vector.extract_strided_slice %1 {offsets = [0, 80], sizes = [75, 8], strides = [1, 1]} : vector<75x128xf32> to vector<75x8xf32>
    %35 = vector.extract_strided_slice %2 {offsets = [0, 320], sizes = [75, 32], strides = [1, 1]} : vector<75x512xf32> to vector<75x32xf32>
    %36 = vector.extract_strided_slice %0 {offsets = [0, 176], sizes = [75, 16], strides = [1, 1]} : vector<75x256xf32> to vector<75x16xf32>
    %37 = vector.extract_strided_slice %1 {offsets = [0, 88], sizes = [75, 8], strides = [1, 1]} : vector<75x128xf32> to vector<75x8xf32>
    %38 = vector.extract_strided_slice %2 {offsets = [0, 352], sizes = [75, 32], strides = [1, 1]} : vector<75x512xf32> to vector<75x32xf32>
    %39 = vector.extract_strided_slice %0 {offsets = [0, 192], sizes = [75, 16], strides = [1, 1]} : vector<75x256xf32> to vector<75x16xf32>
    %40 = vector.extract_strided_slice %1 {offsets = [0, 96], sizes = [75, 8], strides = [1, 1]} : vector<75x128xf32> to vector<75x8xf32>
    %41 = vector.extract_strided_slice %2 {offsets = [0, 384], sizes = [75, 32], strides = [1, 1]} : vector<75x512xf32> to vector<75x32xf32>
    %42 = vector.extract_strided_slice %0 {offsets = [0, 208], sizes = [75, 16], strides = [1, 1]} : vector<75x256xf32> to vector<75x16xf32>
    %43 = vector.extract_strided_slice %1 {offsets = [0, 104], sizes = [75, 8], strides = [1, 1]} : vector<75x128xf32> to vector<75x8xf32>
    %44 = vector.extract_strided_slice %2 {offsets = [0, 416], sizes = [75, 32], strides = [1, 1]} : vector<75x512xf32> to vector<75x32xf32>
    %45 = vector.extract_strided_slice %0 {offsets = [0, 224], sizes = [75, 16], strides = [1, 1]} : vector<75x256xf32> to vector<75x16xf32>
    %46 = vector.extract_strided_slice %1 {offsets = [0, 112], sizes = [75, 8], strides = [1, 1]} : vector<75x128xf32> to vector<75x8xf32>
    %47 = vector.extract_strided_slice %2 {offsets = [0, 448], sizes = [75, 32], strides = [1, 1]} : vector<75x512xf32> to vector<75x32xf32>
    %48 = vector.extract_strided_slice %0 {offsets = [0, 240], sizes = [75, 16], strides = [1, 1]} : vector<75x256xf32> to vector<75x16xf32>
    %49 = vector.extract_strided_slice %1 {offsets = [0, 120], sizes = [75, 8], strides = [1, 1]} : vector<75x128xf32> to vector<75x8xf32>
    %50 = vector.extract_strided_slice %2 {offsets = [0, 480], sizes = [75, 32], strides = [1, 1]} : vector<75x512xf32> to vector<75x32xf32>
    %51 = tpu.concatenate %3, %4, %5, %6, %7, %8, %9, %10, %11, %12, %13, %14, %15, %16, %17, %18 in 1 : vector<75x16xf32>, vector<75x8xf32>, vector<75x32xf32>, vector<75x16xf32>, vector<75x8xf32>, vector<75x32xf32>, vector<75x16xf32>, vector<75x8xf32>, vector<75x32xf32>, vector<75x16xf32>, vector<75x8xf32>, vector<75x32xf32>, vector<75x16xf32>, vector<75x8xf32>, vector<75x32xf32>, vector<75x16xf32> -> vector<75x296xf32>
    %52 = tpu.concatenate %19, %20, %21, %22, %23, %24, %25, %26, %27, %28, %29, %30, %31, %32, %33, %34 in 1 : vector<75x8xf32>, vector<75x32xf32>, vector<75x16xf32>, vector<75x8xf32>, vector<75x32xf32>, vector<75x16xf32>, vector<75x8xf32>, vector<75x32xf32>, vector<75x16xf32>, vector<75x8xf32>, vector<75x32xf32>, vector<75x16xf32>, vector<75x8xf32>, vector<75x32xf32>, vector<75x16xf32>, vector<75x8xf32> -> vector<75x288xf32>
    %53 = tpu.concatenate %35, %36, %37, %38, %39, %40, %41, %42, %43, %44, %45, %46, %47, %48, %49, %50 in 1 : vector<75x32xf32>, vector<75x16xf32>, vector<75x8xf32>, vector<75x32xf32>, vector<75x16xf32>, vector<75x8xf32>, vector<75x32xf32>, vector<75x16xf32>, vector<75x8xf32>, vector<75x32xf32>, vector<75x16xf32>, vector<75x8xf32>, vector<75x32xf32>, vector<75x16xf32>, vector<75x8xf32>, vector<75x32xf32> -> vector<75x312xf32>
    %54 = tpu.concatenate %51, %52, %53 in 1 : vector<75x296xf32>, vector<75x288xf32>, vector<75x312xf32> -> vector<75x896xf32>
    %c0_5 = arith.constant 0 : index
    %c0_6 = arith.constant 0 : index
    %55 = vector.load %arg4[%c0_5, %c0_6] : memref<75x896xf32, #tpu.memory_space<vmem>>, vector<75x896xf32>
    tpu.vector_store %arg4[%c0_5, %c0_6], %54 {strides = array<i32>} : memref<75x896xf32, #tpu.memory_space<vmem>>, vector<75x896xf32>,
    return
  }
  func.func @transform_0(%arg0: i32) -> (i32, i32) {
    %c0_i32 = arith.constant 0 : i32
    %c0_i32_0 = arith.constant 0 : i32
    return %arg0, %c0_i32 : i32, i32
  }
  func.func @transform_1(%arg0: i32) -> (i32, i32) {
    %c0_i32 = arith.constant 0 : i32
    %c0_i32_0 = arith.constant 0 : i32
    return %arg0, %c0_i32 : i32, i32
  }
  func.func @transform_2(%arg0: i32) -> (i32, i32) {
    %c0_i32 = arith.constant 0 : i32
    %c0_i32_0 = arith.constant 0 : i32
    return %arg0, %c0_i32 : i32, i32
  }
  func.func @transform_3(%arg0: i32) -> (i32, i32) {
    %c0_i32 = arith.constant 0 : i32
    %c0_i32_0 = arith.constant 0 : i32
    return %arg0, %c0_i32 : i32, i32
  }
}

</mosaic_0001>

<bundles_post_ra>
// kernel: tpu_custom_call.1
= control target key start
LH: loop header
LB: loop body
LE: loop exit
PB: predicated region body
PF: predicated region fallthrough
CT: control target
= control target key end

     0   :  { %8 = vsyncpa [#allocation3], 0  ;;  %s4992_s0 = inlined_call_operand.hbm [shape: f32[75,256], index: 0, kind: input, shape index: {}]   ;;  %s4993_s1 = inlined_call_operand.hbm [shape: f32[75,128], index: 1, kind: input, shape index: {}]   ;;  %s4994_s2 = inlined_call_operand.hbm [shape: f32[75,512], index: 2, kind: input, shape index: {}]   ;;  %s4995_s3 = inlined_call_operand.hbm [shape: f32[75,896], index: 3, kind: output, shape index: {}]  }
   0x1   :  { %9 = vsyncpa [#allocation6], 0 }
   0x2   :  { %10 = vsyncpa [#allocation4], 0  ;;  %s2276_s12 = smov [#allocation5]   ;;  %s2182_s16 = scalar_lea.hbm %s4993_s1, 1280 }
   0x3   :  { %s28_s13 = sshll.u32 %s2276_s12, 4  ;;  %p2183_p0 = scmp.ne.s32.totalorder %s4993_s1, %s2182_s16  ;;  %s29_s13 = int_to_ptr.vmem [resolvable:$true] %s28_s13 }
   0x4   :  { %p2186_p1 = scmp.lt.u32.totalorder %s2182_s16, %s4993_s1 }
   0x6   :  { %p2188_p2 = pnand %p2186_p1, %p2183_p0 }
   0x8   :  { %2191 = shalt.err (!%p2188_p2)
}
   0x9   :  { %s2192_s21 = scalar_lea.vmem %s29_s13, 1280  ;;  %p2197_p4 = scmp.lt.s32.totalorder %s29_s13, %s29_s13 }
   0xa   :  { %p2193_p3 = scmp.ne.s32.totalorder %s29_s13, %s2192_s21  ;;  %p2198_p5 = scmp.lt.s32.totalorder %s2192_s21, %s2192_s21 }
   0xc   :  { %p2199_p6 = por %p2198_p5, %p2197_p4 }
   0xe   :  { %p2200_p7 = pnand %p2199_p6, %p2193_p3 }
  0x10   :  { %2203 = shalt.err (!%p2200_p7)
}
  0x11   :  { %s2277_s22 = smov 128   ;;  %s2278_s23 = smov 8  }
  0x12   :  { %34 = dma.hbm_to_vmem [thread:$0]  %s4993_s1, 1280, %s29_s13, [#allocation6], %s2277_s22, %s2277_s22, %s2278_s23  }
  0x13   :  { %s2279_s26 = smov [#allocation2]   ;;  %s2204_s30 = scalar_lea.hbm %s4992_s0, 2560 }
  0x14   :  { %s16_s27 = sshll.u32 %s2279_s26, 4  ;;  %p2205_p8 = scmp.ne.s32.totalorder %s4992_s0, %s2204_s30  ;;  %s17_s27 = int_to_ptr.vmem [resolvable:$true] %s16_s27 }
  0x15   :  { %p2208_p9 = scmp.lt.u32.totalorder %s2204_s30, %s4992_s0 }
  0x17   :  { %p2210_p10 = pnand %p2208_p9, %p2205_p8 }
  0x19   :  { %2213 = shalt.err (!%p2210_p10)
}
  0x1a   :  { %s2214_s8 = scalar_lea.vmem %s17_s27, 2560  ;;  %p2219_p12 = scmp.lt.s32.totalorder %s17_s27, %s17_s27 }
  0x1b   :  { %p2215_p11 = scmp.ne.s32.totalorder %s17_s27, %s2214_s8  ;;  %p2220_p13 = scmp.lt.s32.totalorder %s2214_s8, %s2214_s8 }
  0x1d   :  { %p2221_p0 = por %p2220_p13, %p2219_p12 }
  0x1f   :  { %p2222_p1 = pnand %p2221_p0, %p2215_p11 }
  0x21   :  { %2225 = shalt.err (!%p2222_p1)
}
  0x22   :  { %s2280_s1 = smov 256   ;;  %s2281_s9 = smov 16  }
  0x23   :  { %22 = dma.hbm_to_vmem [thread:$0]  %s4992_s0, 2560, %s17_s27, [#allocation3], %s2280_s1, %s2280_s1, %s2281_s9  }
  0x24   :  { %s2282_s12 = smov [#allocation7]   ;;  %s2226_s16 = scalar_lea.hbm %s4994_s2, 5120 }
  0x25   :  { %s40_s13 = sshll.u32 %s2282_s12, 4  ;;  %p2227_p2 = scmp.ne.s32.totalorder %s4994_s2, %s2226_s16  ;;  %s41_s13 = int_to_ptr.vmem [resolvable:$true] %s40_s13 }
  0x26   :  { %p2230_p3 = scmp.lt.u32.totalorder %s2226_s16, %s4994_s2 }
  0x28   :  { %p2232_p4 = pnand %p2230_p3, %p2227_p2 }
  0x2a   :  { %2235 = shalt.err (!%p2232_p4)
}
  0x2b   :  { %s2236_s21 = scalar_lea.vmem %s41_s13, 5120  ;;  %p2241_p6 = scmp.lt.s32.totalorder %s41_s13, %s41_s13 }
  0x2c   :  { %p2237_p5 = scmp.ne.s32.totalorder %s41_s13, %s2236_s21  ;;  %p2242_p7 = scmp.lt.s32.totalorder %s2236_s21, %s2236_s21 }
  0x2e   :  { %p2243_p8 = por %p2242_p7, %p2241_p6 }
  0x30   :  { %p2244_p9 = pnand %p2243_p8, %p2237_p5 }
  0x32   :  { %2247 = shalt.err (!%p2244_p9)
}
  0x33   :  { %s2283_s0 = smov 512   ;;  %s2284_s22 = smov 32  }
  0x34   :  { %46 = dma.hbm_to_vmem [thread:$0]  %s4994_s2, 5120, %s41_s13, [#allocation6], %s2283_s0, %s2283_s0, %s2284_s22  }
  0x35   :  { %2270 = dma.done.wait [#allocation3], 2560  }
  0x36   :  { %2271 = vsyncadd [#allocation3], 4294964736 }
  0x37   :  { %2272 = dma.done.wait [#allocation6], 6400  }
  0x38   :  { %2273 = vsyncadd [#allocation6], 4294960896  ;;  %v2358_v0 = vld [vmem:[#allocation5 + $0x10] sm:$0xff]  ;;  %v2360_v1 = vld [vmem:[#allocation5] sm:$0xff]  ;;  %s2285_s2 = smov 24   ;;  %s2286_s26 = smov 40  }
  0x39   :  { %5132 = vst [vmem:[#allocation12_spill] sm:$0xff] %v2358_v0  ;;  %5133 = vst [vmem:[#allocation13_spill] sm:$0xff] %v2360_v1  ;;  %140 = vrot.lane.b32.xlu1 %v2358_v0, %s2281_s9  ;;  %136 = vrot.lane.b32.xlu0 %v2360_v1, %s2281_s9  ;;  %v2366_v2 = vld [vmem:[#allocation5 + $0x18] sm:$0xff]  ;;  %v2368_v3 = vld [vmem:[#allocation5 + $0x8] sm:$0xff]  ;;  %s2287_s27 = smov 64   ;;  %s2288_s28 = smov 48  }
  0x3a   :  { %5134 = vst [vmem:[#allocation14_spill] sm:$0xff] %v2366_v2  ;;  %5135 = vst [vmem:[#allocation15_spill] sm:$0xff] %v2368_v3  ;;  %v2374_v4 = vld [vmem:[#allocation5 + $0x28] sm:$0xff]  ;;  %v2376_v5 = vld [vmem:[#allocation5 + $0x20] sm:$0xff]  ;;  %s2289_s29 = smov 80   ;;  %s2290_s30 = smov 112  }
  0x3b   :  { %5136 = vst [vmem:[#allocation16_spill] sm:$0xff] %v2374_v4  ;;  %5137 = vst [vmem:[#allocation17_spill] sm:$0xff] %v2376_v5  ;;  %v2382_v6 = vld [vmem:[#allocation5 + $0x38] sm:$0xff]  ;;  %v2384_v7 = vld [vmem:[#allocation5 + $0x30] sm:$0xff]  ;;  %s2291_s4 = smov 72   ;;  %s2292_s5 = smov 120  }
  0x3c   :  { %5138 = vst [vmem:[#allocation18_spill] sm:$0xff] %v2382_v6  ;;  %5139 = vst [vmem:[#allocation19_spill] sm:$0xff] %v2384_v7  ;;  %v2390_v8 = vld [vmem:[#allocation5 + $0x48] sm:$0x7]  ;;  %v2392_v9 = vld [vmem:[#allocation5 + $0x40] sm:$0xff]  ;;  %s2293_s6 = smov 96  }
  0x3d   :  { %142 = vrot.lane.b32.xlu1 %v2366_v2, %s2281_s9  ;;  %138 = vrot.lane.b32.xlu0 %v2368_v3, %s2281_s9  ;;  %5140 = vst [vmem:[#allocation20_spill] sm:$0xff] %v2390_v8  ;;  %5141 = vst [vmem:[#allocation21_spill] sm:$0xff] %v2392_v9  ;;  %v2398_v10 = vld [vmem:[#allocation7 + $0x20] sm:$0xff]  ;;  %v2440_v21 = vld [vmem:[#allocation2] sm:$0xff]  ;;  %vm616_vm0 = vcmask 130048   ;;  %vm627_vm1 = vcmask 195584  }
  0x3e   :  { %v2400_v11 = vld [vmem:[#allocation7] sm:$0xff]  ;;  %v2448_v23 = vld [vmem:[#allocation2 + $0x20] sm:$0xff]  ;;  %vm638_vm2 = vcmask 457728   ;;  %vm649_vm3 = vcmask 588800   ;;  %vm660_vm4 = vcmask 654336   ;;  %vm671_vm5 = vcmask 916480  }
  0x3f   :  { %v2406_v12 = vld [vmem:[#allocation7 + $0x60] sm:$0xff]  ;;  %v2456_v25 = vld [vmem:[#allocation2 + $0x40] sm:$0xff]  ;;  %s2294_s7 = smov 88   ;;  %s2295_s8 = smov 104   ;;  %vm682_vm6 = vcmask 64512   ;;  %vm693_vm7 = vcmask 326656  }
  0x40   :  { %v2408_v13 = vld [vmem:[#allocation7 + $0x40] sm:$0xff]  ;;  %v2464_v27 = vld [vmem:[#allocation2 + $0x60] sm:$0xff]  ;;  %vm714_vm8 = vcmask 523264   ;;  %vm725_vm9 = vcmask 785408   ;;  %vm746_vm10 = vcmask 982016   ;;  %s2296_s1 = smov 56  }
  0x41   :  { %146 = vrot.lane.b32.xlu1 %v2374_v4, %s2281_s9  ;;  %144 = vrot.lane.b32.xlu0 %v2376_v5, %s2281_s9  ;;  %v2414_v14 = vld [vmem:[#allocation7 + $0xa0] sm:$0xff]  ;;  %v2472_v29 = vld [vmem:[#allocation2 + $0x80] sm:$0xff]  ;;  %vm1297_vm11 = vcmask 392192   ;;  %vm1328_vm12 = vcmask 850944   ;;  %vm1609_vm13 = vcmask 261120   ;;  %vm1640_vm14 = vcmask 719872  }
  0x42   :  { %v2416_v15 = vld [vmem:[#allocation7 + $0x80] sm:$0xff] }
  0x43   :  { %v2422_v16 = vld [vmem:[#allocation7 + $0xe0] sm:$0xff] }
  0x44   :  { %v2424_v17 = vld [vmem:[#allocation7 + $0xc0] sm:$0xff] }
  0x45   :  { %150 = vrot.lane.b32.xlu1 %v2382_v6, %s2281_s9  ;;  %148 = vrot.lane.b32.xlu0 %v2384_v7, %s2281_s9  ;;  %v2430_v18 = vld [vmem:[#allocation7 + $0x120] sm:$0x7] }
  0x46   :  { %v2432_v19 = vld [vmem:[#allocation7 + $0x100] sm:$0xff] }
  0x47   :  { %v2438_v20 = vld [vmem:[#allocation2 + $0x10] sm:$0xff] }
  0x48   :  { %v2446_v22 = vld [vmem:[#allocation2 + $0x30] sm:$0xff] }
  0x49   :  { %154 = vrot.lane.b32.xlu1 %v2390_v8, %s2281_s9  ;;  %152 = vrot.lane.b32.xlu0 %v2392_v9, %s2281_s9  ;;  %v2454_v24 = vld [vmem:[#allocation2 + $0x50] sm:$0xff] }
  0x4a   :  { %v2462_v26 = vld [vmem:[#allocation2 + $0x70] sm:$0xff] }
  0x4b   :  { %v2470_v28 = vld [vmem:[#allocation2 + $0x90] sm:$0x7] }
  0x4d   :  { %178 = vrot.lane.b32.xlu1 %v2398_v10, %s2285_s2  ;;  %176 = vrot.lane.b32.xlu0 %v2400_v11, %s2285_s2 }
  0x51   :  { %182 = vrot.lane.b32.xlu1 %v2406_v12, %s2285_s2  ;;  %180 = vrot.lane.b32.xlu0 %v2408_v13, %s2285_s2 }
  0x55   :  { %186 = vrot.lane.b32.xlu1 %v2414_v14, %s2285_s2  ;;  %184 = vrot.lane.b32.xlu0 %v2416_v15, %s2285_s2 }
  0x59   :  { %190 = vrot.lane.b32.xlu1 %v2422_v16, %s2285_s2  ;;  %188 = vrot.lane.b32.xlu0 %v2424_v17, %s2285_s2 }
  0x5d   :  { %194 = vrot.lane.b32.xlu1 %v2430_v18, %s2285_s2  ;;  %192 = vrot.lane.b32.xlu0 %v2432_v19, %s2285_s2 }
  0x61   :  { %218 = vrot.lane.b32.xlu1 %v2438_v20, %s2286_s26  ;;  %216 = vrot.lane.b32.xlu0 %v2440_v21, %s2286_s26 }
  0x65   :  { %222 = vrot.lane.b32.xlu1 %v2446_v22, %s2286_s26  ;;  %220 = vrot.lane.b32.xlu0 %v2448_v23, %s2286_s26 }
  0x69   :  { %226 = vrot.lane.b32.xlu1 %v2454_v24, %s2286_s26  ;;  %224 = vrot.lane.b32.xlu0 %v2456_v25, %s2286_s26 }
  0x6d   :  { %230 = vrot.lane.b32.xlu1 %v2462_v26, %s2286_s26  ;;  %228 = vrot.lane.b32.xlu0 %v2464_v27, %s2286_s26 }
  0x71   :  { %234 = vrot.lane.b32.xlu1 %v2470_v28, %s2286_s26  ;;  %232 = vrot.lane.b32.xlu0 %v2472_v29, %s2286_s26 }
  0x75   :  { %248 = vrot.lane.b32.xlu1 %v2368_v3, %s2287_s27  ;;  %246 = vrot.lane.b32.xlu0 %v2360_v1, %s2287_s27 }
  0x79   :  { %252 = vrot.lane.b32.xlu1 %v2366_v2, %s2287_s27  ;;  %250 = vrot.lane.b32.xlu0 %v2358_v0, %s2287_s27 }
  0x7d   :  { %256 = vrot.lane.b32.xlu1 %v2374_v4, %s2287_s27  ;;  %254 = vrot.lane.b32.xlu0 %v2376_v5, %s2287_s27 }
  0x81   :  { %260 = vrot.lane.b32.xlu1 %v2382_v6, %s2287_s27  ;;  %258 = vrot.lane.b32.xlu0 %v2384_v7, %s2287_s27 }
  0x85   :  { %264 = vrot.lane.b32.xlu1 %v2390_v8, %s2287_s27  ;;  %262 = vrot.lane.b32.xlu0 %v2392_v9, %s2287_s27 }
  0x89   :  { %278 = vrot.lane.b32.xlu1 %v2398_v10, %s2288_s28  ;;  %276 = vrot.lane.b32.xlu0 %v2400_v11, %s2288_s28 }
  0x8d   :  { %282 = vrot.lane.b32.xlu1 %v2406_v12, %s2288_s28  ;;  %280 = vrot.lane.b32.xlu0 %v2408_v13, %s2288_s28 }
  0x91   :  { %286 = vrot.lane.b32.xlu1 %v2414_v14, %s2288_s28  ;;  %284 = vrot.lane.b32.xlu0 %v2416_v15, %s2288_s28 }
  0x95   :  { %290 = vrot.lane.b32.xlu1 %v2422_v16, %s2288_s28  ;;  %288 = vrot.lane.b32.xlu0 %v2424_v17, %s2288_s28 }
  0x99   :  { %294 = vrot.lane.b32.xlu1 %v2430_v18, %s2288_s28  ;;  %292 = vrot.lane.b32.xlu0 %v2432_v19, %s2288_s28 }
  0x9d   :  { %308 = vrot.lane.b32.xlu1 %v2438_v20, %s2289_s29  ;;  %306 = vrot.lane.b32.xlu0 %v2440_v21, %s2289_s29 }
  0xa1   :  { %312 = vrot.lane.b32.xlu1 %v2446_v22, %s2289_s29  ;;  %310 = vrot.lane.b32.xlu0 %v2448_v23, %s2289_s29 }
  0xa5   :  { %316 = vrot.lane.b32.xlu1 %v2454_v24, %s2289_s29  ;;  %314 = vrot.lane.b32.xlu0 %v2456_v25, %s2289_s29 }
  0xa9   :  { %320 = vrot.lane.b32.xlu1 %v2462_v26, %s2289_s29  ;;  %318 = vrot.lane.b32.xlu0 %v2464_v27, %s2289_s29 }
  0xab   :  { %v2534_v30 = vpop.permute.xlu1 %140  ;;  %v2536_v31 = vpop.permute.xlu0 %136 }
  0xad   :  { %324 = vrot.lane.b32.xlu1 %v2470_v28, %s2289_s29  ;;  %322 = vrot.lane.b32.xlu0 %v2472_v29, %s2289_s29 }
  0xaf   :  { %v2542_v32 = vpop.permute.xlu1 %142  ;;  %v2544_v33 = vpop.permute.xlu0 %138 }
  0xb1   :  { %338 = vrot.lane.b32.xlu1 %v2368_v3, %s2290_s30  ;;  %336 = vrot.lane.b32.xlu0 %v2360_v1, %s2290_s30 }
  0xb3   :  { %v2550_v34 = vpop.permute.xlu1 %146  ;;  %v2552_v35 = vpop.permute.xlu0 %144 }
  0xb5   :  { %342 = vrot.lane.b32.xlu1 %v2366_v2, %s2290_s30  ;;  %340 = vrot.lane.b32.xlu0 %v2358_v0, %s2290_s30 }
  0xb7   :  { %v2558_v36 = vpop.permute.xlu1 %150  ;;  %v2560_v37 = vpop.permute.xlu0 %148 }
  0xb9   :  { %346 = vrot.lane.b32.xlu1 %v2374_v4, %s2290_s30  ;;  %344 = vrot.lane.b32.xlu0 %v2376_v5, %s2290_s30 }
  0xbb   :  { %v2566_v38 = vpop.permute.xlu1 %154  ;;  %v2568_v39 = vpop.permute.xlu0 %152 }
  0xbd   :  { %350 = vrot.lane.b32.xlu1 %v2382_v6, %s2290_s30  ;;  %348 = vrot.lane.b32.xlu0 %v2384_v7, %s2290_s30 }
  0xbf   :  { %v2574_v40 = vpop.permute.xlu1 %178  ;;  %v2576_v41 = vpop.permute.xlu0 %176 }
  0xc1   :  { %354 = vrot.lane.b32.xlu1 %v2390_v8, %s2290_s30  ;;  %352 = vrot.lane.b32.xlu0 %v2392_v9, %s2290_s30 }
  0xc3   :  { %v2582_v42 = vpop.permute.xlu1 %182  ;;  %v2584_v43 = vpop.permute.xlu0 %180 }
  0xc5   :  { %368 = vrot.lane.b32.xlu1 %v2398_v10, %s2291_s4  ;;  %366 = vrot.lane.b32.xlu0 %v2400_v11, %s2291_s4 }
  0xc7   :  { %v2590_v44 = vpop.permute.xlu1 %186  ;;  %v2592_v45 = vpop.permute.xlu0 %184 }
  0xc9   :  { %372 = vrot.lane.b32.xlu1 %v2406_v12, %s2291_s4  ;;  %370 = vrot.lane.b32.xlu0 %v2408_v13, %s2291_s4 }
  0xcb   :  { %v2598_v46 = vpop.permute.xlu1 %190  ;;  %v2600_v47 = vpop.permute.xlu0 %188 }
  0xcd   :  { %376 = vrot.lane.b32.xlu1 %v2414_v14, %s2291_s4  ;;  %374 = vrot.lane.b32.xlu0 %v2416_v15, %s2291_s4 }
  0xcf   :  { %v2606_v48 = vpop.permute.xlu1 %194  ;;  %v2608_v49 = vpop.permute.xlu0 %192 }
  0xd0   :  { %5142 = vst [vmem:[#allocation22_spill] sm:$0xff] %v2606_v48  ;;  %5143 = vst [vmem:[#allocation23_spill] sm:$0xff] %v2608_v49 }
  0xd1   :  { %380 = vrot.lane.b32.xlu1 %v2422_v16, %s2291_s4  ;;  %378 = vrot.lane.b32.xlu0 %v2424_v17, %s2291_s4 }
  0xd3   :  { %v2614_v50 = vpop.permute.xlu1 %218  ;;  %v2616_v51 = vpop.permute.xlu0 %216 }
  0xd5   :  { %384 = vrot.lane.b32.xlu1 %v2430_v18, %s2291_s4  ;;  %382 = vrot.lane.b32.xlu0 %v2432_v19, %s2291_s4 }
  0xd7   :  { %v2622_v52 = vpop.permute.xlu1 %222  ;;  %v2624_v53 = vpop.permute.xlu0 %220 }
  0xd9   :  { %398 = vrot.lane.b32.xlu1 %v2438_v20, %s2292_s5  ;;  %396 = vrot.lane.b32.xlu0 %v2440_v21, %s2292_s5 }
  0xdb   :  { %v2630_v54 = vpop.permute.xlu1 %226  ;;  %v2632_v55 = vpop.permute.xlu0 %224 }
  0xdd   :  { %402 = vrot.lane.b32.xlu1 %v2446_v22, %s2292_s5  ;;  %400 = vrot.lane.b32.xlu0 %v2448_v23, %s2292_s5 }
  0xdf   :  { %v2638_v56 = vpop.permute.xlu1 %230  ;;  %v2640_v57 = vpop.permute.xlu0 %228 }
  0xe1   :  { %406 = vrot.lane.b32.xlu1 %v2454_v24, %s2292_s5  ;;  %404 = vrot.lane.b32.xlu0 %v2456_v25, %s2292_s5 }
  0xe3   :  { %v2646_v58 = vpop.permute.xlu1 %234  ;;  %v2648_v59 = vpop.permute.xlu0 %232 }
  0xe4   :  { %5144 = vst [vmem:[#allocation24_spill] sm:$0xff] %v2646_v58  ;;  %5145 = vst [vmem:[#allocation25_spill] sm:$0xff] %v2648_v59 }
  0xe5   :  { %410 = vrot.lane.b32.xlu1 %v2462_v26, %s2292_s5  ;;  %408 = vrot.lane.b32.xlu0 %v2464_v27, %s2292_s5 }
  0xe7   :  { %v249_v60 = vpop.permute.xlu1 %248  ;;  %v247_v61 = vpop.permute.xlu0 %246 }
  0xe9   :  { %414 = vrot.lane.b32.xlu1 %v2470_v28, %s2292_s5  ;;  %412 = vrot.lane.b32.xlu0 %v2472_v29, %s2292_s5 }
  0xeb   :  { %v2658_v62 = vpop.permute.xlu1 %252  ;;  %v2660_v63 = vpop.permute.xlu0 %250 }
  0xed   :  { %428 = vrot.lane.b32.xlu1 %v2368_v3, %s2284_s22  ;;  %426 = vrot.lane.b32.xlu0 %v2360_v1, %s2284_s22 }
  0xef   :  { %v2666_v59 = vpop.permute.xlu1 %256  ;;  %v2668_v58 = vpop.permute.xlu0 %254 }
  0xf1   :  { %432 = vrot.lane.b32.xlu1 %v2366_v2, %s2284_s22  ;;  %430 = vrot.lane.b32.xlu0 %v2358_v0, %s2284_s22 }
  0xf3   :  { %v2674_v49 = vpop.permute.xlu1 %260  ;;  %v2676_v48 = vpop.permute.xlu0 %258 }
  0xf5   :  { %436 = vrot.lane.b32.xlu1 %v2374_v4, %s2284_s22  ;;  %434 = vrot.lane.b32.xlu0 %v2376_v5, %s2284_s22 }
  0xf7   :  { %v2682_v1 = vpop.permute.xlu1 %264  ;;  %v2684_v3 = vpop.permute.xlu0 %262 }
  0xf8   :  { %5146 = vst [vmem:[#allocation26_spill] sm:$0xff] %v2684_v3 }
  0xf9   :  { %440 = vrot.lane.b32.xlu1 %v2382_v6, %s2284_s22  ;;  %438 = vrot.lane.b32.xlu0 %v2384_v7, %s2284_s22 }
  0xfb   :  { %v279_v0 = vpop.permute.xlu1 %278  ;;  %v277_v2 = vpop.permute.xlu0 %276 }
  0xfd   :  { %444 = vrot.lane.b32.xlu1 %v2390_v8, %s2284_s22  ;;  %442 = vrot.lane.b32.xlu0 %v2392_v9, %s2284_s22 }
  0xff   :  { %v283_v4 = vpop.permute.xlu1 %282  ;;  %v281_v5 = vpop.permute.xlu0 %280 }
 0x101   :  { %458 = vrot.lane.b32.xlu1 %v2398_v10, %s2293_s6  ;;  %456 = vrot.lane.b32.xlu0 %v2400_v11, %s2293_s6  ;;  %v617_v10 = vsel %vm616_vm0, %v2440_v21, %v2536_v31  ;;  %v618_v11 = vsel %vm616_vm0, %v2438_v20, %v2544_v33 }
 0x103   :  { %v2698_v6 = vpop.permute.xlu1 %286  ;;  %v2700_v7 = vpop.permute.xlu0 %284 }
 0x105   :  { %462 = vrot.lane.b32.xlu1 %v2406_v12, %s2293_s6  ;;  %460 = vrot.lane.b32.xlu0 %v2408_v13, %s2293_s6 }
 0x107   :  { %v2706_v9 = vpop.permute.xlu1 %290  ;;  %v2708_v8 = vpop.permute.xlu0 %288 }
 0x109   :  { %466 = vrot.lane.b32.xlu1 %v2414_v14, %s2293_s6  ;;  %464 = vrot.lane.b32.xlu0 %v2416_v15, %s2293_s6  ;;  %v629_v14 = vsel %vm627_vm1, %v618_v11, %v2574_v40  ;;  %v628_v15 = vsel %vm627_vm1, %v617_v10, %v2576_v41  ;;  %v619_v41 = vsel %vm616_vm0, %v2448_v23, %v2534_v30 }
 0x10a   :  { %v640_v3 = vsel %vm638_vm2, %v629_v14, %v2614_v50  ;;  %v639_v31 = vsel %vm638_vm2, %v628_v15, %v2616_v51  ;;  %v620_v50 = vsel %vm616_vm0, %v2446_v22, %v2542_v32 }
 0x10b   :  { %v2720_v12 = vpop.permute.xlu1 %294  ;;  %v2722_v13 = vpop.permute.xlu0 %292  ;;  %v651_v33 = vsel %vm649_vm3, %v640_v3, %v249_v60  ;;  %v650_v40 = vsel %vm649_vm3, %v639_v31, %v247_v61  ;;  %v630_v3 = vsel %vm627_vm1, %v619_v41, %v2584_v43  ;;  %v621_v43 = vsel %vm616_vm0, %v2456_v25, %v2552_v35 }
 0x10c   :  { %v662_v51 = vsel %vm660_vm4, %v651_v33, %v279_v0  ;;  %v641_v0 = vsel %vm638_vm2, %v630_v3, %v2624_v53  ;;  %v5150_v3 = vld [vmem:[#allocation25_spill] sm:$0xff] }
 0x10d   :  { %470 = vrot.lane.b32.xlu1 %v2422_v16, %s2293_s6  ;;  %468 = vrot.lane.b32.xlu0 %v2424_v17, %s2293_s6  ;;  %v661_v16 = vsel %vm660_vm4, %v650_v40, %v277_v2  ;;  %v631_v17 = vsel %vm627_vm1, %v620_v50, %v2582_v42  ;;  %v652_v32 = vsel %vm649_vm3, %v641_v0, %v2660_v63 }
 0x10e   :  { %v642_v61 = vsel %vm638_vm2, %v631_v17, %v2622_v52  ;;  %v622_v42 = vsel %vm616_vm0, %v2454_v24, %v2550_v34  ;;  %v632_v63 = vsel %vm627_vm1, %v621_v43, %v2592_v45  ;;  %v623_v45 = vsel %vm616_vm0, %v2464_v27, %v2560_v37  ;;  %v5149_v17 = vld [vmem:[#allocation24_spill] sm:$0xff] }
 0x10f   :  { %v309_v10 = vpop.permute.xlu1 %308  ;;  %v307_v11 = vpop.permute.xlu0 %306  ;;  %v653_v2 = vsel %vm649_vm3, %v642_v61, %v2658_v62  ;;  %v633_v62 = vsel %vm627_vm1, %v622_v42, %v2590_v44  ;;  %v624_v44 = vsel %vm616_vm0, %v2462_v26, %v2558_v36 }
 0x110   :  { %v673_v60 = vsel %vm671_vm5, %v662_v51, %v309_v10  ;;  %v672_v30 = vsel %vm671_vm5, %v661_v16, %v307_v11  ;;  %v664_v52 = vsel %vm660_vm4, %v653_v2, %v283_v4  ;;  %v644_v15 = vsel %vm638_vm2, %v633_v62, %v2630_v54 }
 0x111   :  { %2058 = vst [vmem:[#allocation8 + $0x38] sm:$0xff] %v673_v60  ;;  %2051 = vst [vmem:[#allocation8] sm:$0xff] %v672_v30  ;;  %474 = vrot.lane.b32.xlu1 %v2430_v18, %s2293_s6  ;;  %472 = vrot.lane.b32.xlu0 %v2432_v19, %s2293_s6  ;;  %v663_v18 = vsel %vm660_vm4, %v652_v32, %v281_v5  ;;  %v643_v4 = vsel %vm638_vm2, %v632_v63, %v2632_v55  ;;  %v5151_v60 = vld [vmem:[#allocation26_spill] sm:$0xff] }
 0x112   :  { %v655_v5 = vsel %vm649_vm3, %v644_v15, %v2666_v59  ;;  %v654_v35 = vsel %vm649_vm3, %v643_v4, %v2668_v58  ;;  %v635_v59 = vsel %vm627_vm1, %v624_v44, %v2598_v46  ;;  %v634_v58 = vsel %vm627_vm1, %v623_v45, %v2600_v47  ;;  %v5154_v63 = vld [vmem:[#allocation14_spill] sm:$0xff]  ;;  %v5157_v4 = vld [vmem:[#allocation16_spill] sm:$0xff] }
 0x113   :  { %v313_v53 = vpop.permute.xlu1 %312  ;;  %v311_v19 = vpop.permute.xlu0 %310  ;;  %v666_v54 = vsel %vm660_vm4, %v655_v5, %v2698_v6  ;;  %v665_v55 = vsel %vm660_vm4, %v654_v35, %v2700_v7  ;;  %v646_v37 = vsel %vm638_vm2, %v635_v59, %v2638_v56  ;;  %v645_v6 = vsel %vm638_vm2, %v634_v58, %v2640_v57  ;;  %v5158_v5 = vld [vmem:[#allocation17_spill] sm:$0xff]  ;;  %v5161_v45 = vld [vmem:[#allocation18_spill] sm:$0xff]  ;;  %v2904_v58 = vld [vmem:[#allocation7 + $0x28] sm:$0xff] }
 0x114   :  { %v675_v14 = vsel %vm671_vm5, %v664_v52, %v313_v53  ;;  %v674_v34 = vsel %vm671_vm5, %v663_v18, %v311_v19  ;;  %v657_v7 = vsel %vm649_vm3, %v646_v37, %v2674_v49  ;;  %v656_v46 = vsel %vm649_vm3, %v645_v6, %v2676_v48  ;;  %v5147_v49 = vld [vmem:[#allocation22_spill] sm:$0xff]  ;;  %v5148_v48 = vld [vmem:[#allocation23_spill] sm:$0xff]  ;;  %v5153_v53 = vld [vmem:[#allocation13_spill] sm:$0xff]  ;;  %5165 = vst [vmem:[#allocation25_spill] sm:$0xff] %v2904_v58 }
 0x115   :  { %2072 = vst [vmem:[#allocation8 + $0xa8] sm:$0xff] %v675_v14  ;;  %2065 = vst [vmem:[#allocation8 + $0x70] sm:$0xff] %v674_v34  ;;  %488 = vrot.lane.b32.xlu1 %v2438_v20, %s2284_s22  ;;  %486 = vrot.lane.b32.xlu0 %v2440_v21, %s2284_s22  ;;  %v626_v47 = vsel %vm616_vm0, %v2470_v28, %v2566_v38  ;;  %v625_v56 = vsel %vm616_vm0, %v2472_v29, %v2568_v39  ;;  %v5152_v18 = vld [vmem:[#allocation15_spill] sm:$0xff]  ;;  %v5155_v14 = vld [vmem:[#allocation12_spill] sm:$0xff] }
 0x116   :  { %v668_v57 = vsel %vm660_vm4, %v657_v7, %v2706_v9  ;;  %v667_v41 = vsel %vm660_vm4, %v656_v46, %v2708_v8  ;;  %v637_v16 = vsel %vm627_vm1, %v626_v47, %v5147_v49  ;;  %v636_v10 = vsel %vm627_vm1, %v625_v56, %v5148_v48  ;;  %v5164_v59 = vld [vmem:[#allocation21_spill] sm:$0xff]  ;;  %v2916_v6 = vld [vmem:[#allocation7 + $0x68] sm:$0xff] }
 0x117   :  { %v317_v31 = vpop.permute.xlu1 %316  ;;  %v315_v33 = vpop.permute.xlu0 %314  ;;  %v648_v39 = vsel %vm638_vm2, %v637_v16, %v5149_v17  ;;  %v647_v9 = vsel %vm638_vm2, %v636_v10, %v5150_v3  ;;  %5167 = vst [vmem:[#allocation15_spill] sm:$0xff] %v2916_v6  ;;  %v2918_v7 = vld [vmem:[#allocation7 + $0x48] sm:$0xff] }
 0x118   :  { %v677_v36 = vsel %vm671_vm5, %v666_v54, %v317_v31  ;;  %v676_v40 = vsel %vm671_vm5, %v665_v55, %v315_v33  ;;  %v659_v8 = vsel %vm649_vm3, %v648_v39, %v2682_v1  ;;  %v658_v30 = vsel %vm649_vm3, %v647_v9, %v5151_v60  ;;  %v5162_v54 = vld [vmem:[#allocation19_spill] sm:$0xff]  ;;  %v5163_v33 = vld [vmem:[#allocation20_spill] sm:$0xff]  ;;  %5168 = vst [vmem:[#allocation13_spill] sm:$0xff] %v2918_v7 }
 0x119   :  { %2086 = vst [vmem:[#allocation8 + $0x118] sm:$0xff] %v677_v36  ;;  %2079 = vst [vmem:[#allocation8 + $0xe0] sm:$0xff] %v676_v40  ;;  %492 = vrot.lane.b32.xlu1 %v2446_v22, %s2284_s22  ;;  %490 = vrot.lane.b32.xlu0 %v2448_v23, %s2284_s22  ;;  %v670_v61 = vsel %vm660_vm4, %v659_v8, %v2720_v12  ;;  %v669_v0 = vsel %vm660_vm4, %v658_v30, %v2722_v13  ;;  %v2906_v36 = vld [vmem:[#allocation7 + $0x8] sm:$0xff] }
 0x11a   :  { %5166 = vst [vmem:[#allocation26_spill] sm:$0xff] %v2906_v36  ;;  %v2928_v56 = vld [vmem:[#allocation7 + $0xa8] sm:$0xff] }
 0x11b   :  { %v321_v50 = vpop.permute.xlu1 %320  ;;  %v319_v51 = vpop.permute.xlu0 %318  ;;  %5169 = vst [vmem:[#allocation14_spill] sm:$0xff] %v2928_v56  ;;  %v2942_v49 = vld [vmem:[#allocation7 + $0xc8] sm:$0xff] }
 0x11c   :  { %v679_v38 = vsel %vm671_vm5, %v668_v57, %v321_v50  ;;  %v678_v11 = vsel %vm671_vm5, %v667_v41, %v319_v51  ;;  %v2930_v57 = vld [vmem:[#allocation7 + $0x88] sm:$0xff]  ;;  %5173 = vst [vmem:[#allocation18_spill] sm:$0xff] %v2942_v49 }
 0x11d   :  { %2100 = vst [vmem:[#allocation8 + $0x188] sm:$0xff] %v679_v38  ;;  %2093 = vst [vmem:[#allocation8 + $0x150] sm:$0xff] %v678_v11  ;;  %496 = vrot.lane.b32.xlu1 %v2454_v24, %s2284_s22  ;;  %494 = vrot.lane.b32.xlu0 %v2456_v25, %s2284_s22  ;;  %v2940_v51 = vld [vmem:[#allocation7 + $0xe8] sm:$0xff] }
 0x11e   :  { %5170 = vst [vmem:[#allocation12_spill] sm:$0xff] %v2930_v57  ;;  %5172 = vst [vmem:[#allocation17_spill] sm:$0xff] %v2940_v51  ;;  %v2952_v10 = vld [vmem:[#allocation7 + $0x128] sm:$0x7] }
 0x11f   :  { %v325_v2 = vpop.permute.xlu1 %324  ;;  %v323_v32 = vpop.permute.xlu0 %322  ;;  %5176 = vst [vmem:[#allocation21_spill] sm:$0xff] %v2952_v10  ;;  %v2954_v38 = vld [vmem:[#allocation7 + $0x108] sm:$0xff] }
 0x120   :  { %v681_v42 = vsel %vm671_vm5, %v670_v61, %v325_v2  ;;  %v680_v43 = vsel %vm671_vm5, %v669_v0, %v323_v32  ;;  %5177 = vst [vmem:[#allocation27_spill] sm:$0xff] %v2954_v38 }
 0x121   :  { %2114 = vst [vmem:[#allocation8 + $0x1f8] sm:$0x7] %v681_v42  ;;  %2107 = vst [vmem:[#allocation8 + $0x1c0] sm:$0xff] %v680_v43  ;;  %500 = vrot.lane.b32.xlu1 %v2462_v26, %s2284_s22  ;;  %498 = vrot.lane.b32.xlu0 %v2464_v27, %s2284_s22 }
 0x123   :  { %v2856_v1 = vpop.permute.xlu1 %338  ;;  %v2858_v12 = vpop.permute.xlu0 %336 }
 0x125   :  { %504 = vrot.lane.b32.xlu1 %v2470_v28, %s2284_s22  ;;  %502 = vrot.lane.b32.xlu0 %v2472_v29, %s2284_s22 }
 0x127   :  { %v2864_v13 = vpop.permute.xlu1 %342  ;;  %v2866_v52 = vpop.permute.xlu0 %340 }
 0x129   :  { %518 = vrot.lane.b32.xlu1 %v5152_v18, %s2289_s29  ;;  %516 = vrot.lane.b32.xlu0 %v5153_v53, %s2289_s29 }
 0x12b   :  { %v2872_v19 = vpop.permute.xlu1 %346  ;;  %v2874_v62 = vpop.permute.xlu0 %344 }
 0x12d   :  { %522 = vrot.lane.b32.xlu1 %v5154_v63, %s2289_s29  ;;  %520 = vrot.lane.b32.xlu0 %v5155_v14, %s2289_s29 }
 0x12f   :  { %v2880_v34 = vpop.permute.xlu1 %350  ;;  %v2882_v15 = vpop.permute.xlu0 %348 }
 0x130   :  { %5156 = vst [vmem:[#allocation22_spill] sm:$0xff] %v2882_v15 }
 0x131   :  { %526 = vrot.lane.b32.xlu1 %v5157_v4, %s2289_s29  ;;  %524 = vrot.lane.b32.xlu0 %v5158_v5, %s2289_s29 }
 0x133   :  { %v2888_v35 = vpop.permute.xlu1 %354  ;;  %v2890_v44 = vpop.permute.xlu0 %352 }
 0x134   :  { %5159 = vst [vmem:[#allocation23_spill] sm:$0xff] %v2888_v35  ;;  %5160 = vst [vmem:[#allocation24_spill] sm:$0xff] %v2890_v44 }
 0x135   :  { %530 = vrot.lane.b32.xlu1 %v5161_v45, %s2289_s29  ;;  %528 = vrot.lane.b32.xlu0 %v5162_v54, %s2289_s29 }
 0x137   :  { %v2896_v55 = vpop.permute.xlu1 %368  ;;  %v2898_v31 = vpop.permute.xlu0 %366 }
 0x139   :  { %534 = vrot.lane.b32.xlu1 %v5163_v33, %s2289_s29  ;;  %532 = vrot.lane.b32.xlu0 %v5164_v59, %s2289_s29 }
 0x13b   :  { %v2908_v40 = vpop.permute.xlu1 %372  ;;  %v2910_v37 = vpop.permute.xlu0 %370 }
 0x13d   :  { %558 = vrot.lane.b32.xlu1 %v2904_v58, %s2292_s5  ;;  %556 = vrot.lane.b32.xlu0 %v2906_v36, %s2292_s5 }
 0x13f   :  { %v2920_v46 = vpop.permute.xlu1 %376  ;;  %v2922_v47 = vpop.permute.xlu0 %374 }
 0x141   :  { %562 = vrot.lane.b32.xlu1 %v2916_v6, %s2292_s5  ;;  %560 = vrot.lane.b32.xlu0 %v2918_v7, %s2292_s5 }
 0x143   :  { %v2932_v41 = vpop.permute.xlu1 %380  ;;  %v2934_v50 = vpop.permute.xlu0 %378 }
 0x144   :  { %5171 = vst [vmem:[#allocation16_spill] sm:$0xff] %v2934_v50 }
 0x145   :  { %566 = vrot.lane.b32.xlu1 %v2928_v56, %s2292_s5  ;;  %564 = vrot.lane.b32.xlu0 %v2930_v57, %s2292_s5 }
 0x147   :  { %v2944_v16 = vpop.permute.xlu1 %384  ;;  %v2946_v48 = vpop.permute.xlu0 %382 }
 0x148   :  { %5174 = vst [vmem:[#allocation19_spill] sm:$0xff] %v2944_v16  ;;  %5175 = vst [vmem:[#allocation20_spill] sm:$0xff] %v2946_v48 }
 0x149   :  { %570 = vrot.lane.b32.xlu1 %v2940_v51, %s2292_s5  ;;  %568 = vrot.lane.b32.xlu0 %v2942_v49, %s2292_s5 }
 0x14b   :  { %v2956_v11 = vpop.permute.xlu1 %398  ;;  %v2958_v17 = vpop.permute.xlu0 %396 }
 0x14d   :  { %574 = vrot.lane.b32.xlu1 %v2952_v10, %s2292_s5  ;;  %572 = vrot.lane.b32.xlu0 %v2954_v38, %s2292_s5 }
 0x14f   :  { %v2964_v39 = vpop.permute.xlu1 %402  ;;  %v2966_v3 = vpop.permute.xlu0 %400 }
 0x151   :  { %588 = vrot.lane.b32.xlu1 %v2438_v20, %s2291_s4  ;;  %586 = vrot.lane.b32.xlu0 %v2440_v21, %s2291_s4 }
 0x153   :  { %v2972_v9 = vpop.permute.xlu1 %406  ;;  %v2974_v8 = vpop.permute.xlu0 %404 }
 0x155   :  { %592 = vrot.lane.b32.xlu1 %v2446_v22, %s2291_s4  ;;  %590 = vrot.lane.b32.xlu0 %v2448_v23, %s2291_s4 }
 0x157   :  { %v2980_v60 = vpop.permute.xlu1 %410  ;;  %v2982_v30 = vpop.permute.xlu0 %408 }
 0x158   :  { %5178 = vst [vmem:[#allocation28_spill] sm:$0xff] %v2980_v60  ;;  %5179 = vst [vmem:[#allocation29_spill] sm:$0xff] %v2982_v30 }
 0x159   :  { %596 = vrot.lane.b32.xlu1 %v2454_v24, %s2291_s4  ;;  %594 = vrot.lane.b32.xlu0 %v2456_v25, %s2291_s4 }
 0x15b   :  { %v2988_v61 = vpop.permute.xlu1 %414  ;;  %v2990_v0 = vpop.permute.xlu0 %412 }
 0x15c   :  { %5180 = vst [vmem:[#allocation30_spill] sm:$0xff] %v2988_v61  ;;  %5181 = vst [vmem:[#allocation31_spill] sm:$0xff] %v2990_v0 }
 0x15d   :  { %600 = vrot.lane.b32.xlu1 %v2462_v26, %s2291_s4  ;;  %598 = vrot.lane.b32.xlu0 %v2464_v27, %s2291_s4 }
 0x15f   :  { %v2996_v2 = vpop.permute.xlu1 %428  ;;  %v2998_v32 = vpop.permute.xlu0 %426 }
 0x161   :  { %604 = vrot.lane.b32.xlu1 %v2470_v28, %s2291_s4  ;;  %602 = vrot.lane.b32.xlu0 %v2472_v29, %s2291_s4 }
 0x163   :  { %v3004_v42 = vpop.permute.xlu1 %432  ;;  %v3006_v43 = vpop.permute.xlu0 %430 }
 0x165   :  { %769 = vrot.lane.b32.xlu1 %v5152_v18, %s2294_s7  ;;  %767 = vrot.lane.b32.xlu0 %v5153_v53, %s2294_s7 }
 0x167   :  { %v3012_v0 = vpop.permute.xlu1 %436  ;;  %v3014_v61 = vpop.permute.xlu0 %434 }
 0x169   :  { %773 = vrot.lane.b32.xlu1 %v5154_v63, %s2294_s7  ;;  %771 = vrot.lane.b32.xlu0 %v5155_v14, %s2294_s7 }
 0x16b   :  { %v3020_v44 = vpop.permute.xlu1 %440  ;;  %v3022_v48 = vpop.permute.xlu0 %438 }
 0x16c   :  { %5182 = vst [vmem:[#allocation32_spill] sm:$0xff] %v3020_v44  ;;  %5183 = vst [vmem:[#allocation33_spill] sm:$0xff] %v3022_v48 }
 0x16d   :  { %777 = vrot.lane.b32.xlu1 %v5157_v4, %s2294_s7  ;;  %775 = vrot.lane.b32.xlu0 %v5158_v5, %s2294_s7 }
 0x16f   :  { %v3028_v35 = vpop.permute.xlu1 %444  ;;  %v3030_v16 = vpop.permute.xlu0 %442 }
 0x170   :  { %5184 = vst [vmem:[#allocation34_spill] sm:$0xff] %v3028_v35  ;;  %5185 = vst [vmem:[#allocation35_spill] sm:$0xff] %v3030_v16 }
 0x171   :  { %781 = vrot.lane.b32.xlu1 %v5161_v45, %s2294_s7  ;;  %779 = vrot.lane.b32.xlu0 %v5162_v54, %s2294_s7 }
 0x173   :  { %v3036_v30 = vpop.permute.xlu1 %458  ;;  %v3038_v44 = vpop.permute.xlu0 %456 }
 0x175   :  { %785 = vrot.lane.b32.xlu1 %v5163_v33, %s2294_s7  ;;  %783 = vrot.lane.b32.xlu0 %v5164_v59, %s2294_s7 }
 0x177   :  { %v3044_v48 = vpop.permute.xlu1 %462  ;;  %v3046_v35 = vpop.permute.xlu0 %460 }
 0x179   :  { %799 = vrot.lane.b32.xlu1 %v2904_v58, %s2295_s8  ;;  %797 = vrot.lane.b32.xlu0 %v2906_v36, %s2295_s8 }
 0x17b   :  { %v3052_v16 = vpop.permute.xlu1 %466  ;;  %v3054_v60 = vpop.permute.xlu0 %464 }
 0x17d   :  { %803 = vrot.lane.b32.xlu1 %v2916_v6, %s2295_s8  ;;  %801 = vrot.lane.b32.xlu0 %v2918_v7, %s2295_s8 }
 0x17f   :  { %v3060_v15 = vpop.permute.xlu1 %470  ;;  %v3062_v50 = vpop.permute.xlu0 %468 }
 0x181   :  { %807 = vrot.lane.b32.xlu1 %v2928_v56, %s2295_s8  ;;  %805 = vrot.lane.b32.xlu0 %v2930_v57, %s2295_s8 }
 0x183   :  { %v3068_v36 = vpop.permute.xlu1 %474  ;;  %v3070_v58 = vpop.permute.xlu0 %472 }
 0x184   :  { %5186 = vst [vmem:[#allocation36_spill] sm:$0xff] %v3068_v36  ;;  %5187 = vst [vmem:[#allocation37_spill] sm:$0xff] %v3070_v58 }
 0x185   :  { %811 = vrot.lane.b32.xlu1 %v2940_v51, %s2295_s8  ;;  %809 = vrot.lane.b32.xlu0 %v2942_v49, %s2295_s8 }
 0x187   :  { %v489_v7 = vpop.permute.xlu1 %488  ;;  %v487_v6 = vpop.permute.xlu0 %486 }
 0x189   :  { %815 = vrot.lane.b32.xlu1 %v2952_v10, %s2295_s8  ;;  %813 = vrot.lane.b32.xlu0 %v2954_v38, %s2295_s8 }
 0x18b   :  { %v3080_v56 = vpop.permute.xlu1 %492  ;;  %v3082_v57 = vpop.permute.xlu0 %490 }
 0x18d   :  { %829 = vrot.lane.b32.xlu1 %v5152_v18, %s2278_s23  ;;  %827 = vrot.lane.b32.xlu0 %v5153_v53, %s2278_s23 }
 0x18f   :  { %v3088_v51 = vpop.permute.xlu1 %496  ;;  %v3090_v49 = vpop.permute.xlu0 %494 }
 0x191   :  { %833 = vrot.lane.b32.xlu1 %v5154_v63, %s2278_s23  ;;  %831 = vrot.lane.b32.xlu0 %v5155_v14, %s2278_s23 }
 0x193   :  { %v3096_v38 = vpop.permute.xlu1 %500  ;;  %v3098_v10 = vpop.permute.xlu0 %498 }
 0x195   :  { %837 = vrot.lane.b32.xlu1 %v5157_v4, %s2278_s23  ;;  %835 = vrot.lane.b32.xlu0 %v5158_v5, %s2278_s23 }
 0x197   :  { %v3104_v58 = vpop.permute.xlu1 %504  ;;  %v3106_v36 = vpop.permute.xlu0 %502 }
 0x198   :  { %5188 = vst [vmem:[#allocation38_spill] sm:$0xff] %v3106_v36 }
 0x199   :  { %841 = vrot.lane.b32.xlu1 %v5161_v45, %s2278_s23  ;;  %839 = vrot.lane.b32.xlu0 %v5162_v54, %s2278_s23 }
 0x19b   :  { %v519_v63 = vpop.permute.xlu1 %518  ;;  %v517_v14 = vpop.permute.xlu0 %516 }
 0x19d   :  { %845 = vrot.lane.b32.xlu1 %v5163_v33, %s2278_s23  ;;  %843 = vrot.lane.b32.xlu0 %v5164_v59, %s2278_s23 }
 0x19f   :  { %v523_v4 = vpop.permute.xlu1 %522  ;;  %v521_v5 = vpop.permute.xlu0 %520 }
 0x1a1   :  { %859 = vrot.lane.b32.xlu1 %v2438_v20, %s2290_s30  ;;  %857 = vrot.lane.b32.xlu0 %v2440_v21, %s2290_s30  ;;  %v684_v20 = vsel %vm682_vm6, %v2856_v1, %v2896_v55  ;;  %v683_v21 = vsel %vm682_vm6, %v2858_v12, %v2898_v31  ;;  %v686_v31 = vsel %vm682_vm6, %v2864_v13, %v2908_v40 }
 0x1a3   :  { %v3120_v45 = vpop.permute.xlu1 %526  ;;  %v3122_v36 = vpop.permute.xlu0 %524 }
 0x1a5   :  { %863 = vrot.lane.b32.xlu1 %v2446_v22, %s2290_s30  ;;  %861 = vrot.lane.b32.xlu0 %v2448_v23, %s2290_s30  ;;  %v695_v22 = vsel %vm693_vm7, %v684_v20, %v2956_v11  ;;  %v694_v23 = vsel %vm693_vm7, %v683_v21, %v2958_v17  ;;  %v685_v11 = vsel %vm682_vm6, %v2866_v52, %v2910_v37  ;;  %v5196_v20 = vld [vmem:[#allocation29_spill] sm:$0xff] }
 0x1a6   :  { %v704_v1 = vsel %vm638_vm2, %v694_v23, %v2998_v32 }
 0x1a7   :  { %v3128_v54 = vpop.permute.xlu1 %530  ;;  %v3130_v33 = vpop.permute.xlu0 %528  ;;  %v715_v55 = vsel %vm714_vm8, %v704_v1, %v3038_v44  ;;  %v697_v44 = vsel %vm693_vm7, %v686_v31, %v2964_v39  ;;  %v3270_v31 = vld [vmem:[#allocation5 + $0x10] sm:$0xff] }
 0x1a8   :  { %v707_v52 = vsel %vm638_vm2, %v697_v44, %v3004_v42  ;;  %v687_v42 = vsel %vm682_vm6, %v2874_v62, %v2922_v47  ;;  %v5204_v44 = vld [vmem:[#allocation24_spill] sm:$0xff] }
 0x1a9   :  { %867 = vrot.lane.b32.xlu1 %v2454_v24, %s2290_s30  ;;  %865 = vrot.lane.b32.xlu0 %v2456_v25, %s2290_s30  ;;  %v705_v25 = vsel %vm638_vm2, %v695_v22, %v2996_v2 }
 0x1aa   :  { %v716_v12 = vsel %vm714_vm8, %v705_v25, %v3036_v30  ;;  %v726_v30 = vsel %vm725_vm9, %v715_v55, %v487_v6  ;;  %v3266_v55 = vld [vmem:[#allocation5 + $0x18] sm:$0xff] }
 0x1ab   :  { %v3146_v24 = vpop.permute.xlu1 %534  ;;  %v3148_v59 = vpop.permute.xlu0 %532  ;;  %v727_v17 = vsel %vm725_vm9, %v716_v12, %v489_v7  ;;  %v736_v2 = vsel %vm671_vm5, %v726_v30, %v517_v14  ;;  %v718_v7 = vsel %vm714_vm8, %v707_v52, %v3044_v48  ;;  %v5194_v14 = vld [vmem:[#allocation22_spill] sm:$0xff] }
 0x1ac   :  { %v729_v48 = vsel %vm725_vm9, %v718_v7, %v3080_v56 }
 0x1ad   :  { %871 = vrot.lane.b32.xlu1 %v2462_v26, %s2290_s30  ;;  %869 = vrot.lane.b32.xlu0 %v2464_v27, %s2290_s30  ;;  %v696_v26 = vsel %vm693_vm7, %v685_v11, %v2966_v3  ;;  %v737_v27 = vsel %vm671_vm5, %v727_v17, %v519_v63  ;;  %v688_v3 = vsel %vm682_vm6, %v2872_v19, %v2920_v46  ;;  %v5201_v11 = vld [vmem:[#allocation19_spill] sm:$0xff] }
 0x1ae   :  { %v706_v40 = vsel %vm638_vm2, %v696_v26, %v3006_v43  ;;  %v739_v43 = vsel %vm671_vm5, %v729_v48, %v523_v4  ;;  %v5202_v17 = vld [vmem:[#allocation23_spill] sm:$0xff] }
 0x1af   :  { %v3176_v32 = vpop.permute.xlu1 %558  ;;  %v3178_v13 = vpop.permute.xlu0 %556  ;;  %v717_v39 = vsel %vm714_vm8, %v706_v40, %v3046_v35  ;;  %v692_v30 = vsel %vm682_vm6, %v5202_v17, %v5201_v11  ;;  %v5206_v40 = vld [vmem:[#allocation31_spill] sm:$0xff]  ;;  %v5232_v17 = vld [vmem:[#allocation17_spill] sm:$0xff] }
 0x1b0   :  { %5189 = vst [vmem:[#allocation39_spill] sm:$0xff] %v3176_v32  ;;  %5190 = vst [vmem:[#allocation40_spill] sm:$0xff] %v3178_v13  ;;  %v748_v37 = vsel %vm746_vm10, %v737_v27, %v3176_v32  ;;  %v747_v6 = vsel %vm746_vm10, %v736_v2, %v3178_v13  ;;  %v728_v35 = vsel %vm725_vm9, %v717_v39, %v3082_v57  ;;  %v5205_v2 = vld [vmem:[#allocation30_spill] sm:$0xff] }
 0x1b1   :  { %2059 = vst [vmem:[#allocation8 + $0x40] sm:$0xff] %v748_v37  ;;  %2052 = vst [vmem:[#allocation8 + $0x8] sm:$0xff] %v747_v6  ;;  %875 = vrot.lane.b32.xlu1 %v2470_v28, %s2290_s30  ;;  %873 = vrot.lane.b32.xlu0 %v2472_v29, %s2290_s30  ;;  %v699_v28 = vsel %vm693_vm7, %v688_v3, %v2972_v9  ;;  %v698_v29 = vsel %vm693_vm7, %v687_v42, %v2974_v8 }
 0x1b2   :  { %v738_v19 = vsel %vm671_vm5, %v728_v35, %v521_v5  ;;  %v709_v62 = vsel %vm638_vm2, %v699_v28, %v3012_v0  ;;  %v708_v47 = vsel %vm638_vm2, %v698_v29, %v3014_v61  ;;  %v690_v61 = vsel %vm682_vm6, %v2880_v34, %v2932_v41  ;;  %v5193_v0 = vld [vmem:[#allocation16_spill] sm:$0xff] }
 0x1b3   :  { %v3212_v46 = vpop.permute.xlu1 %562  ;;  %v3214_v63 = vpop.permute.xlu0 %560  ;;  %v720_v9 = vsel %vm714_vm8, %v709_v62, %v3052_v16  ;;  %v719_v8 = vsel %vm714_vm8, %v708_v47, %v3054_v60  ;;  %v689_v16 = vsel %vm682_vm6, %v5194_v14, %v5193_v0  ;;  %v5195_v5 = vld [vmem:[#allocation28_spill] sm:$0xff]  ;;  %v703_v52 = vsel %vm693_vm7, %v692_v30, %v5205_v2  ;;  %v5233_v30 = vld [vmem:[#allocation18_spill] sm:$0xff]  ;;  %v3394_v2 = vld [vmem:[#allocation2 + $0x8] sm:$0xff] }
 0x1b4   :  { %5191 = vst [vmem:[#allocation41_spill] sm:$0xff] %v3212_v46  ;;  %5192 = vst [vmem:[#allocation42_spill] sm:$0xff] %v3214_v63  ;;  %v750_v56 = vsel %vm746_vm10, %v739_v43, %v3212_v46  ;;  %v749_v57 = vsel %vm746_vm10, %v738_v19, %v3214_v63  ;;  %v731_v60 = vsel %vm725_vm9, %v720_v9, %v3088_v51  ;;  %v5199_v51 = vld [vmem:[#allocation32_spill] sm:$0xff]  ;;  %v3308_v19 = vld [vmem:[#allocation5 + $0x28] sm:$0xff] }
 0x1b5   :  { %2073 = vst [vmem:[#allocation8 + $0xb0] sm:$0xff] %v750_v56  ;;  %2066 = vst [vmem:[#allocation8 + $0x78] sm:$0xff] %v749_v57  ;;  %889 = vrot.lane.b32.xlu1 %v5152_v18, %s2296_s1  ;;  %887 = vrot.lane.b32.xlu0 %v5153_v53, %s2296_s1  ;;  %v730_v4 = vsel %vm725_vm9, %v719_v8, %v3090_v49  ;;  %v701_v18 = vsel %vm693_vm7, %v690_v61, %v5195_v5  ;;  %v5200_v49 = vld [vmem:[#allocation33_spill] sm:$0xff]  ;;  %v3312_v62 = vld [vmem:[#allocation5 + $0x20] sm:$0xff] }
 0x1b6   :  { %v700_v53 = vsel %vm693_vm7, %v689_v16, %v5196_v20  ;;  %v741_v21 = vsel %vm671_vm5, %v731_v60, %v3120_v45  ;;  %v740_v34 = vsel %vm671_vm5, %v730_v4, %v3122_v36  ;;  %v711_v23 = vsel %vm638_vm2, %v701_v18, %v5199_v51  ;;  %v5213_v56 = vld [vmem:[#allocation38_spill] sm:$0xff]  ;;  %v3344_v4 = vld [vmem:[#allocation5 + $0x48] sm:$0x7]  ;;  %v3348_v5 = vld [vmem:[#allocation5 + $0x40] sm:$0xff] }
 0x1b7   :  { %v3250_v41 = vpop.permute.xlu1 %566  ;;  %v3252_v22 = vpop.permute.xlu0 %564  ;;  %v710_v25 = vsel %vm638_vm2, %v700_v53, %v5200_v49  ;;  %v722_v45 = vsel %vm714_vm8, %v711_v23, %v3060_v15  ;;  %v5203_v15 = vld [vmem:[#allocation20_spill] sm:$0xff]  ;;  %v5220_v53 = vld [vmem:[#allocation25_spill] sm:$0xff]  ;;  %v5224_v23 = vld [vmem:[#allocation15_spill] sm:$0xff] }
 0x1b8   :  { %5197 = vst [vmem:[#allocation16_spill] sm:$0xff] %v3250_v41  ;;  %5198 = vst [vmem:[#allocation22_spill] sm:$0xff] %v3252_v22  ;;  %v752_v1 = vsel %vm746_vm10, %v741_v21, %v3250_v41  ;;  %v751_v12 = vsel %vm746_vm10, %v740_v34, %v3252_v22  ;;  %v721_v36 = vsel %vm714_vm8, %v710_v25, %v3062_v50  ;;  %v5221_v21 = vld [vmem:[#allocation26_spill] sm:$0xff]  ;;  %v5225_v49 = vld [vmem:[#allocation13_spill] sm:$0xff] }
 0x1b9   :  { %2087 = vst [vmem:[#allocation8 + $0x120] sm:$0xff] %v752_v1  ;;  %2080 = vst [vmem:[#allocation8 + $0xe8] sm:$0xff] %v751_v12  ;;  %893 = vrot.lane.b32.xlu1 %v3266_v55, %s2296_s1  ;;  %891 = vrot.lane.b32.xlu0 %v3270_v31, %s2296_s1  ;;  %v691_v50 = vsel %vm682_vm6, %v5204_v44, %v5203_v15  ;;  %v733_v26 = vsel %vm725_vm9, %v722_v45, %v3096_v38  ;;  %v5209_v38 = vld [vmem:[#allocation34_spill] sm:$0xff]  ;;  %v5229_v45 = vld [vmem:[#allocation12_spill] sm:$0xff] }
 0x1ba   :  { %v732_v27 = vsel %vm725_vm9, %v721_v36, %v3098_v10  ;;  %v702_v37 = vsel %vm693_vm7, %v691_v50, %v5206_v40  ;;  %v743_v6 = vsel %vm671_vm5, %v733_v26, %v3128_v54  ;;  %v713_v42 = vsel %vm638_vm2, %v703_v52, %v5209_v38  ;;  %v5210_v10 = vld [vmem:[#allocation35_spill] sm:$0xff]  ;;  %v5211_v54 = vld [vmem:[#allocation36_spill] sm:$0xff]  ;;  %v5228_v12 = vld [vmem:[#allocation14_spill] sm:$0xff] }
 0x1bb   :  { %v742_v7 = vsel %vm671_vm5, %v732_v27, %v3130_v33  ;;  %v3292_v39 = vpop.permute.xlu1 %570  ;;  %v3294_v3 = vpop.permute.xlu0 %568  ;;  %v712_v48 = vsel %vm638_vm2, %v702_v37, %v5210_v10  ;;  %v724_v29 = vsel %vm714_vm8, %v713_v42, %v5211_v54  ;;  %v5212_v33 = vld [vmem:[#allocation37_spill] sm:$0xff]  ;;  %v5235_v26 = vld [vmem:[#allocation27_spill] sm:$0xff]  ;;  %v3520_v46 = vld [vmem:[#allocation7 + $0xb0] sm:$0xff] }
 0x1bc   :  { %5207 = vst [vmem:[#allocation28_spill] sm:$0xff] %v3292_v39  ;;  %5208 = vst [vmem:[#allocation29_spill] sm:$0xff] %v3294_v3  ;;  %v754_v35 = vsel %vm746_vm10, %v743_v6, %v3292_v39  ;;  %v753_v28 = vsel %vm746_vm10, %v742_v7, %v3294_v3  ;;  %v723_v43 = vsel %vm714_vm8, %v712_v48, %v5212_v33  ;;  %v5234_v50 = vld [vmem:[#allocation21_spill] sm:$0xff]  ;;  %v3392_v27 = vld [vmem:[#allocation2 + $0x18] sm:$0xff] }
 0x1bd   :  { %2101 = vst [vmem:[#allocation8 + $0x190] sm:$0xff] %v754_v35  ;;  %2094 = vst [vmem:[#allocation8 + $0x158] sm:$0xff] %v753_v28  ;;  %897 = vrot.lane.b32.xlu1 %v3308_v19, %s2296_s1  ;;  %895 = vrot.lane.b32.xlu0 %v3312_v62, %s2296_s1  ;;  %v735_v47 = vsel %vm725_vm9, %v724_v29, %v3104_v58  ;;  %v734_v57 = vsel %vm725_vm9, %v723_v43, %v5213_v56  ;;  %v3332_v58 = vld [vmem:[#allocation5 + $0x38] sm:$0xff]  ;;  %v3406_v6 = vld [vmem:[#allocation2 + $0x28] sm:$0xff] }
 0x1be   :  { %v745_v9 = vsel %vm671_vm5, %v735_v47, %v3146_v24  ;;  %v744_v8 = vsel %vm671_vm5, %v734_v57, %v3148_v59  ;;  %v3336_v24 = vld [vmem:[#allocation5 + $0x30] sm:$0xff]  ;;  %v3404_v37 = vld [vmem:[#allocation2 + $0x38] sm:$0xff]  ;;  %v3418_v10 = vld [vmem:[#allocation2 + $0x48] sm:$0xff] }
 0x1bf   :  { %v3324_v61 = vpop.permute.xlu1 %574  ;;  %v3326_v0 = vpop.permute.xlu0 %572  ;;  %v3416_v42 = vld [vmem:[#allocation2 + $0x58] sm:$0xff]  ;;  %v3430_v54 = vld [vmem:[#allocation2 + $0x68] sm:$0xff]  ;;  %v3508_v39 = vld [vmem:[#allocation7 + $0x70] sm:$0xff] }
 0x1c0   :  { %5214 = vst [vmem:[#allocation32_spill] sm:$0xff] %v3324_v61  ;;  %5215 = vst [vmem:[#allocation33_spill] sm:$0xff] %v3326_v0  ;;  %v756_v14 = vsel %vm746_vm10, %v745_v9, %v3324_v61  ;;  %v755_v16 = vsel %vm746_vm10, %v744_v8, %v3326_v0  ;;  %v3428_v28 = vld [vmem:[#allocation2 + $0x78] sm:$0xff]  ;;  %v3442_v47 = vld [vmem:[#allocation2 + $0x88] sm:$0xff] }
 0x1c1   :  { %2115 = vst [vmem:[#allocation8 + $0x200] sm:$0x7] %v756_v14  ;;  %2108 = vst [vmem:[#allocation8 + $0x1c8] sm:$0xff] %v755_v16  ;;  %901 = vrot.lane.b32.xlu1 %v3332_v58, %s2296_s1  ;;  %899 = vrot.lane.b32.xlu0 %v3336_v24, %s2296_s1  ;;  %v3440_v43 = vld [vmem:[#allocation2 + $0x98] sm:$0x7]  ;;  %v3456_v14 = vld [vmem:[#allocation5 + $0x8] sm:$0xff] }
 0x1c2   :  { %v3460_v16 = vld [vmem:[#allocation5] sm:$0xff] }
 0x1c3   :  { %v3340_v59 = vpop.permute.xlu1 %588  ;;  %v3342_v60 = vpop.permute.xlu0 %586  ;;  %v3510_v3 = vld [vmem:[#allocation7 + $0x50] sm:$0xff] }
 0x1c4   :  { %5216 = vst [vmem:[#allocation19_spill] sm:$0xff] %v3340_v59  ;;  %5217 = vst [vmem:[#allocation23_spill] sm:$0xff] %v3342_v60  ;;  %v3522_v63 = vld [vmem:[#allocation7 + $0x90] sm:$0xff] }
 0x1c5   :  { %905 = vrot.lane.b32.xlu1 %v3344_v4, %s2296_s1  ;;  %903 = vrot.lane.b32.xlu0 %v3348_v5, %s2296_s1 }
 0x1c7   :  { %v3352_v18 = vpop.permute.xlu1 %592  ;;  %v3354_v20 = vpop.permute.xlu0 %590 }
 0x1c8   :  { %5218 = vst [vmem:[#allocation20_spill] sm:$0xff] %v3352_v18  ;;  %5219 = vst [vmem:[#allocation24_spill] sm:$0xff] %v3354_v20 }
 0x1c9   :  { %919 = vrot.lane.b32.xlu1 %v5220_v53, %s2285_s2  ;;  %917 = vrot.lane.b32.xlu0 %v5221_v21, %s2285_s2 }
 0x1cb   :  { %v3360_v34 = vpop.permute.xlu1 %596  ;;  %v3362_v51 = vpop.permute.xlu0 %594 }
 0x1cc   :  { %5222 = vst [vmem:[#allocation30_spill] sm:$0xff] %v3360_v34  ;;  %5223 = vst [vmem:[#allocation31_spill] sm:$0xff] %v3362_v51 }
 0x1cd   :  { %923 = vrot.lane.b32.xlu1 %v5224_v23, %s2285_s2  ;;  %921 = vrot.lane.b32.xlu0 %v5225_v49, %s2285_s2 }
 0x1cf   :  { %v3368_v25 = vpop.permute.xlu1 %600  ;;  %v3370_v1 = vpop.permute.xlu0 %598 }
 0x1d0   :  { %5226 = vst [vmem:[#allocation34_spill] sm:$0xff] %v3368_v25  ;;  %5227 = vst [vmem:[#allocation35_spill] sm:$0xff] %v3370_v1 }
 0x1d1   :  { %927 = vrot.lane.b32.xlu1 %v5228_v12, %s2285_s2  ;;  %925 = vrot.lane.b32.xlu0 %v5229_v45, %s2285_s2 }
 0x1d3   :  { %v3376_v36 = vpop.permute.xlu1 %604  ;;  %v3378_v11 = vpop.permute.xlu0 %602 }
 0x1d4   :  { %5230 = vst [vmem:[#allocation36_spill] sm:$0xff] %v3376_v36  ;;  %5231 = vst [vmem:[#allocation37_spill] sm:$0xff] %v3378_v11  ;;  %v3532_v11 = vld [vmem:[#allocation7 + $0xf0] sm:$0xff] }
 0x1d5   :  { %931 = vrot.lane.b32.xlu1 %v5232_v17, %s2285_s2  ;;  %929 = vrot.lane.b32.xlu0 %v5233_v30, %s2285_s2  ;;  %v3534_v36 = vld [vmem:[#allocation7 + $0xd0] sm:$0xff] }
 0x1d7   :  { %v3384_v15 = vpop.permute.xlu1 %769  ;;  %v3386_v44 = vpop.permute.xlu0 %767 }
 0x1d9   :  { %935 = vrot.lane.b32.xlu1 %v5234_v50, %s2285_s2  ;;  %933 = vrot.lane.b32.xlu0 %v5235_v26, %s2285_s2  ;;  %v3496_v50 = vld [vmem:[#allocation7 + $0x30] sm:$0xff] }
 0x1da   :  { %v3498_v26 = vld [vmem:[#allocation7 + $0x10] sm:$0xff] }
 0x1db   :  { %v3396_v52 = vpop.permute.xlu1 %773  ;;  %v3398_v40 = vpop.permute.xlu0 %771 }
 0x1dc   :  { %5236 = vst [vmem:[#allocation38_spill] sm:$0xff] %v3396_v52  ;;  %5237 = vst [vmem:[#allocation25_spill] sm:$0xff] %v3398_v40 }
 0x1dd   :  { %959 = vrot.lane.b32.xlu1 %v3392_v27, %s2285_s2  ;;  %957 = vrot.lane.b32.xlu0 %v3394_v2, %s2285_s2 }
 0x1df   :  { %v3408_v7 = vpop.permute.xlu1 %777  ;;  %v3410_v38 = vpop.permute.xlu0 %775 }
 0x1e0   :  { %5238 = vst [vmem:[#allocation26_spill] sm:$0xff] %v3408_v7  ;;  %5239 = vst [vmem:[#allocation15_spill] sm:$0xff] %v3410_v38 }
 0x1e1   :  { %963 = vrot.lane.b32.xlu1 %v3404_v37, %s2285_s2  ;;  %961 = vrot.lane.b32.xlu0 %v3406_v6, %s2285_s2 }
 0x1e3   :  { %v3420_v48 = vpop.permute.xlu1 %781  ;;  %v3422_v35 = vpop.permute.xlu0 %779 }
 0x1e4   :  { %5240 = vst [vmem:[#allocation13_spill] sm:$0xff] %v3420_v48  ;;  %5241 = vst [vmem:[#allocation14_spill] sm:$0xff] %v3422_v35 }
 0x1e5   :  { %967 = vrot.lane.b32.xlu1 %v3416_v42, %s2285_s2  ;;  %965 = vrot.lane.b32.xlu0 %v3418_v10, %s2285_s2 }
 0x1e7   :  { %v3432_v29 = vpop.permute.xlu1 %785  ;;  %v3434_v33 = vpop.permute.xlu0 %783 }
 0x1e8   :  { %5242 = vst [vmem:[#allocation12_spill] sm:$0xff] %v3432_v29  ;;  %5243 = vst [vmem:[#allocation17_spill] sm:$0xff] %v3434_v33 }
 0x1e9   :  { %971 = vrot.lane.b32.xlu1 %v3428_v28, %s2285_s2  ;;  %969 = vrot.lane.b32.xlu0 %v3430_v54, %s2285_s2 }
 0x1eb   :  { %v3444_v56 = vpop.permute.xlu1 %799  ;;  %v3446_v57 = vpop.permute.xlu0 %797 }
 0x1ed   :  { %975 = vrot.lane.b32.xlu1 %v3440_v43, %s2285_s2  ;;  %973 = vrot.lane.b32.xlu0 %v3442_v47, %s2285_s2 }
 0x1ef   :  { %v3452_v9 = vpop.permute.xlu1 %803  ;;  %v3454_v8 = vpop.permute.xlu0 %801 }
 0x1f1   :  { %989 = vrot.lane.b32.xlu1 %v3456_v14, %s2295_s8  ;;  %987 = vrot.lane.b32.xlu0 %v3460_v16, %s2295_s8 }
 0x1f3   :  { %v3464_v53 = vpop.permute.xlu1 %807  ;;  %v3466_v21 = vpop.permute.xlu0 %805 }
 0x1f4   :  { %5244 = vst [vmem:[#allocation18_spill] sm:$0xff] %v3464_v53  ;;  %5245 = vst [vmem:[#allocation21_spill] sm:$0xff] %v3466_v21 }
 0x1f5   :  { %993 = vrot.lane.b32.xlu1 %v3266_v55, %s2295_s8  ;;  %991 = vrot.lane.b32.xlu0 %v3270_v31, %s2295_s8 }
 0x1f7   :  { %v3472_v23 = vpop.permute.xlu1 %811  ;;  %v3474_v49 = vpop.permute.xlu0 %809 }
 0x1f8   :  { %5246 = vst [vmem:[#allocation27_spill] sm:$0xff] %v3472_v23  ;;  %5247 = vst [vmem:[#allocation43_spill] sm:$0xff] %v3474_v49 }
 0x1f9   :  { %997 = vrot.lane.b32.xlu1 %v3308_v19, %s2295_s8  ;;  %995 = vrot.lane.b32.xlu0 %v3312_v62, %s2295_s8 }
 0x1fb   :  { %v3480_v12 = vpop.permute.xlu1 %815  ;;  %v3482_v45 = vpop.permute.xlu0 %813 }
 0x1fc   :  { %5248 = vst [vmem:[#allocation44_spill] sm:$0xff] %v3480_v12  ;;  %5249 = vst [vmem:[#allocation45_spill] sm:$0xff] %v3482_v45 }
 0x1fd   :  { %1001 = vrot.lane.b32.xlu1 %v3332_v58, %s2295_s8  ;;  %999 = vrot.lane.b32.xlu0 %v3336_v24, %s2295_s8 }
 0x1ff   :  { %v3488_v17 = vpop.permute.xlu1 %829  ;;  %v3490_v30 = vpop.permute.xlu0 %827 }
 0x201   :  { %1005 = vrot.lane.b32.xlu1 %v3344_v4, %s2295_s8  ;;  %1003 = vrot.lane.b32.xlu0 %v3348_v5, %s2295_s8 }
 0x203   :  { %v3500_v61 = vpop.permute.xlu1 %833  ;;  %v3502_v0 = vpop.permute.xlu0 %831 }
 0x204   :  { %5250 = vst [vmem:[#allocation46_spill] sm:$0xff] %v3500_v61  ;;  %5251 = vst [vmem:[#allocation47_spill] sm:$0xff] %v3502_v0 }
 0x205   :  { %1029 = vrot.lane.b32.xlu1 %v3496_v50, %s2288_s28  ;;  %1027 = vrot.lane.b32.xlu0 %v3498_v26, %s2288_s28 }
 0x207   :  { %v3512_v41 = vpop.permute.xlu1 %837  ;;  %v3514_v22 = vpop.permute.xlu0 %835 }
 0x208   :  { %5252 = vst [vmem:[#allocation48_spill] sm:$0xff] %v3512_v41  ;;  %5253 = vst [vmem:[#allocation49_spill] sm:$0xff] %v3514_v22 }
 0x209   :  { %1033 = vrot.lane.b32.xlu1 %v3508_v39, %s2288_s28  ;;  %1031 = vrot.lane.b32.xlu0 %v3510_v3, %s2288_s28 }
 0x20b   :  { %v3524_v32 = vpop.permute.xlu1 %841  ;;  %v3526_v13 = vpop.permute.xlu0 %839 }
 0x20c   :  { %5254 = vst [vmem:[#allocation50_spill] sm:$0xff] %v3524_v32  ;;  %5255 = vst [vmem:[#allocation51_spill] sm:$0xff] %v3526_v13  ;;  %v3544_v32 = vld [vmem:[#allocation7 + $0x130] sm:$0x7] }
 0x20d   :  { %1037 = vrot.lane.b32.xlu1 %v3520_v46, %s2288_s28  ;;  %1035 = vrot.lane.b32.xlu0 %v3522_v63, %s2288_s28  ;;  %v3546_v13 = vld [vmem:[#allocation7 + $0x110] sm:$0xff] }
 0x20f   :  { %v3536_v25 = vpop.permute.xlu1 %845  ;;  %v3538_v45 = vpop.permute.xlu0 %843 }
 0x210   :  { %5256 = vst [vmem:[#allocation52_spill] sm:$0xff] %v3536_v25  ;;  %5257 = vst [vmem:[#allocation53_spill] sm:$0xff] %v3538_v45 }
 0x211   :  { %1041 = vrot.lane.b32.xlu1 %v3532_v11, %s2288_s28  ;;  %1039 = vrot.lane.b32.xlu0 %v3534_v36, %s2288_s28 }
 0x213   :  { %v3548_v1 = vpop.permute.xlu1 %859  ;;  %v3550_v12 = vpop.permute.xlu0 %857 }
 0x215   :  { %1045 = vrot.lane.b32.xlu1 %v3544_v32, %s2288_s28  ;;  %1043 = vrot.lane.b32.xlu0 %v3546_v13, %s2288_s28 }
 0x217   :  { %v3556_v45 = vpop.permute.xlu1 %863  ;;  %v3558_v25 = vpop.permute.xlu0 %861 }
 0x218   :  { %5258 = vst [vmem:[#allocation54_spill] sm:$0xff] %v3556_v45  ;;  %5259 = vst [vmem:[#allocation55_spill] sm:$0xff] %v3558_v25 }
 0x219   :  { %1059 = vrot.lane.b32.xlu1 %v3392_v27, %s2287_s27  ;;  %1057 = vrot.lane.b32.xlu0 %v3394_v2, %s2287_s27 }
 0x21b   :  { %v3564_v23 = vpop.permute.xlu1 %867  ;;  %v3566_v49 = vpop.permute.xlu0 %865 }
 0x21c   :  { %5260 = vst [vmem:[#allocation56_spill] sm:$0xff] %v3564_v23  ;;  %5261 = vst [vmem:[#allocation57_spill] sm:$0xff] %v3566_v49 }
 0x21d   :  { %1063 = vrot.lane.b32.xlu1 %v3404_v37, %s2287_s27  ;;  %1061 = vrot.lane.b32.xlu0 %v3406_v6, %s2287_s27 }
 0x21f   :  { %v3572_v41 = vpop.permute.xlu1 %871  ;;  %v3574_v34 = vpop.permute.xlu0 %869 }
 0x220   :  { %5262 = vst [vmem:[#allocation58_spill] sm:$0xff] %v3572_v41  ;;  %5263 = vst [vmem:[#allocation59_spill] sm:$0xff] %v3574_v34 }
 0x221   :  { %1067 = vrot.lane.b32.xlu1 %v3416_v42, %s2287_s27  ;;  %1065 = vrot.lane.b32.xlu0 %v3418_v10, %s2287_s27 }
 0x223   :  { %v3580_v22 = vpop.permute.xlu1 %875  ;;  %v3582_v23 = vpop.permute.xlu0 %873 }
 0x224   :  { %5264 = vst [vmem:[#allocation60_spill] sm:$0xff] %v3580_v22  ;;  %5265 = vst [vmem:[#allocation61_spill] sm:$0xff] %v3582_v23 }
 0x225   :  { %1071 = vrot.lane.b32.xlu1 %v3428_v28, %s2287_s27  ;;  %1069 = vrot.lane.b32.xlu0 %v3430_v54, %s2287_s27 }
 0x227   :  { %v3588_v49 = vpop.permute.xlu1 %889  ;;  %v3590_v41 = vpop.permute.xlu0 %887 }
 0x229   :  { %1075 = vrot.lane.b32.xlu1 %v3440_v43, %s2287_s27  ;;  %1073 = vrot.lane.b32.xlu0 %v3442_v47, %s2287_s27 }
 0x22b   :  { %v3596_v34 = vpop.permute.xlu1 %893  ;;  %v3598_v22 = vpop.permute.xlu0 %891 }
 0x22c   :  { %5266 = vst [vmem:[#allocation62_spill] sm:$0xff] %v3596_v34  ;;  %5267 = vst [vmem:[#allocation63_spill] sm:$0xff] %v3598_v22 }
 0x22d   :  { %1089 = vrot.lane.b32.xlu1 %v3456_v14, %s2285_s2  ;;  %1087 = vrot.lane.b32.xlu0 %v3460_v16, %s2285_s2 }
 0x22f   :  { %v3604_v23 = vpop.permute.xlu1 %897  ;;  %v3606_v7 = vpop.permute.xlu0 %895 }
 0x230   :  { %5268 = vst [vmem:[#allocation64_spill] sm:$0xff] %v3604_v23  ;;  %5269 = vst [vmem:[#allocation65_spill] sm:$0xff] %v3606_v7 }
 0x231   :  { %1093 = vrot.lane.b32.xlu1 %v3266_v55, %s2285_s2  ;;  %1091 = vrot.lane.b32.xlu0 %v3270_v31, %s2285_s2 }
 0x233   :  { %v3612_v53 = vpop.permute.xlu1 %901  ;;  %v3614_v51 = vpop.permute.xlu0 %899 }
 0x234   :  { %5270 = vst [vmem:[#allocation66_spill] sm:$0xff] %v3612_v53  ;;  %5271 = vst [vmem:[#allocation67_spill] sm:$0xff] %v3614_v51 }
 0x235   :  { %1097 = vrot.lane.b32.xlu1 %v3308_v19, %s2285_s2  ;;  %1095 = vrot.lane.b32.xlu0 %v3312_v62, %s2285_s2 }
 0x237   :  { %v3620_v34 = vpop.permute.xlu1 %905  ;;  %v3622_v23 = vpop.permute.xlu0 %903 }
 0x238   :  { %5272 = vst [vmem:[#allocation68_spill] sm:$0xff] %v3620_v34  ;;  %5273 = vst [vmem:[#allocation69_spill] sm:$0xff] %v3622_v23 }
 0x239   :  { %1101 = vrot.lane.b32.xlu1 %v3332_v58, %s2285_s2  ;;  %1099 = vrot.lane.b32.xlu0 %v3336_v24, %s2285_s2 }
 0x23b   :  { %v3628_v7 = vpop.permute.xlu1 %919  ;;  %v3630_v53 = vpop.permute.xlu0 %917 }
 0x23d   :  { %1105 = vrot.lane.b32.xlu1 %v3344_v4, %s2285_s2  ;;  %1103 = vrot.lane.b32.xlu0 %v3348_v5, %s2285_s2 }
 0x23f   :  { %v3636_v51 = vpop.permute.xlu1 %923  ;;  %v3638_v34 = vpop.permute.xlu0 %921 }
 0x240   :  { %5274 = vst [vmem:[#allocation70_spill] sm:$0xff] %v3636_v51 }
 0x241   :  { %1119 = vrot.lane.b32.xlu1 %v3496_v50, %s2291_s4  ;;  %1117 = vrot.lane.b32.xlu0 %v3498_v26, %s2291_s4 }
 0x243   :  { %v3644_v23 = vpop.permute.xlu1 %927  ;;  %v3646_v45 = vpop.permute.xlu0 %925 }
 0x244   :  { %5275 = vst [vmem:[#allocation71_spill] sm:$0xff] %v3644_v23  ;;  %5276 = vst [vmem:[#allocation72_spill] sm:$0xff] %v3646_v45 }
 0x245   :  { %1123 = vrot.lane.b32.xlu1 %v3508_v39, %s2291_s4  ;;  %1121 = vrot.lane.b32.xlu0 %v3510_v3, %s2291_s4 }
 0x247   :  { %v3652_v38 = vpop.permute.xlu1 %931  ;;  %v3654_v51 = vpop.permute.xlu0 %929 }
 0x248   :  { %5277 = vst [vmem:[#allocation73_spill] sm:$0xff] %v3652_v38  ;;  %5278 = vst [vmem:[#allocation74_spill] sm:$0xff] %v3654_v51 }
 0x249   :  { %1127 = vrot.lane.b32.xlu1 %v3520_v46, %s2291_s4  ;;  %1125 = vrot.lane.b32.xlu0 %v3522_v63, %s2291_s4 }
 0x24b   :  { %v3660_v21 = vpop.permute.xlu1 %935  ;;  %v3662_v23 = vpop.permute.xlu0 %933 }
 0x24c   :  { %5279 = vst [vmem:[#allocation75_spill] sm:$0xff] %v3660_v21  ;;  %5280 = vst [vmem:[#allocation76_spill] sm:$0xff] %v3662_v23 }
 0x24d   :  { %1131 = vrot.lane.b32.xlu1 %v3532_v11, %s2291_s4  ;;  %1129 = vrot.lane.b32.xlu0 %v3534_v36, %s2291_s4 }
 0x24f   :  { %v3668_v45 = vpop.permute.xlu1 %959  ;;  %v3670_v38 = vpop.permute.xlu0 %957 }
 0x251   :  { %1135 = vrot.lane.b32.xlu1 %v3544_v32, %s2291_s4  ;;  %1133 = vrot.lane.b32.xlu0 %v3546_v13, %s2291_s4 }
 0x253   :  { %v3676_v51 = vpop.permute.xlu1 %963  ;;  %v3678_v21 = vpop.permute.xlu0 %961 }
 0x254   :  { %5281 = vst [vmem:[#allocation77_spill] sm:$0xff] %v3676_v51  ;;  %5282 = vst [vmem:[#allocation78_spill] sm:$0xff] %v3678_v21 }
 0x255   :  { %1149 = vrot.lane.b32.xlu1 %v3392_v27, %s2295_s8  ;;  %1147 = vrot.lane.b32.xlu0 %v3394_v2, %s2295_s8 }
 0x257   :  { %v3684_v23 = vpop.permute.xlu1 %967  ;;  %v3686_v33 = vpop.permute.xlu0 %965 }
 0x258   :  { %5283 = vst [vmem:[#allocation79_spill] sm:$0xff] %v3684_v23  ;;  %5284 = vst [vmem:[#allocation80_spill] sm:$0xff] %v3686_v33 }
 0x259   :  { %1153 = vrot.lane.b32.xlu1 %v3404_v37, %s2295_s8  ;;  %1151 = vrot.lane.b32.xlu0 %v3406_v6, %s2295_s8 }
 0x25b   :  { %v3692_v29 = vpop.permute.xlu1 %971  ;;  %v3694_v51 = vpop.permute.xlu0 %969 }
 0x25c   :  { %5285 = vst [vmem:[#allocation81_spill] sm:$0xff] %v3692_v29  ;;  %5286 = vst [vmem:[#allocation82_spill] sm:$0xff] %v3694_v51 }
 0x25d   :  { %1157 = vrot.lane.b32.xlu1 %v3416_v42, %s2295_s8  ;;  %1155 = vrot.lane.b32.xlu0 %v3418_v10, %s2295_s8 }
 0x25f   :  { %v3700_v22 = vpop.permute.xlu1 %975  ;;  %v3702_v23 = vpop.permute.xlu0 %973 }
 0x260   :  { %5287 = vst [vmem:[#allocation83_spill] sm:$0xff] %v3700_v22  ;;  %5288 = vst [vmem:[#allocation84_spill] sm:$0xff] %v3702_v23 }
 0x261   :  { %1161 = vrot.lane.b32.xlu1 %v3428_v28, %s2295_s8  ;;  %1159 = vrot.lane.b32.xlu0 %v3430_v54, %s2295_s8 }
 0x263   :  { %v3708_v33 = vpop.permute.xlu1 %989  ;;  %v3710_v25 = vpop.permute.xlu0 %987 }
 0x264   :  { %5289 = vst [vmem:[#allocation85_spill] sm:$0xff] %v3708_v33 }
 0x265   :  { %1165 = vrot.lane.b32.xlu1 %v3440_v43, %s2295_s8  ;;  %1163 = vrot.lane.b32.xlu0 %v3442_v47, %s2295_s8 }
 0x267   :  { %v3716_v61 = vpop.permute.xlu1 %993  ;;  %v3718_v22 = vpop.permute.xlu0 %991 }
 0x268   :  { %5290 = vst [vmem:[#allocation86_spill] sm:$0xff] %v3716_v61  ;;  %5291 = vst [vmem:[#allocation87_spill] sm:$0xff] %v3718_v22 }
 0x269   :  { %1179 = vrot.lane.b32.xlu1 %v3456_v14, %s2291_s4  ;;  %1177 = vrot.lane.b32.xlu0 %v3460_v16, %s2291_s4 }
 0x26b   :  { %v3724_v23 = vpop.permute.xlu1 %997  ;;  %v3726_v51 = vpop.permute.xlu0 %995 }
 0x26c   :  { %5292 = vst [vmem:[#allocation88_spill] sm:$0xff] %v3724_v23  ;;  %5293 = vst [vmem:[#allocation89_spill] sm:$0xff] %v3726_v51 }
 0x26d   :  { %1183 = vrot.lane.b32.xlu1 %v3266_v55, %s2291_s4  ;;  %1181 = vrot.lane.b32.xlu0 %v3270_v31, %s2291_s4 }
 0x26f   :  { %v3732_v29 = vpop.permute.xlu1 %1001  ;;  %v3734_v61 = vpop.permute.xlu0 %999 }
 0x270   :  { %5294 = vst [vmem:[#allocation90_spill] sm:$0xff] %v3732_v29  ;;  %5295 = vst [vmem:[#allocation91_spill] sm:$0xff] %v3734_v61 }
 0x271   :  { %1187 = vrot.lane.b32.xlu1 %v3308_v19, %s2291_s4  ;;  %1185 = vrot.lane.b32.xlu0 %v3312_v62, %s2291_s4 }
 0x273   :  { %v3740_v14 = vpop.permute.xlu1 %1005  ;;  %v3742_v16 = vpop.permute.xlu0 %1003 }
 0x274   :  { %5296 = vst [vmem:[#allocation92_spill] sm:$0xff] %v3740_v14  ;;  %5297 = vst [vmem:[#allocation93_spill] sm:$0xff] %v3742_v16 }
 0x275   :  { %1191 = vrot.lane.b32.xlu1 %v3332_v58, %s2291_s4  ;;  %1189 = vrot.lane.b32.xlu0 %v3336_v24, %s2291_s4 }
 0x277   :  { %v3748_v55 = vpop.permute.xlu1 %1029  ;;  %v3750_v31 = vpop.permute.xlu0 %1027 }
 0x279   :  { %1195 = vrot.lane.b32.xlu1 %v3344_v4, %s2291_s4  ;;  %1193 = vrot.lane.b32.xlu0 %v3348_v5, %s2291_s4 }
 0x27b   :  { %v3756_v19 = vpop.permute.xlu1 %1033  ;;  %v3758_v62 = vpop.permute.xlu0 %1031 }
 0x27c   :  { %5298 = vst [vmem:[#allocation94_spill] sm:$0xff] %v3756_v19  ;;  %5299 = vst [vmem:[#allocation95_spill] sm:$0xff] %v3758_v62 }
 0x27d   :  { %1361 = vrot.lane.b32.xlu1 %v3496_v50, %s2287_s27  ;;  %1359 = vrot.lane.b32.xlu0 %v3498_v26, %s2287_s27 }
 0x27f   :  { %v3764_v58 = vpop.permute.xlu1 %1037  ;;  %v3766_v24 = vpop.permute.xlu0 %1035 }
 0x280   :  { %5300 = vst [vmem:[#allocation96_spill] sm:$0xff] %v3764_v58  ;;  %5301 = vst [vmem:[#allocation97_spill] sm:$0xff] %v3766_v24 }
 0x281   :  { %1365 = vrot.lane.b32.xlu1 %v3508_v39, %s2287_s27  ;;  %1363 = vrot.lane.b32.xlu0 %v3510_v3, %s2287_s27 }
 0x283   :  { %v3772_v4 = vpop.permute.xlu1 %1041  ;;  %v3774_v5 = vpop.permute.xlu0 %1039 }
 0x284   :  { %5302 = vst [vmem:[#allocation98_spill] sm:$0xff] %v3772_v4  ;;  %5303 = vst [vmem:[#allocation99_spill] sm:$0xff] %v3774_v5 }
 0x285   :  { %1369 = vrot.lane.b32.xlu1 %v3520_v46, %s2287_s27  ;;  %1367 = vrot.lane.b32.xlu0 %v3522_v63, %s2287_s27 }
 0x287   :  { %v3780_v14 = vpop.permute.xlu1 %1045  ;;  %v3782_v16 = vpop.permute.xlu0 %1043 }
 0x288   :  { %5304 = vst [vmem:[#allocation100_spill] sm:$0xff] %v3780_v14  ;;  %5305 = vst [vmem:[#allocation101_spill] sm:$0xff] %v3782_v16 }
 0x289   :  { %1373 = vrot.lane.b32.xlu1 %v3532_v11, %s2287_s27  ;;  %1371 = vrot.lane.b32.xlu0 %v3534_v36, %s2287_s27 }
 0x28b   :  { %v3788_v29 = vpop.permute.xlu1 %1059  ;;  %v3790_v4 = vpop.permute.xlu0 %1057 }
 0x28d   :  { %1377 = vrot.lane.b32.xlu1 %v3544_v32, %s2287_s27  ;;  %1375 = vrot.lane.b32.xlu0 %v3546_v13, %s2287_s27 }
 0x28f   :  { %v3796_v5 = vpop.permute.xlu1 %1063  ;;  %v3798_v14 = vpop.permute.xlu0 %1061 }
 0x290   :  { %5306 = vst [vmem:[#allocation102_spill] sm:$0xff] %v3796_v5  ;;  %5307 = vst [vmem:[#allocation103_spill] sm:$0xff] %v3798_v14 }
 0x291   :  { %1391 = vrot.lane.b32.xlu1 %v3392_v27, %s2290_s30  ;;  %1389 = vrot.lane.b32.xlu0 %v3394_v2, %s2290_s30 }
 0x293   :  { %v3804_v16 = vpop.permute.xlu1 %1067  ;;  %v3806_v61 = vpop.permute.xlu0 %1065 }
 0x294   :  { %5308 = vst [vmem:[#allocation104_spill] sm:$0xff] %v3804_v16  ;;  %5309 = vst [vmem:[#allocation105_spill] sm:$0xff] %v3806_v61 }
 0x295   :  { %1395 = vrot.lane.b32.xlu1 %v3404_v37, %s2290_s30  ;;  %1393 = vrot.lane.b32.xlu0 %v3406_v6, %s2290_s30 }
 0x297   :  { %v3812_v58 = vpop.permute.xlu1 %1071  ;;  %v3814_v23 = vpop.permute.xlu0 %1069 }
 0x298   :  { %5310 = vst [vmem:[#allocation106_spill] sm:$0xff] %v3812_v58  ;;  %5311 = vst [vmem:[#allocation107_spill] sm:$0xff] %v3814_v23 }
 0x299   :  { %1399 = vrot.lane.b32.xlu1 %v3416_v42, %s2290_s30  ;;  %1397 = vrot.lane.b32.xlu0 %v3418_v10, %s2290_s30 }
 0x29b   :  { %v3820_v24 = vpop.permute.xlu1 %1075  ;;  %v3822_v16 = vpop.permute.xlu0 %1073 }
 0x29c   :  { %5312 = vst [vmem:[#allocation108_spill] sm:$0xff] %v3820_v24  ;;  %5313 = vst [vmem:[#allocation109_spill] sm:$0xff] %v3822_v16 }
 0x29d   :  { %1403 = vrot.lane.b32.xlu1 %v3428_v28, %s2290_s30  ;;  %1401 = vrot.lane.b32.xlu0 %v3430_v54, %s2290_s30 }
 0x29f   :  { %v3828_v61 = vpop.permute.xlu1 %1089  ;;  %v3830_v58 = vpop.permute.xlu0 %1087 }
 0x2a0   :  { %5314 = vst [vmem:[#allocation110_spill] sm:$0xff] %v3828_v61  ;;  %5315 = vst [vmem:[#allocation111_spill] sm:$0xff] %v3830_v58 }
 0x2a1   :  { %1407 = vrot.lane.b32.xlu1 %v3440_v43, %s2290_s30  ;;  %1405 = vrot.lane.b32.xlu0 %v3442_v47, %s2290_s30 }
 0x2a3   :  { %v3836_v23 = vpop.permute.xlu1 %1093  ;;  %v3838_v24 = vpop.permute.xlu0 %1091 }
 0x2a4   :  { %5316 = vst [vmem:[#allocation112_spill] sm:$0xff] %v3836_v23  ;;  %5317 = vst [vmem:[#allocation113_spill] sm:$0xff] %v3838_v24 }
 0x2a5   :  { %1421 = vrot.lane.b32.xlu1 %v3496_v50, %s2294_s7  ;;  %1419 = vrot.lane.b32.xlu0 %v3498_v26, %s2294_s7 }
 0x2a7   :  { %v3844_v16 = vpop.permute.xlu1 %1097  ;;  %v3846_v51 = vpop.permute.xlu0 %1095 }
 0x2a8   :  { %5318 = vst [vmem:[#allocation114_spill] sm:$0xff] %v3844_v16  ;;  %5319 = vst [vmem:[#allocation115_spill] sm:$0xff] %v3846_v51 }
 0x2a9   :  { %1425 = vrot.lane.b32.xlu1 %v3508_v39, %s2294_s7  ;;  %1423 = vrot.lane.b32.xlu0 %v3510_v3, %s2294_s7 }
 0x2ab   :  { %v3852_v5 = vpop.permute.xlu1 %1101  ;;  %v3854_v23 = vpop.permute.xlu0 %1099 }
 0x2ac   :  { %5320 = vst [vmem:[#allocation116_spill] sm:$0xff] %v3852_v5  ;;  %5321 = vst [vmem:[#allocation117_spill] sm:$0xff] %v3854_v23  ;;  %v3900_v5 = vld [vmem:[#allocation7 + $0xb8] sm:$0xff] }
 0x2ad   :  { %1429 = vrot.lane.b32.xlu1 %v3520_v46, %s2294_s7  ;;  %1427 = vrot.lane.b32.xlu0 %v3522_v63, %s2294_s7  ;;  %v3876_v46 = vld [vmem:[#allocation7 + $0x38] sm:$0xff] }
 0x2ae   :  { %v3878_v63 = vld [vmem:[#allocation7 + $0x18] sm:$0xff] }
 0x2af   :  { %v3860_v50 = vpop.permute.xlu1 %1105  ;;  %v3862_v26 = vpop.permute.xlu0 %1103  ;;  %v3902_v23 = vld [vmem:[#allocation7 + $0x98] sm:$0xff] }
 0x2b0   :  { %5322 = vst [vmem:[#allocation118_spill] sm:$0xff] %v3860_v50  ;;  %5323 = vst [vmem:[#allocation119_spill] sm:$0xff] %v3862_v26 }
 0x2b1   :  { %1433 = vrot.lane.b32.xlu1 %v3532_v11, %s2294_s7  ;;  %1431 = vrot.lane.b32.xlu0 %v3534_v36, %s2294_s7  ;;  %v3888_v36 = vld [vmem:[#allocation7 + $0x78] sm:$0xff] }
 0x2b3   :  { %v3868_v39 = vpop.permute.xlu1 %1119  ;;  %v3870_v3 = vpop.permute.xlu0 %1117 }
 0x2b5   :  { %1437 = vrot.lane.b32.xlu1 %v3544_v32, %s2294_s7  ;;  %1435 = vrot.lane.b32.xlu0 %v3546_v13, %s2294_s7  ;;  %v3890_v32 = vld [vmem:[#allocation7 + $0x58] sm:$0xff] }
 0x2b7   :  { %v3880_v50 = vpop.permute.xlu1 %1123  ;;  %v3882_v11 = vpop.permute.xlu0 %1121 }
 0x2b8   :  { %5324 = vst [vmem:[#allocation120_spill] sm:$0xff] %v3880_v50  ;;  %5325 = vst [vmem:[#allocation121_spill] sm:$0xff] %v3882_v11 }
 0x2b9   :  { %1461 = vrot.lane.b32.xlu1 %v3876_v46, %s2290_s30  ;;  %1459 = vrot.lane.b32.xlu0 %v3878_v63, %s2290_s30 }
 0x2bb   :  { %v3892_v26 = vpop.permute.xlu1 %1127  ;;  %v3894_v13 = vpop.permute.xlu0 %1125 }
 0x2bc   :  { %5326 = vst [vmem:[#allocation122_spill] sm:$0xff] %v3892_v26  ;;  %5327 = vst [vmem:[#allocation123_spill] sm:$0xff] %v3894_v13  ;;  %v3912_v26 = vld [vmem:[#allocation7 + $0xf8] sm:$0xff] }
 0x2bd   :  { %1465 = vrot.lane.b32.xlu1 %v3888_v36, %s2290_s30  ;;  %1463 = vrot.lane.b32.xlu0 %v3890_v32, %s2290_s30  ;;  %v3914_v13 = vld [vmem:[#allocation7 + $0xd8] sm:$0xff] }
 0x2bf   :  { %v3904_v16 = vpop.permute.xlu1 %1131  ;;  %v3906_v51 = vpop.permute.xlu0 %1129 }
 0x2c0   :  { %5328 = vst [vmem:[#allocation124_spill] sm:$0xff] %v3904_v16  ;;  %5329 = vst [vmem:[#allocation125_spill] sm:$0xff] %v3906_v51  ;;  %v3924_v16 = vld [vmem:[#allocation7 + $0x138] sm:$0x7] }
 0x2c1   :  { %1469 = vrot.lane.b32.xlu1 %v3900_v5, %s2290_s30  ;;  %1467 = vrot.lane.b32.xlu0 %v3902_v23, %s2290_s30  ;;  %v3926_v51 = vld [vmem:[#allocation7 + $0x118] sm:$0xff] }
 0x2c3   :  { %v3916_v50 = vpop.permute.xlu1 %1135  ;;  %v3918_v19 = vpop.permute.xlu0 %1133 }
 0x2c4   :  { %5330 = vst [vmem:[#allocation126_spill] sm:$0xff] %v3916_v50  ;;  %5331 = vst [vmem:[#allocation127_spill] sm:$0xff] %v3918_v19 }
 0x2c5   :  { %1473 = vrot.lane.b32.xlu1 %v3912_v26, %s2290_s30  ;;  %1471 = vrot.lane.b32.xlu0 %v3914_v13, %s2290_s30 }
 0x2c7   :  { %v3928_v11 = vpop.permute.xlu1 %1149  ;;  %v3930_v24 = vpop.permute.xlu0 %1147 }
 0x2c8   :  { %5332 = vst [vmem:[#allocation128_spill] sm:$0xff] %v3928_v11 }
 0x2c9   :  { %1477 = vrot.lane.b32.xlu1 %v3924_v16, %s2290_s30  ;;  %1475 = vrot.lane.b32.xlu0 %v3926_v51, %s2290_s30 }
 0x2cb   :  { %v3936_v50 = vpop.permute.xlu1 %1153  ;;  %v3938_v19 = vpop.permute.xlu0 %1151 }
 0x2cc   :  { %5333 = vst [vmem:[#allocation129_spill] sm:$0xff] %v3936_v50  ;;  %5334 = vst [vmem:[#allocation130_spill] sm:$0xff] %v3938_v19 }
 0x2cd   :  { %1491 = vrot.lane.b32.xlu1 %v3876_v46, %s2278_s23  ;;  %1489 = vrot.lane.b32.xlu0 %v3878_v63, %s2278_s23 }
 0x2cf   :  { %v3944_v14 = vpop.permute.xlu1 %1157  ;;  %v3946_v62 = vpop.permute.xlu0 %1155 }
 0x2d0   :  { %5335 = vst [vmem:[#allocation131_spill] sm:$0xff] %v3944_v14  ;;  %5336 = vst [vmem:[#allocation132_spill] sm:$0xff] %v3946_v62 }
 0x2d1   :  { %1495 = vrot.lane.b32.xlu1 %v3888_v36, %s2278_s23  ;;  %1493 = vrot.lane.b32.xlu0 %v3890_v32, %s2278_s23 }
 0x2d3   :  { %v3952_v35 = vpop.permute.xlu1 %1161  ;;  %v3954_v50 = vpop.permute.xlu0 %1159 }
 0x2d4   :  { %5337 = vst [vmem:[#allocation133_spill] sm:$0xff] %v3952_v35  ;;  %5338 = vst [vmem:[#allocation134_spill] sm:$0xff] %v3954_v50 }
 0x2d5   :  { %1499 = vrot.lane.b32.xlu1 %v3900_v5, %s2278_s23  ;;  %1497 = vrot.lane.b32.xlu0 %v3902_v23, %s2278_s23 }
 0x2d7   :  { %v3960_v19 = vpop.permute.xlu1 %1165  ;;  %v3962_v14 = vpop.permute.xlu0 %1163 }
 0x2d8   :  { %5339 = vst [vmem:[#allocation135_spill] sm:$0xff] %v3960_v19  ;;  %5340 = vst [vmem:[#allocation136_spill] sm:$0xff] %v3962_v14 }
 0x2d9   :  { %1503 = vrot.lane.b32.xlu1 %v3912_v26, %s2278_s23  ;;  %1501 = vrot.lane.b32.xlu0 %v3914_v13, %s2278_s23 }
 0x2db   :  { %v3968_v62 = vpop.permute.xlu1 %1179  ;;  %v3970_v35 = vpop.permute.xlu0 %1177 }
 0x2dc   :  { %5341 = vst [vmem:[#allocation137_spill] sm:$0xff] %v3968_v62 }
 0x2dd   :  { %1507 = vrot.lane.b32.xlu1 %v3924_v16, %s2278_s23  ;;  %1505 = vrot.lane.b32.xlu0 %v3926_v51, %s2278_s23  ;;  %s2297_s23 = smov [#allocation8]  }
 0x2df   :  { %v3976_v50 = vpop.permute.xlu1 %1183  ;;  %v3978_v19 = vpop.permute.xlu0 %1181 }
 0x2e0   :  { %5342 = vst [vmem:[#allocation138_spill] sm:$0xff] %v3976_v50  ;;  %5343 = vst [vmem:[#allocation139_spill] sm:$0xff] %v3978_v19 }
 0x2e1   :  { %1521 = vrot.lane.b32.xlu1 %v3876_v46, %s2284_s22  ;;  %1519 = vrot.lane.b32.xlu0 %v3878_v63, %s2284_s22 }
 0x2e3   :  { %v3984_v14 = vpop.permute.xlu1 %1187  ;;  %v3986_v48 = vpop.permute.xlu0 %1185 }
 0x2e4   :  { %5344 = vst [vmem:[#allocation140_spill] sm:$0xff] %v3984_v14  ;;  %5345 = vst [vmem:[#allocation141_spill] sm:$0xff] %v3986_v48 }
 0x2e5   :  { %1525 = vrot.lane.b32.xlu1 %v3888_v36, %s2284_s22  ;;  %1523 = vrot.lane.b32.xlu0 %v3890_v32, %s2284_s22 }
 0x2e7   :  { %v3992_v62 = vpop.permute.xlu1 %1191  ;;  %v3994_v50 = vpop.permute.xlu0 %1189 }
 0x2e8   :  { %5346 = vst [vmem:[#allocation142_spill] sm:$0xff] %v3992_v62  ;;  %5347 = vst [vmem:[#allocation143_spill] sm:$0xff] %v3994_v50 }
 0x2e9   :  { %1529 = vrot.lane.b32.xlu1 %v3900_v5, %s2284_s22  ;;  %1527 = vrot.lane.b32.xlu0 %v3902_v23, %s2284_s22 }
 0x2eb   :  { %v4000_v19 = vpop.permute.xlu1 %1195  ;;  %v4002_v14 = vpop.permute.xlu0 %1193 }
 0x2ec   :  { %5348 = vst [vmem:[#allocation144_spill] sm:$0xff] %v4000_v19  ;;  %5349 = vst [vmem:[#allocation145_spill] sm:$0xff] %v4002_v14 }
 0x2ed   :  { %1533 = vrot.lane.b32.xlu1 %v3912_v26, %s2284_s22  ;;  %1531 = vrot.lane.b32.xlu0 %v3914_v13, %s2284_s22 }
 0x2ef   :  { %v4008_v48 = vpop.permute.xlu1 %1361  ;;  %v4010_v62 = vpop.permute.xlu0 %1359 }
 0x2f0   :  { %5350 = vst [vmem:[#allocation146_spill] sm:$0xff] %v4008_v48  ;;  %5351 = vst [vmem:[#allocation147_spill] sm:$0xff] %v4010_v62 }
 0x2f1   :  { %1537 = vrot.lane.b32.xlu1 %v3924_v16, %s2284_s22  ;;  %1535 = vrot.lane.b32.xlu0 %v3926_v51, %s2284_s22 }
 0x2f3   :  { %v4016_v50 = vpop.permute.xlu1 %1365  ;;  %v4018_v19 = vpop.permute.xlu0 %1363 }
 0x2f4   :  { %5352 = vst [vmem:[#allocation148_spill] sm:$0xff] %v4016_v50 }
 0x2f5   :  { %1551 = vrot.lane.b32.xlu1 %v3392_v27, %s2281_s9  ;;  %1549 = vrot.lane.b32.xlu0 %v3394_v2, %s2281_s9 }
 0x2f7   :  { %v4024_v14 = vpop.permute.xlu1 %1369  ;;  %v4026_v48 = vpop.permute.xlu0 %1367 }
 0x2f8   :  { %5353 = vst [vmem:[#allocation149_spill] sm:$0xff] %v4024_v14  ;;  %5354 = vst [vmem:[#allocation150_spill] sm:$0xff] %v4026_v48 }
 0x2f9   :  { %1555 = vrot.lane.b32.xlu1 %v3404_v37, %s2281_s9  ;;  %1553 = vrot.lane.b32.xlu0 %v3406_v6, %s2281_s9 }
 0x2fb   :  { %v4032_v62 = vpop.permute.xlu1 %1373  ;;  %v4034_v50 = vpop.permute.xlu0 %1371 }
 0x2fd   :  { %1559 = vrot.lane.b32.xlu1 %v3416_v42, %s2281_s9  ;;  %1557 = vrot.lane.b32.xlu0 %v3418_v10, %s2281_s9 }
 0x2ff   :  { %v4040_v27 = vpop.permute.xlu1 %1377  ;;  %v4042_v2 = vpop.permute.xlu0 %1375 }
 0x301   :  { %1563 = vrot.lane.b32.xlu1 %v3428_v28, %s2281_s9  ;;  %1561 = vrot.lane.b32.xlu0 %v3430_v54, %s2281_s9 }
 0x303   :  { %v4048_v37 = vpop.permute.xlu1 %1391  ;;  %v4050_v6 = vpop.permute.xlu0 %1389 }
 0x305   :  { %1567 = vrot.lane.b32.xlu1 %v3440_v43, %s2281_s9  ;;  %1565 = vrot.lane.b32.xlu0 %v3442_v47, %s2281_s9  ;;  %s2126_s9 = sshll.u32 %s2297_s23, 4  ;;  %s2127_s9 = int_to_ptr.vmem [resolvable:$true] %s2126_s9 }
 0x306   :  { %s2248_s10 = scalar_lea.vmem %s2127_s9, 8960  ;;  %p2253_p11 = scmp.lt.s32.totalorder %s2127_s9, %s2127_s9 }
 0x307   :  { %v4056_v42 = vpop.permute.xlu1 %1395  ;;  %v4058_v10 = vpop.permute.xlu0 %1393  ;;  %p2249_p10 = scmp.ne.s32.totalorder %s2127_s9, %s2248_s10  ;;  %p2254_p12 = scmp.lt.s32.totalorder %s2248_s10, %s2248_s10 }
 0x309   :  { %1581 = vrot.lane.b32.xlu1 %v3876_v46, %s2296_s1  ;;  %1579 = vrot.lane.b32.xlu0 %v3878_v63, %s2296_s1  ;;  %v1207_v46 = vsel %vm682_vm6, %v3386_v44, %v3446_v57  ;;  %p2255_p13 = por %p2254_p12, %p2253_p11 }
 0x30b   :  { %v4064_v28 = vpop.permute.xlu1 %1399  ;;  %v4066_v54 = vpop.permute.xlu0 %1397  ;;  %p2256_p0 = pnand %p2255_p13, %p2249_p10 }
 0x30c   :  { %5355 = vst [vmem:[#allocation151_spill] sm:$0xff] %v4064_v28  ;;  %5356 = vst [vmem:[#allocation152_spill] sm:$0xff] %v4066_v54 }
 0x30d   :  { %1585 = vrot.lane.b32.xlu1 %v3888_v36, %s2296_s1  ;;  %1583 = vrot.lane.b32.xlu0 %v3890_v32, %s2296_s1  ;;  %v1208_v36 = vsel %vm682_vm6, %v3384_v15, %v3444_v56  ;;  %v1217_v32 = vsel %vm693_vm7, %v1207_v46, %v3342_v60  ;;  %v2172_v60 = vld [vmem:[#allocation7 + $0x8] sm:$0xff] }
 0x30e   :  { %v1227_v57 = vsel %vm638_vm2, %v1217_v32, %v3490_v30  ;;  %v1218_v46 = vsel %vm693_vm7, %v1208_v36, %v3340_v59  ;;  %v1209_v36 = vsel %vm682_vm6, %v3398_v40, %v3454_v8  ;;  %v2173_v8 = vld [vmem:[#allocation7 + $0x28] sm:$0xff] }
 0x30f   :  { %v1404_v43 = vpop.permute.xlu1 %1403  ;;  %v1402_v47 = vpop.permute.xlu0 %1401  ;;  %v1237_v32 = vsel %vm714_vm8, %v1227_v57, %v2172_v60  ;;  %v5389_v59 = vld [vmem:[#allocation139_spill] sm:$0xff] }
 0x311   :  { %1589 = vrot.lane.b32.xlu1 %v3900_v5, %s2296_s1  ;;  %1587 = vrot.lane.b32.xlu0 %v3902_v23, %s2296_s1  ;;  %v1277_v23 = vsel %vm627_vm1, %v3630_v53, %v3670_v38 }
 0x313   :  { %v4079_v63 = vpop.permute.xlu1 %1407  ;;  %v4081_v48 = vpop.permute.xlu0 %1405 }
 0x315   :  { %1593 = vrot.lane.b32.xlu1 %v3912_v26, %s2296_s1  ;;  %1591 = vrot.lane.b32.xlu0 %v3914_v13, %s2296_s1  ;;  %v1287_v26 = vsel %vm693_vm7, %v1277_v23, %v3710_v25  ;;  %v1228_v13 = vsel %vm638_vm2, %v1218_v46, %v3488_v17  ;;  %v1247_v23 = vsel %vm725_vm9, %v1237_v32, %v3550_v12 }
 0x316   :  { %v1298_v54 = vsel %vm1297_vm11, %v1287_v26, %v3750_v31  ;;  %v1210_v31 = vsel %vm682_vm6, %v3396_v52, %v3452_v9  ;;  %v1238_v12 = vsel %vm714_vm8, %v1228_v13, %v2173_v8  ;;  %v1219_v9 = vsel %vm693_vm7, %v1209_v36, %v3354_v20  ;;  %v5379_v20 = vld [vmem:[#allocation84_spill] sm:$0xff] }
 0x317   :  { %v4097_v5 = vpop.permute.xlu1 %1421  ;;  %v4099_v56 = vpop.permute.xlu0 %1419  ;;  %v1308_v60 = vsel %vm660_vm4, %v1298_v54, %v3790_v4  ;;  %v1248_v32 = vsel %vm725_vm9, %v1238_v12, %v3548_v1  ;;  %v1229_v13 = vsel %vm638_vm2, %v1219_v9, %v3502_v0  ;;  %v1339_v36 = vsel %vm682_vm6, %v3870_v3, %v3930_v24 }
 0x318   :  { %v1349_v12 = vsel %vm627_vm1, %v1339_v36, %v3970_v35 }
 0x319   :  { %1597 = vrot.lane.b32.xlu1 %v3924_v16, %s2296_s1  ;;  %1595 = vrot.lane.b32.xlu0 %v3926_v51, %s2296_s1  ;;  %v1257_v16 = vsel %vm671_vm5, %v1247_v23, %v3590_v41  ;;  %v1318_v51 = vsel %vm725_vm9, %v1308_v60, %v3830_v58  ;;  %v1220_v23 = vsel %vm693_vm7, %v1210_v31, %v3352_v18 }
 0x31a   :  { %v1329_v54 = vsel %vm1328_vm12, %v1318_v51, %v3870_v3  ;;  %v1267_v26 = vsel %vm746_vm10, %v1257_v16, %v3630_v53  ;;  %v1258_v60 = vsel %vm671_vm5, %v1248_v32, %v3588_v49  ;;  %v1278_v53 = vsel %vm627_vm1, %v3628_v7, %v3668_v45 }
 0x31b   :  { %v4128_v57 = vpop.permute.xlu1 %1425  ;;  %v4130_v46 = vpop.permute.xlu0 %1423  ;;  %v1288_v1 = vsel %vm693_vm7, %v1278_v53, %v3708_v33  ;;  %v1268_v51 = vsel %vm746_vm10, %v1258_v60, %v3628_v7  ;;  %v1616_v3 = vsel %vm1609_vm13, %v4034_v50, %v1402_v47  ;;  %v1279_v32 = vsel %vm627_vm1, %v3638_v34, %v3678_v21  ;;  %v5361_v50 = vld [vmem:[#allocation137_spill] sm:$0xff]  ;;  %v5363_v53 = vld [vmem:[#allocation14_spill] sm:$0xff] }
 0x31c   :  { %5357 = vst [vmem:[#allocation153_spill] sm:$0xff] %v4128_v57  ;;  %5358 = vst [vmem:[#allocation154_spill] sm:$0xff] %v4130_v46  ;;  %v1299_v8 = vsel %vm1297_vm11, %v1288_v1, %v3748_v55  ;;  %v1289_v35 = vsel %vm693_vm7, %v1279_v32, %v3718_v22  ;;  %v5362_v47 = vld [vmem:[#allocation13_spill] sm:$0xff]  ;;  %v1626_v1 = vsel %vm1297_vm11, %v1616_v3, %v5363_v53  ;;  %v5364_v32 = vld [vmem:[#allocation95_spill] sm:$0xff] }
 0x31d   :  { %1783 = vrot.lane.b32.xlu1 %v1329_v54, %s2286_s26  ;;  %1781 = vrot.lane.b32.xlu0 %v1267_v26, %s2286_s26  ;;  %v1617_v54 = vsel %vm1609_vm13, %v4032_v62, %v1404_v43  ;;  %v2174_v26 = vld [vmem:[#allocation7 + $0x48] sm:$0xff]  ;;  %v1309_v7 = vsel %vm660_vm4, %v1299_v8, %v3788_v29  ;;  %v1340_v62 = vsel %vm682_vm6, %v3868_v39, %v3928_v11  ;;  %v5365_v3 = vld [vmem:[#allocation81_spill] sm:$0xff] }
 0x31e   :  { %v1239_v9 = vsel %vm714_vm8, %v1229_v13, %v2174_v26  ;;  %v1319_v55 = vsel %vm725_vm9, %v1309_v7, %v3828_v61  ;;  %v1350_v43 = vsel %vm627_vm1, %v1340_v62, %v5361_v50  ;;  %v1627_v13 = vsel %vm1297_vm11, %v1617_v54, %v5362_v47  ;;  %v5371_v50 = vld [vmem:[#allocation103_spill] sm:$0xff]  ;;  %v5461_v61 = vld [vmem:[#allocation93_spill] sm:$0xff] }
 0x31f   :  { %v4157_v16 = vpop.permute.xlu1 %1429  ;;  %v4159_v31 = vpop.permute.xlu0 %1427  ;;  %v1619_v8 = vsel %vm1609_vm13, %v4040_v27, %v4079_v63  ;;  %v1300_v7 = vsel %vm1297_vm11, %v1289_v35, %v5364_v32  ;;  %v2178_v22 = vld [vmem:[#allocation7 + $0xc8] sm:$0xff] }
 0x320   :  { %5359 = vst [vmem:[#allocation155_spill] sm:$0xff] %v4157_v16  ;;  %5360 = vst [vmem:[#allocation156_spill] sm:$0xff] %v4159_v31  ;;  %v1310_v35 = vsel %vm660_vm4, %v1300_v7, %v5371_v50  ;;  %v5391_v16 = vld [vmem:[#allocation94_spill] sm:$0xff]  ;;  %v5439_v46 = vld [vmem:[#allocation99_spill] sm:$0xff] }
 0x321   :  { %1787 = vrot.lane.b32.xlu1 %v1268_v51, %s2286_s26  ;;  %1785 = vrot.lane.b32.xlu0 %v1349_v12, %s2286_s26  ;;  %v1330_v51 = vsel %vm1328_vm12, %v1319_v55, %v3868_v39  ;;  %v1618_v12 = vsel %vm1609_vm13, %v4042_v2, %v4081_v48  ;;  %v5367_v39 = vld [vmem:[#allocation82_spill] sm:$0xff]  ;;  %v5370_v2 = vld [vmem:[#allocation55_spill] sm:$0xff] }
 0x322   :  { %v5369_v48 = vld [vmem:[#allocation46_spill] sm:$0xff]  ;;  %v1249_v63 = vsel %vm725_vm9, %v1239_v9, %v5370_v2  ;;  %v5376_v2 = vld [vmem:[#allocation121_spill] sm:$0xff]  ;;  %v5459_v11 = vld [vmem:[#allocation143_spill] sm:$0xff] }
 0x323   :  { %v1434_v60 = vpop.permute.xlu1 %1433  ;;  %v1432_v36 = vpop.permute.xlu0 %1431  ;;  %v1230_v27 = vsel %vm638_vm2, %v1220_v23, %v5369_v48  ;;  %v5404_v48 = vld [vmem:[#allocation30_spill] sm:$0xff] }
 0x324   :  { %v1637_v26 = vsel %vm638_vm2, %v1627_v13, %v1434_v60  ;;  %v1636_v54 = vsel %vm638_vm2, %v1626_v1, %v1432_v36  ;;  %v5372_v13 = vld [vmem:[#allocation63_spill] sm:$0xff]  ;;  %v5373_v1 = vld [vmem:[#allocation113_spill] sm:$0xff] }
 0x325   :  { %v4206_v62 = vsel %vm1640_vm14, %v1637_v26, %v5365_v3  ;;  %v4210_v55 = vsel %vm1640_vm14, %v1636_v54, %v5367_v39  ;;  %1791 = vrot.lane.b32.xlu1 %v1350_v43, %s2286_s26  ;;  %1789 = vrot.lane.b32.xlu0 %v1330_v51, %s2286_s26  ;;  %v1259_v60 = vsel %vm671_vm5, %v1249_v63, %v5372_v13  ;;  %v5374_v26 = vld [vmem:[#allocation12_spill] sm:$0xff]  ;;  %v5375_v51 = vld [vmem:[#allocation17_spill] sm:$0xff] }
 0x326   :  { %5366 = vst [vmem:[#allocation137_spill] sm:$0xff] %v4206_v62  ;;  %5368 = vst [vmem:[#allocation13_spill] sm:$0xff] %v4210_v55  ;;  %v1320_v36 = vsel %vm725_vm9, %v1310_v35, %v5373_v1  ;;  %v1629_v43 = vsel %vm1297_vm11, %v1619_v8, %v5374_v26  ;;  %v1628_v32 = vsel %vm1297_vm11, %v1618_v12, %v5375_v51  ;;  %v2175_v55 = vld [vmem:[#allocation7 + $0x68] sm:$0xff] }
 0x327   :  { %v1438_v54 = vpop.permute.xlu1 %1437  ;;  %v1436_v23 = vpop.permute.xlu0 %1435  ;;  %v1331_v7 = vsel %vm1328_vm12, %v1320_v36, %v5376_v2  ;;  %v1269_v63 = vsel %vm746_vm10, %v1259_v60, %v3638_v34  ;;  %v1240_v35 = vsel %vm714_vm8, %v1230_v27, %v2175_v55  ;;  %v5377_v62 = vld [vmem:[#allocation83_spill] sm:$0xff]  ;;  %v5383_v34 = vld [vmem:[#allocation54_spill] sm:$0xff] }
 0x328   :  { %v1639_v18 = vsel %vm638_vm2, %v1629_v43, %v1438_v54  ;;  %v1638_v9 = vsel %vm638_vm2, %v1628_v32, %v1436_v23  ;;  %v5381_v43 = vld [vmem:[#allocation21_spill] sm:$0xff]  ;;  %v5382_v36 = vld [vmem:[#allocation15_spill] sm:$0xff]  ;;  %v1250_v60 = vsel %vm725_vm9, %v1240_v35, %v5383_v34  ;;  %v5384_v55 = vld [vmem:[#allocation62_spill] sm:$0xff] }
 0x329   :  { %v4237_v8 = vsel %vm1640_vm14, %v1639_v18, %v5377_v62  ;;  %v4241_v12 = vsel %vm1640_vm14, %v1638_v9, %v5379_v20  ;;  %1795 = vrot.lane.b32.xlu1 %v1331_v7, %s2286_s26  ;;  %1793 = vrot.lane.b32.xlu0 %v1269_v63, %s2286_s26  ;;  %v1211_v54 = vsel %vm682_vm6, %v5382_v36, %v5381_v43  ;;  %v5385_v18 = vld [vmem:[#allocation77_spill] sm:$0xff]  ;;  %v5386_v32 = vld [vmem:[#allocation70_spill] sm:$0xff] }
 0x32a   :  { %5378 = vst [vmem:[#allocation14_spill] sm:$0xff] %v4237_v8  ;;  %5380 = vst [vmem:[#allocation95_spill] sm:$0xff] %v4241_v12  ;;  %v1260_v27 = vsel %vm671_vm5, %v1250_v60, %v5384_v55  ;;  %v1280_v23 = vsel %vm627_vm1, %v5386_v32, %v5385_v18  ;;  %v5387_v9 = vld [vmem:[#allocation130_spill] sm:$0xff]  ;;  %v5390_v60 = vld [vmem:[#allocation31_spill] sm:$0xff] }
 0x32b   :  { %v1341_v7 = vsel %vm682_vm6, %v5376_v2, %v5387_v9  ;;  %v4258_v12 = vpop.permute.xlu1 %1461  ;;  %v4260_v63 = vpop.permute.xlu0 %1459  ;;  %v5388_v8 = vld [vmem:[#allocation86_spill] sm:$0xff]  ;;  %v1270_v34 = vsel %vm746_vm10, %v1260_v27, %v5386_v32  ;;  %v1221_v31 = vsel %vm693_vm7, %v1211_v54, %v5390_v60  ;;  %v5396_v32 = vld [vmem:[#allocation80_spill] sm:$0xff] }
 0x32c   :  { %v1290_v43 = vsel %vm693_vm7, %v1280_v23, %v5388_v8  ;;  %v1351_v35 = vsel %vm627_vm1, %v1341_v7, %v5389_v59  ;;  %v5392_v2 = vld [vmem:[#allocation18_spill] sm:$0xff]  ;;  %v5394_v8 = vld [vmem:[#allocation49_spill] sm:$0xff]  ;;  %v5397_v55 = vld [vmem:[#allocation72_spill] sm:$0xff] }
 0x32d   :  { %v1301_v1 = vsel %vm1297_vm11, %v1290_v43, %v5391_v16  ;;  %1799 = vrot.lane.b32.xlu1 %v1270_v34, %s2286_s26  ;;  %1797 = vrot.lane.b32.xlu0 %v1351_v35, %s2286_s26  ;;  %v5393_v36 = vld [vmem:[#allocation26_spill] sm:$0xff]  ;;  %v1231_v59 = vsel %vm638_vm2, %v1221_v31, %v5394_v8  ;;  %v1281_v54 = vsel %vm627_vm1, %v5397_v55, %v5396_v32  ;;  %v5398_v60 = vld [vmem:[#allocation112_spill] sm:$0xff]  ;;  %v5399_v43 = vld [vmem:[#allocation129_spill] sm:$0xff] }
 0x32e   :  { %v1212_v23 = vsel %vm682_vm6, %v5393_v36, %v5392_v2  ;;  %v5395_v7 = vld [vmem:[#allocation102_spill] sm:$0xff]  ;;  %v5400_v34 = vld [vmem:[#allocation120_spill] sm:$0xff]  ;;  %v5402_v36 = vld [vmem:[#allocation89_spill] sm:$0xff] }
 0x32f   :  { %v1311_v27 = vsel %vm660_vm4, %v1301_v1, %v5395_v7  ;;  %v1342_v35 = vsel %vm682_vm6, %v5400_v34, %v5399_v43  ;;  %v4289_v0 = vpop.permute.xlu1 %1465  ;;  %v4291_v2 = vpop.permute.xlu0 %1463  ;;  %v1291_v31 = vsel %vm693_vm7, %v1281_v54, %v5402_v36  ;;  %v5403_v8 = vld [vmem:[#allocation138_spill] sm:$0xff]  ;;  %v5405_v43 = vld [vmem:[#allocation97_spill] sm:$0xff]  ;;  %v5406_v54 = vld [vmem:[#allocation48_spill] sm:$0xff] }
 0x330   :  { %v1321_v16 = vsel %vm725_vm9, %v1311_v27, %v5398_v60  ;;  %5401 = vst [vmem:[#allocation81_spill] sm:$0xff] %v4289_v0  ;;  %v1352_v1 = vsel %vm627_vm1, %v1342_v35, %v5403_v8  ;;  %v1222_v27 = vsel %vm693_vm7, %v1212_v23, %v5404_v48  ;;  %v2176_v60 = vld [vmem:[#allocation7 + $0x88] sm:$0xff]  ;;  %v1302_v28 = vsel %vm1297_vm11, %v1291_v31, %v5405_v43  ;;  %v5407_v8 = vld [vmem:[#allocation57_spill] sm:$0xff]  ;;  %v5426_v7 = vld [vmem:[#allocation96_spill] sm:$0xff] }
 0x331   :  { %v1332_v32 = vsel %vm1328_vm12, %v1321_v16, %v5400_v34  ;;  %v1241_v14 = vsel %vm714_vm8, %v1231_v59, %v2176_v60  ;;  %1803 = vrot.lane.b32.xlu1 %v1352_v1, %s2286_s26  ;;  %v1232_v36 = vsel %vm638_vm2, %v1222_v27, %v5406_v54  ;;  %v5408_v16 = vld [vmem:[#allocation105_spill] sm:$0xff]  ;;  %v5410_v60 = vld [vmem:[#allocation115_spill] sm:$0xff] }
 0x332   :  { %1801 = vrot.lane.b32.xlu0 %v1332_v32, %s2286_s26  ;;  %v1251_v35 = vsel %vm725_vm9, %v1241_v14, %v5407_v8  ;;  %v1312_v34 = vsel %vm660_vm4, %v1302_v28, %v5408_v16  ;;  %v5409_v23 = vld [vmem:[#allocation65_spill] sm:$0xff]  ;;  %v5413_v32 = vld [vmem:[#allocation123_spill] sm:$0xff] }
 0x333   :  { %v1261_v48 = vsel %vm671_vm5, %v1251_v35, %v5409_v23  ;;  %v1322_v59 = vsel %vm725_vm9, %v1312_v34, %v5410_v60  ;;  %v4316_v43 = vpop.permute.xlu1 %1469  ;;  %v4318_v31 = vpop.permute.xlu0 %1467  ;;  %v2177_v14 = vld [vmem:[#allocation7 + $0xa8] sm:$0xff]  ;;  %v5415_v34 = vld [vmem:[#allocation56_spill] sm:$0xff] }
 0x334   :  { %5411 = vst [vmem:[#allocation82_spill] sm:$0xff] %v4316_v43  ;;  %5412 = vst [vmem:[#allocation55_spill] sm:$0xff] %v4318_v31  ;;  %v1333_v1 = vsel %vm1328_vm12, %v1322_v59, %v5413_v32  ;;  %v1271_v27 = vsel %vm746_vm10, %v1261_v48, %v5397_v55  ;;  %v1242_v8 = vsel %vm714_vm8, %v1232_v36, %v2177_v14  ;;  %v5414_v28 = vld [vmem:[#allocation43_spill] sm:$0xff]  ;;  %v5417_v23 = vld [vmem:[#allocation64_spill] sm:$0xff] }
 0x335   :  { %1807 = vrot.lane.b32.xlu1 %v1333_v1, %s2286_s26  ;;  %v1213_v35 = vsel %vm682_vm6, %v5363_v53, %v5414_v28  ;;  %v1252_v60 = vsel %vm725_vm9, %v1242_v8, %v5415_v34  ;;  %v5416_v54 = vld [vmem:[#allocation27_spill] sm:$0xff]  ;;  %v5420_v14 = vld [vmem:[#allocation132_spill] sm:$0xff] }
 0x336   :  { %1805 = vrot.lane.b32.xlu0 %v1271_v27, %s2286_s26  ;;  %v1214_v59 = vsel %vm682_vm6, %v5362_v47, %v5416_v54  ;;  %v1262_v48 = vsel %vm671_vm5, %v1252_v60, %v5417_v23  ;;  %v5418_v55 = vld [vmem:[#allocation79_spill] sm:$0xff]  ;;  %v1343_v27 = vsel %vm682_vm6, %v5413_v32, %v5420_v14  ;;  %v5421_v8 = vld [vmem:[#allocation44_spill] sm:$0xff]  ;;  %v5423_v60 = vld [vmem:[#allocation141_spill] sm:$0xff] }
 0x337   :  { %v5419_v36 = vld [vmem:[#allocation71_spill] sm:$0xff]  ;;  %v4343_v31 = vpop.permute.xlu1 %1473  ;;  %v4345_v53 = vpop.permute.xlu0 %1471  ;;  %v1216_v28 = vsel %vm682_vm6, %v5374_v26, %v5421_v8  ;;  %v5422_v47 = vld [vmem:[#allocation88_spill] sm:$0xff]  ;;  %v1353_v34 = vsel %vm627_vm1, %v1343_v27, %v5423_v60  ;;  %v5425_v14 = vld [vmem:[#allocation45_spill] sm:$0xff] }
 0x338   :  { %v1282_v1 = vsel %vm627_vm1, %v5419_v36, %v5418_v55  ;;  %v1272_v55 = vsel %vm746_vm10, %v1262_v48, %v5419_v36  ;;  %v5424_v16 = vld [vmem:[#allocation35_spill] sm:$0xff]  ;;  %v1215_v0 = vsel %vm682_vm6, %v5375_v51, %v5425_v14  ;;  %v5427_v26 = vld [vmem:[#allocation34_spill] sm:$0xff]  ;;  %v5429_v36 = vld [vmem:[#allocation104_spill] sm:$0xff] }
 0x339   :  { %v1292_v54 = vsel %vm693_vm7, %v1282_v1, %v5422_v47  ;;  %v1223_v32 = vsel %vm693_vm7, %v1213_v35, %v5424_v16  ;;  %1811 = vrot.lane.b32.xlu1 %v1272_v55, %s2286_s26  ;;  %v1224_v1 = vsel %vm693_vm7, %v1214_v59, %v5427_v26  ;;  %v5428_v27 = vld [vmem:[#allocation51_spill] sm:$0xff]  ;;  %v5430_v8 = vld [vmem:[#allocation36_spill] sm:$0xff]  ;;  %v5431_v51 = vld [vmem:[#allocation74_spill] sm:$0xff] }
 0x33a   :  { %v1303_v21 = vsel %vm1297_vm11, %v1292_v54, %v5426_v7  ;;  %1809 = vrot.lane.b32.xlu0 %v1353_v34, %s2286_s26  ;;  %v1233_v48 = vsel %vm638_vm2, %v1223_v32, %v5428_v27  ;;  %v1226_v60 = vsel %vm693_vm7, %v1216_v28, %v5430_v8  ;;  %v1283_v7 = vsel %vm627_vm1, %v5431_v51, %v5367_v39  ;;  %v5432_v14 = vld [vmem:[#allocation114_spill] sm:$0xff]  ;;  %v5433_v54 = vld [vmem:[#allocation131_spill] sm:$0xff]  ;;  %v5435_v16 = vld [vmem:[#allocation37_spill] sm:$0xff] }
 0x33b   :  { %v1313_v35 = vsel %vm660_vm4, %v1303_v21, %v5429_v36  ;;  %v5434_v34 = vld [vmem:[#allocation122_spill] sm:$0xff]  ;;  %v4381_v26 = vpop.permute.xlu1 %1477  ;;  %v4383_v32 = vpop.permute.xlu0 %1475  ;;  %v1225_v21 = vsel %vm693_vm7, %v1215_v0, %v5435_v16  ;;  %v5436_v27 = vld [vmem:[#allocation91_spill] sm:$0xff]  ;;  %v5437_v8 = vld [vmem:[#allocation140_spill] sm:$0xff]  ;;  %v1243_v33 = vsel %vm714_vm8, %v1233_v48, %v2178_v22 }
 0x33c   :  { %v1323_v55 = vsel %vm725_vm9, %v1313_v35, %v5432_v14  ;;  %v1344_v59 = vsel %vm682_vm6, %v5434_v34, %v5433_v54  ;;  %v1293_v28 = vsel %vm693_vm7, %v1283_v7, %v5436_v27  ;;  %v5438_v14 = vld [vmem:[#allocation50_spill] sm:$0xff]  ;;  %v5440_v0 = vld [vmem:[#allocation52_spill] sm:$0xff]  ;;  %v5444_v22 = vld [vmem:[#allocation67_spill] sm:$0xff] }
 0x33d   :  { %v1354_v39 = vsel %vm627_vm1, %v1344_v59, %v5437_v8  ;;  %v1334_v35 = vsel %vm1328_vm12, %v1323_v55, %v5434_v34  ;;  %v1234_v18 = vsel %vm638_vm2, %v1224_v1, %v5438_v14  ;;  %v1304_v57 = vsel %vm1297_vm11, %v1293_v28, %v5439_v46  ;;  %v5441_v8 = vld [vmem:[#allocation53_spill] sm:$0xff]  ;;  %v5442_v55 = vld [vmem:[#allocation59_spill] sm:$0xff] }
 0x33e   :  { %1815 = vrot.lane.b32.xlu1 %v1354_v39, %s2286_s26  ;;  %1813 = vrot.lane.b32.xlu0 %v1334_v35, %s2286_s26  ;;  %v1236_v7 = vsel %vm638_vm2, %v1226_v60, %v5440_v0  ;;  %v1235_v59 = vsel %vm638_vm2, %v1225_v21, %v5441_v8  ;;  %v1253_v34 = vsel %vm725_vm9, %v1243_v33, %v5442_v55  ;;  %v5443_v1 = vld [vmem:[#allocation107_spill] sm:$0xff]  ;;  %v5445_v46 = vld [vmem:[#allocation117_spill] sm:$0xff] }
 0x33f   :  { %v1314_v16 = vsel %vm660_vm4, %v1304_v57, %v5443_v1  ;;  %v1263_v48 = vsel %vm671_vm5, %v1253_v34, %v5444_v22  ;;  %v4412_v39 = vpop.permute.xlu1 %1491  ;;  %v4414_v35 = vpop.permute.xlu0 %1489  ;;  %v2179_v60 = vld [vmem:[#allocation7 + $0xe8] sm:$0xff]  ;;  %v5446_v21 = vld [vmem:[#allocation125_spill] sm:$0xff]  ;;  %v5447_v57 = vld [vmem:[#allocation58_spill] sm:$0xff] }
 0x340   :  { %v1324_v28 = vsel %vm725_vm9, %v1314_v16, %v5445_v46  ;;  %v1244_v0 = vsel %vm714_vm8, %v1234_v18, %v2179_v60  ;;  %v1273_v33 = vsel %vm746_vm10, %v1263_v48, %v5431_v51  ;;  %v2180_v34 = vld [vmem:[#allocation7 + $0x128] sm:$0x7]  ;;  %v5448_v18 = vld [vmem:[#allocation60_spill] sm:$0xff]  ;;  %v5450_v51 = vld [vmem:[#allocation66_spill] sm:$0xff] }
 0x341   :  { %v1335_v8 = vsel %vm1328_vm12, %v1324_v28, %v5446_v21  ;;  %v1254_v55 = vsel %vm725_vm9, %v1244_v0, %v5447_v57  ;;  %v1246_v14 = vsel %vm714_vm8, %v1236_v7, %v2180_v34  ;;  %v2181_v16 = vld [vmem:[#allocation7 + $0x108] sm:$0xff]  ;;  %v5449_v28 = vld [vmem:[#allocation61_spill] sm:$0xff]  ;;  %v5452_v57 = vld [vmem:[#allocation68_spill] sm:$0xff] }
 0x342   :  { %v1245_v46 = vsel %vm714_vm8, %v1235_v59, %v2181_v16  ;;  %1819 = vrot.lane.b32.xlu1 %v1335_v8, %s2286_s26  ;;  %1817 = vrot.lane.b32.xlu0 %v1273_v33, %s2286_s26  ;;  %v1256_v60 = vsel %vm725_vm9, %v1246_v14, %v5448_v18  ;;  %v1264_v48 = vsel %vm671_vm5, %v1254_v55, %v5450_v51  ;;  %v5451_v0 = vld [vmem:[#allocation73_spill] sm:$0xff]  ;;  %v5453_v34 = vld [vmem:[#allocation90_spill] sm:$0xff]  ;;  %v5457_v18 = vld [vmem:[#allocation76_spill] sm:$0xff] }
 0x343   :  { %v1255_v9 = vsel %vm725_vm9, %v1245_v46, %v5449_v28  ;;  %v1284_v7 = vsel %vm627_vm1, %v5451_v0, %v5365_v3  ;;  %v1266_v59 = vsel %vm671_vm5, %v1256_v60, %v5452_v57  ;;  %v5454_v33 = vld [vmem:[#allocation134_spill] sm:$0xff]  ;;  %v4443_v16 = vpop.permute.xlu1 %1495  ;;  %v4445_v46 = vpop.permute.xlu0 %1493  ;;  %v1274_v55 = vsel %vm746_vm10, %v1264_v48, %v5451_v0 }
 0x344   :  { %v1294_v8 = vsel %vm693_vm7, %v1284_v7, %v5453_v34  ;;  %v1345_v14 = vsel %vm682_vm6, %v5446_v21, %v5454_v33  ;;  %5455 = vst [vmem:[#allocation103_spill] sm:$0xff] %v4443_v16  ;;  %5456 = vst [vmem:[#allocation63_spill] sm:$0xff] %v4445_v46  ;;  %v1285_v3 = vsel %vm627_vm1, %v5457_v18, %v5379_v20  ;;  %v5458_v28 = vld [vmem:[#allocation98_spill] sm:$0xff]  ;;  %v5460_v16 = vld [vmem:[#allocation69_spill] sm:$0xff] }
 0x345   :  { %v1305_v60 = vsel %vm1297_vm11, %v1294_v8, %v5458_v28  ;;  %v1355_v7 = vsel %vm627_vm1, %v1345_v14, %v5459_v11  ;;  %v1676_v21 = vsel %vm616_vm0, %v4316_v43, %v5429_v36  ;;  %v1265_v58 = vsel %vm671_vm5, %v1255_v9, %v5460_v16  ;;  %v5462_v0 = vld [vmem:[#allocation106_spill] sm:$0xff]  ;;  %v5463_v20 = vld [vmem:[#allocation75_spill] sm:$0xff]  ;;  %v5464_v8 = vld [vmem:[#allocation101_spill] sm:$0xff] }
 0x346   :  { %v1295_v48 = vsel %vm693_vm7, %v1285_v3, %v5461_v61  ;;  %v1315_v40 = vsel %vm660_vm4, %v1305_v60, %v5462_v0  ;;  %1823 = vrot.lane.b32.xlu1 %v1274_v55, %s2286_s26  ;;  %1821 = vrot.lane.b32.xlu0 %v1355_v7, %s2286_s26  ;;  %v1286_v11 = vsel %vm627_vm1, %v5463_v20, %v5377_v62  ;;  %v5465_v14 = vld [vmem:[#allocation116_spill] sm:$0xff]  ;;  %v5466_v28 = vld [vmem:[#allocation109_spill] sm:$0xff] }
 0x347   :  { %v1306_v36 = vsel %vm1297_vm11, %v1295_v48, %v5464_v8  ;;  %v1325_v9 = vsel %vm725_vm9, %v1315_v40, %v5465_v14  ;;  %v1275_v3 = vsel %vm746_vm10, %v1265_v58, %v5457_v18  ;;  %v5467_v43 = vld [vmem:[#allocation133_spill] sm:$0xff]  ;;  %v5468_v55 = vld [vmem:[#allocation124_spill] sm:$0xff]  ;;  %v1686_v52 = vsel %vm1609_vm13, %v1676_v21, %v5417_v23  ;;  %v1500_v62 = vpop.permute.xlu1 %1499  ;;  %v4483_v46 = vpop.permute.xlu0 %1497  ;;  %v5470_v40 = vld [vmem:[#allocation142_spill] sm:$0xff] }
 0x348   :  { %v1316_v60 = vsel %vm660_vm4, %v1306_v36, %v5466_v28  ;;  %v1346_v7 = vsel %vm682_vm6, %v5468_v55, %v5467_v43  ;;  %5469 = vst [vmem:[#allocation12_spill] sm:$0xff] %v4483_v46  ;;  %v1336_v48 = vsel %vm1328_vm12, %v1325_v9, %v5468_v55  ;;  %v1678_v58 = vsel %vm616_vm0, %v4343_v31, %v5462_v0  ;;  %v5471_v23 = vld [vmem:[#allocation92_spill] sm:$0xff]  ;;  %v5472_v14 = vld [vmem:[#allocation119_spill] sm:$0xff] }
 0x349   :  { %v1356_v8 = vsel %vm627_vm1, %v1346_v7, %v5470_v40  ;;  %v1677_v18 = vsel %vm616_vm0, %v4345_v53, %v5443_v1  ;;  %v1696_v36 = vsel %vm693_vm7, %v1686_v52, %v1500_v62  ;;  %v1296_v21 = vsel %vm693_vm7, %v1286_v11, %v5471_v23  ;;  %v5473_v0 = vld [vmem:[#allocation100_spill] sm:$0xff]  ;;  %v5474_v7 = vld [vmem:[#allocation127_spill] sm:$0xff] }
 0x34a   :  { %v1326_v46 = vsel %vm725_vm9, %v1316_v60, %v5472_v14  ;;  %v1706_v9 = vsel %vm649_vm3, %v1696_v36, %v5433_v54  ;;  %1827 = vrot.lane.b32.xlu1 %v1356_v8, %s2286_s26  ;;  %1825 = vrot.lane.b32.xlu0 %v1336_v48, %s2286_s26  ;;  %v1307_v55 = vsel %vm1297_vm11, %v1296_v21, %v5473_v0  ;;  %v5475_v60 = vld [vmem:[#allocation136_spill] sm:$0xff]  ;;  %v5476_v62 = vld [vmem:[#allocation147_spill] sm:$0xff] }
 0x34b   :  { %v1337_v1 = vsel %vm1328_vm12, %v1326_v46, %v5474_v7  ;;  %v1276_v52 = vsel %vm746_vm10, %v1266_v59, %v5463_v20  ;;  %v4512_v11 = vsel %vm1640_vm14, %v1706_v9, %v5422_v47  ;;  %v1347_v54 = vsel %vm682_vm6, %v5474_v7, %v5475_v60  ;;  %v1504_v8 = vpop.permute.xlu1 %1503  ;;  %v1502_v59 = vpop.permute.xlu0 %1501  ;;  %v5477_v20 = vld [vmem:[#allocation108_spill] sm:$0xff] }
 0x34c   :  { %v1610_v48 = vsel %vm1609_vm13, %v5476_v62, %v4050_v6  ;;  %v1688_v40 = vsel %vm1609_vm13, %v1678_v58, %v5450_v51  ;;  %v1687_v46 = vsel %vm1609_vm13, %v1677_v18, %v5444_v22  ;;  %v1680_v47 = vsel %vm616_vm0, %v4381_v26, %v5477_v20  ;;  %v5478_v18 = vld [vmem:[#allocation145_spill] sm:$0xff] }
 0x34d   :  { %v1679_v36 = vsel %vm616_vm0, %v4383_v32, %v5466_v28  ;;  %v1698_v21 = vsel %vm693_vm7, %v1688_v40, %v1504_v8  ;;  %v1697_v6 = vsel %vm693_vm7, %v1687_v46, %v1502_v59  ;;  %v1671_v51 = vsel %vm616_vm0, %v4260_v63, %v3790_v4 }
 0x34e   :  { %v1708_v22 = vsel %vm649_vm3, %v1698_v21, %v5467_v43  ;;  %v1707_v58 = vsel %vm649_vm3, %v1697_v6, %v5454_v33  ;;  %1831 = vrot.lane.b32.xlu1 %v1337_v1, %s2286_s26  ;;  %1829 = vrot.lane.b32.xlu0 %v1275_v3, %s2286_s26  ;;  %v1317_v28 = vsel %vm660_vm4, %v1307_v55, %v5477_v20  ;;  %v5479_v43 = vld [vmem:[#allocation146_spill] sm:$0xff]  ;;  %v5483_v20 = vld [vmem:[#allocation144_spill] sm:$0xff] }
 0x34f   :  { %v1357_v9 = vsel %vm627_vm1, %v1347_v54, %v5478_v18  ;;  %v1718_v0 = vsel %vm1640_vm14, %v1708_v22, %v5453_v34  ;;  %v4549_v4 = vsel %vm1640_vm14, %v1707_v58, %v5436_v27  ;;  %v1611_v33 = vsel %vm1609_vm13, %v5479_v43, %v4048_v37  ;;  %v1508_v7 = vpop.permute.xlu1 %1507  ;;  %v1506_v54 = vpop.permute.xlu0 %1505 }
 0x350   :  { %v1620_v3 = vsel %vm1297_vm11, %v1610_v48, %v3386_v44  ;;  %v1690_v55 = vsel %vm1609_vm13, %v1680_v47, %v5452_v57  ;;  %v1689_v1 = vsel %vm1609_vm13, %v1679_v36, %v5460_v16  ;;  %v1681_v27 = vsel %vm1609_vm13, %v1671_v51, %v3590_v41  ;;  %v5480_v48 = vld [vmem:[#allocation135_spill] sm:$0xff] }
 0x351   :  { %v1630_v34 = vsel %vm638_vm2, %v1620_v3, %v4099_v56  ;;  %v1700_v62 = vsel %vm693_vm7, %v1690_v55, %v1508_v7  ;;  %v1699_v37 = vsel %vm693_vm7, %v1689_v1, %v1506_v54  ;;  %v1691_v44 = vsel %vm693_vm7, %v1681_v27, %v4414_v35  ;;  %v5481_v56 = vld [vmem:[#allocation118_spill] sm:$0xff] }
 0x352   :  { %v1710_v57 = vsel %vm649_vm3, %v1700_v62, %v5480_v48  ;;  %v1709_v16 = vsel %vm649_vm3, %v1699_v37, %v5475_v60  ;;  %1835 = vrot.lane.b32.xlu1 %v1276_v52, %s2286_s26  ;;  %1833 = vrot.lane.b32.xlu0 %v1357_v9, %s2286_s26  ;;  %v1327_v41 = vsel %vm725_vm9, %v1317_v28, %v5481_v56  ;;  %v5482_v35 = vld [vmem:[#allocation126_spill] sm:$0xff] }
 0x353   :  { %v1720_v40 = vsel %vm1640_vm14, %v1710_v57, %v5471_v23  ;;  %v1719_v8 = vsel %vm1640_vm14, %v1709_v16, %v5461_v61  ;;  %v1348_v46 = vsel %vm682_vm6, %v5482_v35, %v5480_v48  ;;  %v4583_v59 = vpop.permute.xlu1 %1521  ;;  %v1520_v60 = vpop.permute.xlu0 %1519  ;;  %v1338_v52 = vsel %vm1328_vm12, %v1327_v41, %v5482_v35  ;;  %v5484_v57 = vld [vmem:[#allocation148_spill] sm:$0xff]  ;;  %v5486_v35 = vld [vmem:[#allocation38_spill] sm:$0xff] }
 0x354   :  { %v1358_v47 = vsel %vm627_vm1, %v1348_v46, %v5483_v20  ;;  %v1621_v36 = vsel %vm1297_vm11, %v1611_v33, %v3384_v15  ;;  %v1641_v23 = vsel %vm1640_vm14, %v1630_v34, %v3670_v38  ;;  %v1701_v61 = vsel %vm649_vm3, %v1691_v44, %v3930_v24 }
 0x355   :  { %v1631_v21 = vsel %vm638_vm2, %v1621_v36, %v4097_v5  ;;  %v1711_v6 = vsel %vm1640_vm14, %v1701_v61, %v3710_v25  ;;  %v1651_v15 = vsel %vm1328_vm12, %v1641_v23, %v3490_v30  ;;  %v1672_v62 = vsel %vm616_vm0, %v4258_v12, %v3788_v29  ;;  %v5491_v36 = vld [vmem:[#allocation130_spill] sm:$0xff] }
 0x356   :  { %1839 = vrot.lane.b32.xlu1 %v1358_v47, %s2286_s26  ;;  %1837 = vrot.lane.b32.xlu0 %v1338_v52, %s2286_s26  ;;  %v1642_v38 = vsel %vm1640_vm14, %v1631_v21, %v3668_v45  ;;  %v1721_v24 = vsel %vm725_vm9, %v1711_v6, %v1520_v60  ;;  %v1661_v5 = vsel %vm671_vm5, %v1651_v15, %v4260_v63  ;;  %v5488_v52 = vld [vmem:[#allocation110_spill] sm:$0xff]  ;;  %v5490_v47 = vld [vmem:[#allocation128_spill] sm:$0xff]  ;;  %v5492_v6 = vld [vmem:[#allocation153_spill] sm:$0xff] }
 0x357   :  { %v4601_v51 = vpop.permute.xlu1 %1525  ;;  %v1524_v22 = vpop.permute.xlu0 %1523  ;;  %v1652_v28 = vsel %vm1328_vm12, %v1642_v38, %v3488_v17  ;;  %v1673_v37 = vsel %vm616_vm0, %v4291_v2, %v5371_v50  ;;  %v1613_v16 = vsel %vm1609_vm13, %v5484_v57, %v4056_v42  ;;  %v1612_v41 = vsel %vm1609_vm13, %v4018_v19, %v4058_v10  ;;  %v5487_v42 = vld [vmem:[#allocation25_spill] sm:$0xff]  ;;  %v5489_v10 = vld [vmem:[#allocation111_spill] sm:$0xff]  ;;  %v5493_v38 = vld [vmem:[#allocation154_spill] sm:$0xff] }
 0x358   :  { %v1662_v30 = vsel %vm671_vm5, %v1652_v28, %v4258_v12  ;;  %v1683_v29 = vsel %vm1609_vm13, %v1673_v37, %v5372_v13  ;;  %v5485_v12 = vld [vmem:[#allocation63_spill] sm:$0xff]  ;;  %v1623_v46 = vsel %vm1297_vm11, %v1613_v16, %v5486_v35  ;;  %v1622_v60 = vsel %vm1297_vm11, %v1612_v41, %v5487_v42  ;;  %v5498_v41 = vld [vmem:[#allocation102_spill] sm:$0xff] }
 0x359   :  { %v1633_v15 = vsel %vm638_vm2, %v1623_v46, %v5492_v6  ;;  %v5502_v35 = vld [vmem:[#allocation151_spill] sm:$0xff]  ;;  %v5503_v46 = vld [vmem:[#allocation149_spill] sm:$0xff] }
 0x35a   :  { %1921 = vrot.lane.b32.xlu0 %v1661_v5, %s2291_s4  ;;  %1923 = vrot.lane.b32.xlu1 %v1721_v24, %s2291_s4  ;;  %v1632_v24 = vsel %vm638_vm2, %v1622_v60, %v5493_v38  ;;  %v5494_v5 = vld [vmem:[#allocation85_spill] sm:$0xff]  ;;  %v1615_v42 = vsel %vm1609_vm13, %v5503_v46, %v5502_v35  ;;  %v5504_v60 = vld [vmem:[#allocation152_spill] sm:$0xff]  ;;  %v5510_v6 = vld [vmem:[#allocation103_spill] sm:$0xff] }
 0x35b   :  { %v4612_v58 = vpop.permute.xlu1 %1529  ;;  %v4614_v25 = vpop.permute.xlu0 %1527  ;;  %v5511_v38 = vld [vmem:[#allocation12_spill] sm:$0xff]  ;;  %v5518_v35 = vld [vmem:[#allocation155_spill] sm:$0xff] }
 0x35c   :  { %v5519_v46 = vld [vmem:[#allocation156_spill] sm:$0xff] }
 0x35e   :  { %1927 = vrot.lane.b32.xlu1 %v1662_v30, %s2291_s4  ;;  %v5495_v30 = vld [vmem:[#allocation87_spill] sm:$0xff] }
 0x35f   :  { %v1534_v45 = vpop.permute.xlu1 %1533  ;;  %v4621_v18 = vpop.permute.xlu0 %1531 }
 0x360   :  { %v4624_v63 = vsel %vm725_vm9, %v1718_v0, %v1534_v45 }
 0x363   :  { %v1538_v9 = vpop.permute.xlu1 %1537  ;;  %v1536_v43 = vpop.permute.xlu0 %1535 }
 0x364   :  { %v4627_v33 = vsel %vm725_vm9, %v1720_v40, %v1538_v9  ;;  %v4630_v3 = vsel %vm725_vm9, %v1719_v8, %v1536_v43  ;;  %v1682_v40 = vsel %vm1609_vm13, %v1672_v62, %v3588_v49  ;;  %v1693_v8 = vsel %vm693_vm7, %v1683_v29, %v5485_v12  ;;  %v5497_v62 = vld [vmem:[#allocation78_spill] sm:$0xff]  ;;  %v5501_v12 = vld [vmem:[#allocation55_spill] sm:$0xff] }
 0x365   :  { %v1692_v50 = vsel %vm693_vm7, %v1682_v40, %v4412_v39  ;;  %v1703_v23 = vsel %vm649_vm3, %v1693_v8, %v5491_v36  ;;  %v1643_v37 = vsel %vm1640_vm14, %v1632_v24, %v5497_v62  ;;  %v5499_v40 = vld [vmem:[#allocation81_spill] sm:$0xff] }
 0x366   :  { %v1702_v39 = vsel %vm649_vm3, %v1692_v50, %v5490_v47  ;;  %v1713_v45 = vsel %vm1640_vm14, %v1703_v23, %v5495_v30  ;;  %v1674_v29 = vsel %vm616_vm0, %v5499_v40, %v5498_v41  ;;  %v5500_v50 = vld [vmem:[#allocation105_spill] sm:$0xff]  ;;  %v5508_v47 = vld [vmem:[#allocation62_spill] sm:$0xff]  ;;  %v5513_v30 = vld [vmem:[#allocation15_spill] sm:$0xff] }
 0x367   :  { %v1552_v17 = vpop.permute.xlu1 %1551  ;;  %v1550_v55 = vpop.permute.xlu0 %1549  ;;  %v1712_v28 = vsel %vm1640_vm14, %v1702_v39, %v5494_v5  ;;  %v1723_v16 = vsel %vm725_vm9, %v1713_v45, %v1524_v22  ;;  %v1675_v8 = vsel %vm616_vm0, %v5501_v12, %v5500_v50  ;;  %v1684_v39 = vsel %vm1609_vm13, %v1674_v29, %v5508_v47  ;;  %v5509_v36 = vld [vmem:[#allocation65_spill] sm:$0xff]  ;;  %v5512_v5 = vld [vmem:[#allocation26_spill] sm:$0xff] }
 0x368   :  { %v1732_v19 = vsel %vm616_vm0, %v1552_v17, %v5488_v52  ;;  %v1731_v49 = vsel %vm616_vm0, %v1550_v55, %v5489_v10  ;;  %v5496_v17 = vld [vmem:[#allocation77_spill] sm:$0xff]  ;;  %v1722_v57 = vsel %vm725_vm9, %v1712_v28, %v4583_v59  ;;  %v5505_v59 = vld [vmem:[#allocation150_spill] sm:$0xff]  ;;  %v1685_v23 = vsel %vm1609_vm13, %v1675_v8, %v5509_v36  ;;  %v5524_v36 = vld [vmem:[#allocation23_spill] sm:$0xff] }
 0x369   :  { %v1644_v55 = vsel %vm1640_vm14, %v1633_v15, %v5496_v17  ;;  %v1614_v22 = vsel %vm1609_vm13, %v5505_v59, %v5504_v60  ;;  %v5506_v10 = vld [vmem:[#allocation46_spill] sm:$0xff]  ;;  %v1694_v15 = vsel %vm693_vm7, %v1684_v39, %v5510_v6  ;;  %v1695_v24 = vsel %vm693_vm7, %v1685_v23, %v5511_v38  ;;  %v5514_v17 = vld [vmem:[#allocation112_spill] sm:$0xff]  ;;  %v5521_v59 = vld [vmem:[#allocation89_spill] sm:$0xff] }
 0x36a   :  { %v1625_v28 = vsel %vm1297_vm11, %v1615_v42, %v5512_v5  ;;  %v1624_v45 = vsel %vm1297_vm11, %v1614_v22, %v5513_v30  ;;  %v5520_v42 = vld [vmem:[#allocation86_spill] sm:$0xff]  ;;  %v5525_v23 = vld [vmem:[#allocation40_spill] sm:$0xff] }
 0x36b   :  { %v1556_v7 = vpop.permute.xlu1 %1555  ;;  %v1554_v1 = vpop.permute.xlu0 %1553 }
 0x36f   :  { %v4632_v54 = vpop.permute.xlu1 %1559  ;;  %v4634_v34 = vpop.permute.xlu0 %1557 }
 0x373   :  { %v4636_v27 = vpop.permute.xlu1 %1563  ;;  %v4638_v0 = vpop.permute.xlu0 %1561 }
 0x377   :  { %v4646_v44 = vpop.permute.xlu1 %1567  ;;  %v4648_v48 = vpop.permute.xlu0 %1565 }
 0x37b   :  { %v1582_v20 = vpop.permute.xlu1 %1581  ;;  %v1580_v13 = vpop.permute.xlu0 %1579 }
 0x37c   :  { %v1742_v61 = vsel %vm627_vm1, %v1732_v19, %v1582_v20  ;;  %v1741_v21 = vsel %vm627_vm1, %v1731_v49, %v1580_v13  ;;  %v1654_v49 = vsel %vm1328_vm12, %v1644_v55, %v5506_v10  ;;  %v5507_v20 = vld [vmem:[#allocation47_spill] sm:$0xff]  ;;  %v1734_v55 = vsel %vm616_vm0, %v1556_v7, %v5514_v17 }
 0x37d   :  { %1931 = vrot.lane.b32.xlu1 %v1742_v61, %s2291_s4  ;;  %1925 = vrot.lane.b32.xlu0 %v1741_v21, %s2291_s4  ;;  %v1653_v13 = vsel %vm1328_vm12, %v1643_v37, %v5507_v20  ;;  %v1664_v61 = vsel %vm671_vm5, %v1654_v49, %v5499_v40  ;;  %v5517_v40 = vld [vmem:[#allocation132_spill] sm:$0xff]  ;;  %v1635_v7 = vsel %vm638_vm2, %v1625_v28, %v5518_v35  ;;  %v5528_v28 = vld [vmem:[#allocation82_spill] sm:$0xff]  ;;  %v5529_v17 = vld [vmem:[#allocation19_spill] sm:$0xff] }
 0x37e   :  { %v1663_v21 = vsel %vm671_vm5, %v1653_v13, %v4291_v2  ;;  %v5515_v2 = vld [vmem:[#allocation113_spill] sm:$0xff]  ;;  %v1705_v29 = vsel %vm649_vm3, %v1695_v24, %v5517_v40  ;;  %v5523_v20 = vld [vmem:[#allocation80_spill] sm:$0xff] }
 0x37f   :  { %v1586_v9 = vpop.permute.xlu1 %1585  ;;  %v1584_v43 = vpop.permute.xlu0 %1583  ;;  %v1733_v62 = vsel %vm616_vm0, %v1554_v1, %v5515_v2  ;;  %v1634_v1 = vsel %vm638_vm2, %v1624_v45, %v5519_v46  ;;  %v1715_v22 = vsel %vm1640_vm14, %v1705_v29, %v5521_v59  ;;  %v5527_v24 = vld [vmem:[#allocation49_spill] sm:$0xff]  ;;  %v5533_v46 = vld [vmem:[#allocation24_spill] sm:$0xff] }
 0x380   :  { %v1744_v50 = vsel %vm627_vm1, %v1734_v55, %v1586_v9  ;;  %v1743_v8 = vsel %vm627_vm1, %v1733_v62, %v1584_v43  ;;  %v5522_v43 = vld [vmem:[#allocation79_spill] sm:$0xff]  ;;  %v1645_v13 = vsel %vm1640_vm14, %v1634_v1, %v5523_v20  ;;  %v1725_v39 = vsel %vm725_vm9, %v1715_v22, %v4614_v25  ;;  %v5531_v62 = vld [vmem:[#allocation114_spill] sm:$0xff] }
 0x381   :  { %1935 = vrot.lane.b32.xlu1 %v1723_v16, %s2291_s4  ;;  %1929 = vrot.lane.b32.xlu0 %v1722_v57, %s2291_s4  ;;  %v5516_v16 = vld [vmem:[#allocation129_spill] sm:$0xff]  ;;  %v1646_v49 = vsel %vm1640_vm14, %v1635_v7, %v5522_v43  ;;  %v5530_v55 = vld [vmem:[#allocation39_spill] sm:$0xff]  ;;  %v5534_v1 = vld [vmem:[#allocation42_spill] sm:$0xff] }
 0x382   :  { %v1704_v41 = vsel %vm649_vm3, %v1694_v15, %v5516_v16  ;;  %v5526_v15 = vld [vmem:[#allocation48_spill] sm:$0xff]  ;;  %v758_v2 = vsel %vm627_vm1, %v5530_v55, %v5529_v17  ;;  %v1736_v16 = vsel %vm616_vm0, %v4632_v54, %v5531_v62  ;;  %v5535_v22 = vld [vmem:[#allocation50_spill] sm:$0xff]  ;;  %v5537_v43 = vld [vmem:[#allocation51_spill] sm:$0xff] }
 0x383   :  { %v1590_v52 = vpop.permute.xlu1 %1589  ;;  %v1588_v19 = vpop.permute.xlu0 %1587  ;;  %v1714_v60 = vsel %vm1640_vm14, %v1704_v41, %v5520_v42  ;;  %v1656_v38 = vsel %vm1328_vm12, %v1646_v49, %v5526_v15  ;;  %v5532_v41 = vld [vmem:[#allocation115_spill] sm:$0xff]  ;;  %v759_v42 = vsel %vm627_vm1, %v5534_v1, %v5533_v46  ;;  %v5542_v15 = vld [vmem:[#allocation117_spill] sm:$0xff]  ;;  %v5546_v62 = vld [vmem:[#allocation14_spill] sm:$0xff] }
 0x384   :  { %v1724_v47 = vsel %vm725_vm9, %v1714_v60, %v4601_v51  ;;  %v1655_v51 = vsel %vm1328_vm12, %v1645_v13, %v5527_v24  ;;  %v1666_v30 = vsel %vm671_vm5, %v1656_v38, %v5528_v28  ;;  %v1735_v40 = vsel %vm616_vm0, %v4634_v34, %v5532_v41  ;;  %v5547_v41 = vld [vmem:[#allocation53_spill] sm:$0xff] }
 0x385   :  { %1939 = vrot.lane.b32.xlu1 %v1664_v61, %s2291_s4  ;;  %1933 = vrot.lane.b32.xlu0 %v1663_v21, %s2291_s4  ;;  %v757_v61 = vsel %vm627_vm1, %v5525_v23, %v5524_v36  ;;  %v1665_v45 = vsel %vm671_vm5, %v1655_v51, %v5501_v12  ;;  %v1726_v34 = vsel %vm725_vm9, %v4512_v11, %v4612_v58  ;;  %v5536_v11 = vld [vmem:[#allocation137_spill] sm:$0xff] }
 0x386   :  { %v1658_v58 = vsel %vm1328_vm12, %v5536_v11, %v5535_v22  ;;  %v5540_v36 = vld [vmem:[#allocation41_spill] sm:$0xff] }
 0x387   :  { %v4735_v37 = vpop.permute.xlu1 %1593  ;;  %v4737_v57 = vpop.permute.xlu0 %1591  ;;  %v1668_v13 = vsel %vm671_vm5, %v1658_v58, %v4343_v31  ;;  %v1737_v31 = vsel %vm616_vm0, %v4638_v0, %v5542_v15  ;;  %v5555_v15 = vld [vmem:[#allocation37_spill] sm:$0xff] }
 0x388   :  { %v1747_v51 = vsel %vm627_vm1, %v1737_v31, %v4737_v57  ;;  %v5544_v57 = vld [vmem:[#allocation22_spill] sm:$0xff]  ;;  %v5556_v31 = vld [vmem:[#allocation33_spill] sm:$0xff] }
 0x389   :  { %1943 = vrot.lane.b32.xlu1 %v1744_v50, %s2291_s4  ;;  %1937 = vrot.lane.b32.xlu0 %v1743_v8, %s2291_s4  ;;  %v1746_v50 = vsel %vm627_vm1, %v1736_v16, %v1590_v52  ;;  %v1745_v8 = vsel %vm627_vm1, %v1735_v40, %v1588_v19  ;;  %v1727_v52 = vsel %vm725_vm9, %v4549_v4, %v4621_v18  ;;  %v5538_v4 = vld [vmem:[#allocation13_spill] sm:$0xff]  ;;  %v5548_v40 = vld [vmem:[#allocation95_spill] sm:$0xff] }
 0x38a   :  { %v1657_v18 = vsel %vm1328_vm12, %v5538_v4, %v5537_v43 }
 0x38b   :  { %v4755_v10 = vpop.permute.xlu1 %1597  ;;  %v4757_v9 = vpop.permute.xlu0 %1595 }
 0x38d   :  { %1947 = vrot.lane.b32.xlu1 %v1725_v39, %s2291_s4  ;;  %1941 = vrot.lane.b32.xlu0 %v1724_v47, %s2291_s4  ;;  %v1667_v47 = vsel %vm671_vm5, %v1657_v18, %v4345_v53  ;;  %v5539_v39 = vld [vmem:[#allocation20_spill] sm:$0xff]  ;;  %v5553_v18 = vld [vmem:[#allocation34_spill] sm:$0xff] }
 0x38e   :  { %v760_v23 = vsel %vm627_vm1, %v5540_v36, %v5539_v39 }
 0x38f   :  { %v4772_v21 = vpop.permute.xlu1 %1783  ;;  %v1782_v6 = vpop.permute.xlu0 %1781 }
 0x390   :  { %v1841_v25 = vsel %vm693_vm7, %v1782_v6, %v4772_v21  ;;  %v2031_v5 = vsel %vm693_vm7, %v757_v61, %v1782_v6  ;;  %v5541_v61 = vld [vmem:[#allocation116_spill] sm:$0xff] }
 0x391   :  { %2053 = vst [vmem:[#allocation8 + $0x10] sm:$0xff] %v2031_v5  ;;  %2054 = vst [vmem:[#allocation8 + $0x18] sm:$0xff] %v1841_v25  ;;  %1951 = vrot.lane.b32.xlu1 %v1666_v30, %s2291_s4  ;;  %1945 = vrot.lane.b32.xlu0 %v1665_v45, %s2291_s4  ;;  %v1738_v6 = vsel %vm616_vm0, %v4636_v27, %v5541_v61 }
 0x392   :  { %v1748_v24 = vsel %vm627_vm1, %v1738_v6, %v4735_v37  ;;  %v5543_v37 = vld [vmem:[#allocation31_spill] sm:$0xff] }
 0x393   :  { %v1788_v29 = vpop.permute.xlu1 %1787  ;;  %v4796_v12 = vpop.permute.xlu0 %1785  ;;  %v761_v45 = vsel %vm627_vm1, %v5544_v57, %v5543_v37 }
 0x394   :  { %v2032_v35 = vsel %vm693_vm7, %v758_v2, %v1788_v29  ;;  %v5545_v2 = vld [vmem:[#allocation52_spill] sm:$0xff] }
 0x395   :  { %2060 = vst [vmem:[#allocation8 + $0x48] sm:$0xff] %v2032_v35  ;;  %1955 = vrot.lane.b32.xlu1 %v1746_v50, %s2291_s4  ;;  %1949 = vrot.lane.b32.xlu0 %v1745_v8, %s2291_s4  ;;  %v1660_v16 = vsel %vm1328_vm12, %v5546_v62, %v5545_v2  ;;  %v5549_v35 = vld [vmem:[#allocation30_spill] sm:$0xff] }
 0x397   :  { %v4803_v7 = vpop.permute.xlu1 %1791  ;;  %v4805_v54 = vpop.permute.xlu0 %1789 }
 0x398   :  { %v1843_v19 = vsel %vm693_vm7, %v1788_v29, %v4805_v54  ;;  %v1659_v29 = vsel %vm1328_vm12, %v5548_v40, %v5547_v41  ;;  %v1842_v41 = vsel %vm693_vm7, %v4772_v21, %v4796_v12 }
 0x399   :  { %2061 = vst [vmem:[#allocation8 + $0x50] sm:$0xff] %v1843_v19  ;;  %1959 = vrot.lane.b32.xlu1 %v1727_v52, %s2291_s4  ;;  %1953 = vrot.lane.b32.xlu0 %v1726_v34, %s2291_s4  ;;  %v1669_v8 = vsel %vm671_vm5, %v1659_v29, %v4383_v32  ;;  %v5550_v34 = vld [vmem:[#allocation16_spill] sm:$0xff]  ;;  %v1740_v19 = vsel %vm616_vm0, %v4646_v44, %v5481_v56 }
 0x39a   :  { %v762_v52 = vsel %vm627_vm1, %v5550_v34, %v5549_v35  ;;  %v1750_v1 = vsel %vm627_vm1, %v1740_v19, %v4755_v10  ;;  %v5551_v10 = vld [vmem:[#allocation35_spill] sm:$0xff] }
 0x39b   :  { %v1796_v60 = vpop.permute.xlu1 %1795  ;;  %v1794_v59 = vpop.permute.xlu0 %1793 }
 0x39c   :  { %v1845_v49 = vsel %vm693_vm7, %v1794_v59, %v1796_v60  ;;  %v2033_v20 = vsel %vm693_vm7, %v759_v42, %v1794_v59 }
 0x39d   :  { %2067 = vst [vmem:[#allocation8 + $0x80] sm:$0xff] %v2033_v20  ;;  %2068 = vst [vmem:[#allocation8 + $0x88] sm:$0xff] %v1845_v49  ;;  %1963 = vrot.lane.b32.xlu1 %v1668_v13, %s2291_s4  ;;  %1957 = vrot.lane.b32.xlu0 %v1667_v47, %s2291_s4  ;;  %v5554_v49 = vld [vmem:[#allocation28_spill] sm:$0xff] }
 0x39e   :  { %v764_v20 = vsel %vm627_vm1, %v5554_v49, %v5553_v18 }
 0x39f   :  { %v1800_v38 = vpop.permute.xlu1 %1799  ;;  %v1798_v53 = vpop.permute.xlu0 %1797 }
 0x3a0   :  { %v2034_v25 = vsel %vm693_vm7, %v760_v23, %v1800_v38  ;;  %v4849_v5 = vsel %vm693_vm7, %v1796_v60, %v1798_v53 }
 0x3a1   :  { %2074 = vst [vmem:[#allocation8 + $0xb8] sm:$0xff] %v2034_v25  ;;  %1967 = vrot.lane.b32.xlu1 %v1748_v24, %s2291_s4  ;;  %1961 = vrot.lane.b32.xlu0 %v1747_v51, %s2291_s4 }
 0x3a3   :  { %v1804_v27 = vpop.permute.xlu1 %1803 }
 0x3a4   :  { %v1802_v0 = vpop.permute.xlu0 %1801 }
 0x3a5   :  { %v1847_v28 = vsel %vm693_vm7, %v1800_v38, %v1802_v0  ;;  %v4855_v30 = vsel %vm693_vm7, %v1802_v0, %v1804_v27  ;;  %1971 = vrot.lane.b32.xlu1 %v4630_v3, %s2291_s4  ;;  %1965 = vrot.lane.b32.xlu0 %v4624_v63, %s2291_s4  ;;  %v1670_v63 = vsel %vm671_vm5, %v1660_v16, %v4381_v26  ;;  %v5557_v27 = vld [vmem:[#allocation36_spill] sm:$0xff] }
 0x3a6   :  { %2075 = vst [vmem:[#allocation8 + $0xc0] sm:$0xff] %v1847_v28  ;;  %v1739_v26 = vsel %vm616_vm0, %v4648_v48, %v5472_v14  ;;  %v765_v38 = vsel %vm627_vm1, %v5556_v31, %v5555_v15  ;;  %v5558_v0 = vld [vmem:[#allocation32_spill] sm:$0xff] }
 0x3a7   :  { %v1808_v17 = vpop.permute.xlu1 %1807  ;;  %v1749_v42 = vsel %vm627_vm1, %v1739_v26, %v4757_v9  ;;  %v5552_v9 = vld [vmem:[#allocation29_spill] sm:$0xff]  ;;  %v766_v28 = vsel %vm627_vm1, %v5558_v0, %v5557_v27 }
 0x3a8   :  { %v1806_v55 = vpop.permute.xlu0 %1805  ;;  %v763_v22 = vsel %vm627_vm1, %v5552_v9, %v5551_v10 }
 0x3a9   :  { %v1849_v50 = vsel %vm693_vm7, %v1806_v55, %v1808_v17  ;;  %v2035_v3 = vsel %vm693_vm7, %v761_v45, %v1806_v55  ;;  %1975 = vrot.lane.b32.xlu1 %v1670_v63, %s2291_s4  ;;  %1969 = vrot.lane.b32.xlu0 %v1669_v8, %s2291_s4  ;;  %v1844_v63 = vsel %vm693_vm7, %v4805_v54, %v4803_v7 }
 0x3aa   :  { %2081 = vst [vmem:[#allocation8 + $0xf0] sm:$0xff] %v2035_v3  ;;  %2082 = vst [vmem:[#allocation8 + $0xf8] sm:$0xff] %v1849_v50 }
 0x3ab   :  { %v1812_v46 = vpop.permute.xlu1 %1811 }
 0x3ac   :  { %v1810_v32 = vpop.permute.xlu0 %1809  ;;  %v2036_v60 = vsel %vm693_vm7, %v762_v52, %v1812_v46 }
 0x3ad   :  { %v4893_v59 = vsel %vm693_vm7, %v1808_v17, %v1810_v32  ;;  %2088 = vst [vmem:[#allocation8 + $0x128] sm:$0xff] %v2036_v60  ;;  %1979 = vrot.lane.b32.xlu1 %v1750_v1, %s2291_s4  ;;  %1973 = vrot.lane.b32.xlu0 %v1749_v42, %s2291_s4 }
 0x3b0   :  { %v1816_v56 = vpop.permute.xlu1 %1815  ;;  %v1814_v14 = vpop.permute.xlu0 %1813 }
 0x3b1   :  { %v1851_v44 = vsel %vm693_vm7, %v1812_v46, %v1814_v14  ;;  %v4899_v48 = vsel %vm693_vm7, %v1814_v14, %v1816_v56  ;;  %1977 = vrot.lane.b32.xlu0 %v4627_v33, %s2291_s4 }
 0x3b2   :  { %2089 = vst [vmem:[#allocation8 + $0x130] sm:$0xff] %v1851_v44 }
 0x3b4   :  { %v1820_v11 = vpop.permute.xlu1 %1819  ;;  %v1818_v58 = vpop.permute.xlu0 %1817 }
 0x3b5   :  { %v1853_v43 = vsel %vm693_vm7, %v1818_v58, %v1820_v11  ;;  %v2037_v4 = vsel %vm693_vm7, %v763_v22, %v1818_v58 }
 0x3b6   :  { %2095 = vst [vmem:[#allocation8 + $0x160] sm:$0xff] %v2037_v4  ;;  %2096 = vst [vmem:[#allocation8 + $0x168] sm:$0xff] %v1853_v43 }
 0x3b8   :  { %v1824_v13 = vpop.permute.xlu1 %1823  ;;  %v1822_v47 = vpop.permute.xlu0 %1821 }
 0x3b9   :  { %v2038_v33 = vsel %vm693_vm7, %v764_v20, %v1824_v13  ;;  %v4913_v39 = vsel %vm693_vm7, %v1820_v11, %v1822_v47 }
 0x3ba   :  { %2102 = vst [vmem:[#allocation8 + $0x198] sm:$0xff] %v2038_v33 }
 0x3bc   :  { %v1828_v36 = vpop.permute.xlu1 %1827  ;;  %v1826_v23 = vpop.permute.xlu0 %1825 }
 0x3bd   :  { %v1855_v61 = vsel %vm693_vm7, %v1824_v13, %v1826_v23  ;;  %v4917_v6 = vsel %vm693_vm7, %v1826_v23, %v1828_v36 }
 0x3be   :  { %2103 = vst [vmem:[#allocation8 + $0x1a0] sm:$0xff] %v1855_v61 }
 0x3c0   :  { %v1832_v53 = vpop.permute.xlu1 %1831  ;;  %v1830_v24 = vpop.permute.xlu0 %1829 }
 0x3c1   :  { %v1857_v51 = vsel %vm693_vm7, %v1830_v24, %v1832_v53  ;;  %v2039_v25 = vsel %vm693_vm7, %v765_v38, %v1830_v24 }
 0x3c2   :  { %2109 = vst [vmem:[#allocation8 + $0x1d0] sm:$0xff] %v2039_v25  ;;  %2110 = vst [vmem:[#allocation8 + $0x1d8] sm:$0xff] %v1857_v51 }
 0x3c4   :  { %v1836_v37 = vpop.permute.xlu1 %1835  ;;  %v1834_v57 = vpop.permute.xlu0 %1833 }
 0x3c5   :  { %v2040_v45 = vsel %vm693_vm7, %v766_v28, %v1836_v37  ;;  %v4929_v17 = vsel %vm693_vm7, %v1832_v53, %v1834_v57 }
 0x3c6   :  { %2116 = vst [vmem:[#allocation8 + $0x208] sm:$0x7] %v2040_v45 }
 0x3c8   :  { %v1840_v55 = vpop.permute.xlu1 %1839  ;;  %v1838_v2 = vpop.permute.xlu0 %1837 }
 0x3c9   :  { %v1859_v62 = vsel %vm693_vm7, %v1836_v37, %v1838_v2  ;;  %v4933_v16 = vsel %vm693_vm7, %v1838_v2, %v1840_v55 }
 0x3ca   :  { %2117 = vst [vmem:[#allocation8 + $0x210] sm:$0x7] %v1859_v62 }
 0x3cc   :  { %v1924_v40 = vpop.permute.xlu1 %1923  ;;  %v1922_v29 = vpop.permute.xlu0 %1921 }
 0x3cd   :  { %v1981_v50 = vsel %vm649_vm3, %v1922_v29, %v1924_v40  ;;  %v2041_v3 = vsel %vm649_vm3, %v1842_v41, %v1922_v29 }
 0x3ce   :  { %2055 = vst [vmem:[#allocation8 + $0x20] sm:$0xff] %v2041_v3  ;;  %2056 = vst [vmem:[#allocation8 + $0x28] sm:$0xff] %v1981_v50 }
 0x3d0   :  { %v1928_v8 = vpop.permute.xlu1 %1927 }
 0x3d1   :  { %v2042_v35 = vsel %vm649_vm3, %v1844_v63, %v1928_v8 }
 0x3d2   :  { %2062 = vst [vmem:[#allocation8 + $0x58] sm:$0xff] %v2042_v35 }
 0x3ef   :  { %v1932_v34 = vpop.permute.xlu1 %1931  ;;  %v1926_v52 = vpop.permute.xlu0 %1925 }
 0x3f0   :  { %v1982_v21 = vsel %vm649_vm3, %v1924_v40, %v1926_v52 }
 0x3f1   :  { %2057 = vst [vmem:[#allocation8 + $0x30] sm:$0xff] %v1982_v21 }
 0x3f3   :  { %v1936_v12 = vpop.permute.xlu1 %1935  ;;  %v1930_v19 = vpop.permute.xlu0 %1929 }
 0x3f4   :  { %v1983_v26 = vsel %vm649_vm3, %v1928_v8, %v1930_v19  ;;  %v1984_v46 = vsel %vm649_vm3, %v1930_v19, %v1932_v34 }
 0x3f5   :  { %2063 = vst [vmem:[#allocation8 + $0x60] sm:$0xff] %v1983_v26  ;;  %2064 = vst [vmem:[#allocation8 + $0x68] sm:$0xff] %v1984_v46 }
 0x3f7   :  { %v1940_v32 = vpop.permute.xlu1 %1939  ;;  %v1934_v1 = vpop.permute.xlu0 %1933 }
 0x3f8   :  { %v2044_v7 = vsel %vm649_vm3, %v4855_v30, %v1940_v32  ;;  %v1985_v54 = vsel %vm649_vm3, %v1934_v1, %v1936_v12  ;;  %v2043_v42 = vsel %vm649_vm3, %v4849_v5, %v1934_v1 }
 0x3f9   :  { %2076 = vst [vmem:[#allocation8 + $0xc8] sm:$0xff] %v2044_v7  ;;  %2069 = vst [vmem:[#allocation8 + $0x90] sm:$0xff] %v2043_v42 }
 0x3fa   :  { %2070 = vst [vmem:[#allocation8 + $0x98] sm:$0xff] %v1985_v54 }
 0x3fb   :  { %v1944_v60 = vpop.permute.xlu1 %1943  ;;  %v1938_v56 = vpop.permute.xlu0 %1937 }
 0x3fc   :  { %v1986_v14 = vsel %vm649_vm3, %v1936_v12, %v1938_v56 }
 0x3fd   :  { %2071 = vst [vmem:[#allocation8 + $0xa0] sm:$0xff] %v1986_v14 }
 0x3ff   :  { %v1948_v44 = vpop.permute.xlu1 %1947  ;;  %v1942_v10 = vpop.permute.xlu0 %1941 }
 0x400   :  { %v1987_v9 = vsel %vm649_vm3, %v1940_v32, %v1942_v10  ;;  %v1988_v22 = vsel %vm649_vm3, %v1942_v10, %v1944_v60 }
 0x401   :  { %2077 = vst [vmem:[#allocation8 + $0xd0] sm:$0xff] %v1987_v9  ;;  %2078 = vst [vmem:[#allocation8 + $0xd8] sm:$0xff] %v1988_v22 }
 0x403   :  { %v1952_v30 = vpop.permute.xlu1 %1951  ;;  %v1946_v11 = vpop.permute.xlu0 %1945 }
 0x404   :  { %v2046_v5 = vsel %vm649_vm3, %v4899_v48, %v1952_v30  ;;  %v1989_v58 = vsel %vm649_vm3, %v1946_v11, %v1948_v44  ;;  %v2045_v43 = vsel %vm649_vm3, %v4893_v59, %v1946_v11 }
 0x405   :  { %2090 = vst [vmem:[#allocation8 + $0x138] sm:$0xff] %v2046_v5  ;;  %2083 = vst [vmem:[#allocation8 + $0x100] sm:$0xff] %v2045_v43 }
 0x406   :  { %2084 = vst [vmem:[#allocation8 + $0x108] sm:$0xff] %v1989_v58 }
 0x407   :  { %v1956_v4 = vpop.permute.xlu1 %1955  ;;  %v1950_v18 = vpop.permute.xlu0 %1949 }
 0x408   :  { %v1990_v49 = vsel %vm649_vm3, %v1948_v44, %v1950_v18 }
 0x409   :  { %2085 = vst [vmem:[#allocation8 + $0x110] sm:$0xff] %v1990_v49 }
 0x40b   :  { %v1960_v20 = vpop.permute.xlu1 %1959  ;;  %v1954_v13 = vpop.permute.xlu0 %1953 }
 0x40c   :  { %v1991_v47 = vsel %vm649_vm3, %v1952_v30, %v1954_v13  ;;  %v1992_v33 = vsel %vm649_vm3, %v1954_v13, %v1956_v4 }
 0x40d   :  { %2091 = vst [vmem:[#allocation8 + $0x140] sm:$0xff] %v1991_v47  ;;  %2092 = vst [vmem:[#allocation8 + $0x148] sm:$0xff] %v1992_v33 }
 0x40f   :  { %v1964_v48 = vpop.permute.xlu1 %1963  ;;  %v1958_v36 = vpop.permute.xlu0 %1957 }
 0x410   :  { %v2048_v59 = vsel %vm649_vm3, %v4917_v6, %v1964_v48  ;;  %v1993_v23 = vsel %vm649_vm3, %v1958_v36, %v1960_v20  ;;  %v2047_v61 = vsel %vm649_vm3, %v4913_v39, %v1958_v36 }
 0x411   :  { %2104 = vst [vmem:[#allocation8 + $0x1a8] sm:$0xff] %v2048_v59  ;;  %2097 = vst [vmem:[#allocation8 + $0x170] sm:$0xff] %v2047_v61 }
 0x412   :  { %2098 = vst [vmem:[#allocation8 + $0x178] sm:$0xff] %v1993_v23 }
 0x413   :  { %v1968_v15 = vpop.permute.xlu1 %1967  ;;  %v1962_v31 = vpop.permute.xlu0 %1961 }
 0x414   :  { %v1994_v38 = vsel %vm649_vm3, %v1960_v20, %v1962_v31 }
 0x415   :  { %2099 = vst [vmem:[#allocation8 + $0x180] sm:$0xff] %v1994_v38 }
 0x417   :  { %v1972_v53 = vpop.permute.xlu1 %1971  ;;  %v1966_v24 = vpop.permute.xlu0 %1965 }
 0x418   :  { %v1995_v51 = vsel %vm649_vm3, %v1964_v48, %v1966_v24  ;;  %v1996_v25 = vsel %vm649_vm3, %v1966_v24, %v1968_v15 }
 0x419   :  { %2105 = vst [vmem:[#allocation8 + $0x1b0] sm:$0xff] %v1995_v51  ;;  %2106 = vst [vmem:[#allocation8 + $0x1b8] sm:$0xff] %v1996_v25 }
 0x41b   :  { %v1976_v6 = vpop.permute.xlu1 %1975  ;;  %v1970_v27 = vpop.permute.xlu0 %1969 }
 0x41c   :  { %v2050_v39 = vsel %vm649_vm3, %v4933_v16, %v1976_v6  ;;  %v1997_v0 = vsel %vm649_vm3, %v1970_v27, %v1972_v53  ;;  %v2049_v28 = vsel %vm649_vm3, %v4929_v17, %v1970_v27 }
 0x41d   :  { %2118 = vst [vmem:[#allocation8 + $0x218] sm:$0x7] %v2050_v39  ;;  %2111 = vst [vmem:[#allocation8 + $0x1e0] sm:$0xff] %v2049_v28 }
 0x41e   :  { %2112 = vst [vmem:[#allocation8 + $0x1e8] sm:$0xff] %v1997_v0 }
 0x41f   :  { %v1974_v37 = vpop.permute.xlu0 %1973  ;;  %v1980_v45 = vpop.permute.xlu1 %1979 }
 0x420   :  { %v1998_v57 = vsel %vm649_vm3, %v1972_v53, %v1974_v37 }
 0x421   :  { %2113 = vst [vmem:[#allocation8 + $0x1f0] sm:$0xff] %v1998_v57 }
 0x423   :  { %v1978_v55 = vpop.permute.xlu0 %1977 }
 0x424   :  { %v1999_v2 = vsel %vm649_vm3, %v1976_v6, %v1978_v55  ;;  %v2000_v62 = vsel %vm649_vm3, %v1978_v55, %v1980_v45 }
 0x425   :  { %2119 = vst [vmem:[#allocation8 + $0x220] sm:$0x7] %v1999_v2  ;;  %2120 = vst [vmem:[#allocation8 + $0x228] sm:$0x7] %v2000_v62 }
 0x426   :  { %2259 = shalt.err (!%p2256_p0)
}
 0x427   :  { %s2260_s13 = scalar_lea.hbm %s4995_s3, 8960 }
 0x428   :  { %p2261_p1 = scmp.ne.s32.totalorder %s4995_s3, %s2260_s13  ;;  %p2264_p2 = scmp.lt.u32.totalorder %s2260_s13, %s4995_s3 }
 0x42a   :  { %p2266_p3 = pnand %p2264_p2, %p2261_p1 }
 0x42c   :  { %2269 = shalt.err (!%p2266_p3)
}
 0x42d   :  { %s2298_s18 = smov 896  }
 0x42e   :  { %2132 = dma.vmem_to_hbm [thread:$0]  %s2127_s9, 8960, %s4995_s3, [#allocation4], %s2298_s18, %s2298_s18, %s2296_s1  }
 0x42f   :  { %2274 = dma.done.wait [#allocation4], 8960  }
 0x430   :  { %2275 = vsyncadd [#allocation4], 4294958336 }
 0x431   :  { %2136 = vsyncpa [#allocation3], 1 }
 0x432   :  { %2137 = vsyncpa [#allocation6], 1 }
 0x433   :  { %2138 = vsyncpa [#allocation4], 1 }

</bundles_post_ra>
